<compile_context>
chip_gen: v7x
topology: tpu7x:2x2x1
jax: 0.10.0
libtpu: 0.0.40
codegen_flags: <defaults>
</compile_context>

<pallas_src>
import functools

import jax
import jax.numpy as jnp
from jax import lax
from jax.experimental import pallas as pl
from jax.experimental.pallas import tpu as pltpu


def _round_up(x, m):
    return (x + m - 1) // m * m


def _mdnrnn_kernel(G, Z,
                   x_ref, h0_ref, c0_ref,
                   wih_ref, wfused_ref, bg_ref, bh_ref,
                   out_ref, hout_ref, cout_ref,
                   xproj_ref):
    T, B, OUT_W = out_ref.shape
    HPAD = hout_ref.shape[1]          # per-gate lane segment == padded hidden width
    NG = 4 * HPAD                     # width of the padded gate block
    GZ = G * Z

    # ---- hoisted input projection: all T timesteps in one MXU pass (bias folded in) ----
    xproj_ref[...] = (
        jnp.dot(x_ref[...].astype(jnp.bfloat16), wih_ref[...],
                preferred_element_type=jnp.float32)
        + bg_ref[...])                                            # (T*B, 4*HPAD)

    def step(t, carry):
        h, c = carry                                              # (B, HPAD) f32
        # One fused matmul per step: [ gate pre-acts | MDN head linear of h_{t-1} ].
        fused = jnp.dot(h.astype(jnp.bfloat16), wfused_ref[...],
                        preferred_element_type=jnp.float32)       # (B, NG + OUT_W)

        # Head outputs ride along one step late: write to row t-1.  At t==0 this is a
        # dummy write to row 0 that t==1 overwrites; row T-1 is filled after the loop.
        out_ref[jnp.maximum(t - 1, 0)] = fused[:, NG:]

        gates = fused[:, :NG] + xproj_ref[pl.ds(t * B, B), :]     # (B, 4*HPAD)
        # Each gate lives in its own 128-lane segment -> whole-vreg slices, no shuffles.
        i_g = jax.nn.sigmoid(gates[:, 0 * HPAD:1 * HPAD])
        f_g = jax.nn.sigmoid(gates[:, 1 * HPAD:2 * HPAD])
        g_g = jnp.tanh(gates[:, 2 * HPAD:3 * HPAD])
        o_g = jax.nn.sigmoid(gates[:, 3 * HPAD:4 * HPAD])
        c_new = f_g * c + i_g * g_g
        h_new = o_g * jnp.tanh(c_new)
        return h_new, c_new

    h_f, c_f = lax.fori_loop(0, T, step, (h0_ref[...], c0_ref[...]), unroll=True)
    hout_ref[...] = h_f
    cout_ref[...] = c_f

    # MDN heads of the final hidden state (completes the 1-step shift).
    out_ref[T - 1] = jnp.dot(h_f.astype(jnp.bfloat16), wfused_ref[...][:, NG:],
                             preferred_element_type=jnp.float32)

    # ---- one-shot epilogue: bias add, softmax over gaussians (groups of Z), exp ----
    raw = out_ref[...] + bh_ref[...]                              # (T, B, OUT_W)
    out_ref[...] = raw                                            # lane-dense store (mu + pad)
    out_ref[:, :, 2 * GZ:3 * GZ] = jnp.exp(raw[:, :, 2 * GZ:3 * GZ])   # sigma

    pi_lin = raw[:, :, 0:GZ]
    m = pi_lin[:, :, 0:Z]
    for g in range(1, G):
        m = jnp.maximum(m, pi_lin[:, :, g * Z:(g + 1) * Z])
    exps = [jnp.exp(pi_lin[:, :, g * Z:(g + 1) * Z] - m) for g in range(G)]
    den = exps[0]
    for e in exps[1:]:
        den = den + e
    inv = pl.reciprocal(den, approx=True)
    out_ref[:, :, 0:GZ] = jnp.concatenate([e * inv for e in exps], axis=-1)


def mdnrnn_forward(x, h, params, *, n_hidden, n_gaussians, z_size):
    """x: (B, T, z_size); h = (h0, c0) each (n_layers=1, B, n_hidden)."""
    h0, c0 = h
    B, T, Z = x.shape
    H = n_hidden
    G = n_gaussians
    GZ = G * Z
    HPAD = _round_up(H, 128)           # per-gate lane segment / padded hidden width
    OUT_W = _round_up(3 * GZ, 128)     # lane-dense packed [pi | mu | sigma | pad]

    f32, bf16 = jnp.float32, jnp.bfloat16

    # --- parameter prep (glue): pad weights into lane-aligned layouts, cast to bf16 ---
    wih, whh, b_lstm = params["wih_t"], params["whh_t"], params["b_lstm"]
    w1, w2, w3 = params["w1_t"], params["w2_t"], params["w3_t"]
    b1, b2, b3 = params["b1"], params["b2"], params["b3"]

    wih_p = jnp.zeros((Z, 4 * HPAD), f32)
    whh_p = jnp.zeros((HPAD, 4 * HPAD), f32)
    bg_p = jnp.zeros((1, 4 * HPAD), f32)
    for g in range(4):
        wih_p = wih_p.at[:, g * HPAD:g * HPAD + H].set(wih[:, g * H:(g + 1) * H])
        whh_p = whh_p.at[:H, g * HPAD:g * HPAD + H].set(whh[:, g * H:(g + 1) * H])
        bg_p = bg_p.at[:, g * HPAD:g * HPAD + H].set(b_lstm[:, g * H:(g + 1) * H])

    wheads_p = jnp.zeros((HPAD, OUT_W), f32)
    wheads_p = wheads_p.at[:H, 0:GZ].set(w1)
    wheads_p = wheads_p.at[:H, GZ:2 * GZ].set(w2)
    wheads_p = wheads_p.at[:H, 2 * GZ:3 * GZ].set(w3)

    bh_p = jnp.zeros((1, 1, OUT_W), f32)
    bh_p = bh_p.at[:, :, 0:GZ].set(b1[:, None, :])
    bh_p = bh_p.at[:, :, GZ:2 * GZ].set(b2[:, None, :])
    bh_p = bh_p.at[:, :, 2 * GZ:3 * GZ].set(b3[:, None, :])

    wfused = jnp.concatenate([whh_p, wheads_p], axis=1).astype(bf16)   # (HPAD, 4*HPAD+OUT_W)
    wih_b = wih_p.astype(bf16)

    h0_p = jnp.zeros((B, HPAD), f32).at[:, :H].set(h0[0])
    c0_p = jnp.zeros((B, HPAD), f32).at[:, :H].set(c0[0])

    # time-major, rows ordered as t*B + b
    x2d = jnp.transpose(x, (1, 0, 2)).reshape(T * B, Z).astype(f32)

    kernel = functools.partial(_mdnrnn_kernel, G, Z)
    vmem = pl.BlockSpec(memory_space=pltpu.MemorySpace.VMEM)

    out_shapes = (
        jax.ShapeDtypeStruct((T, B, OUT_W), f32),   # packed [pi | mu | sigma | pad]
        jax.ShapeDtypeStruct((B, HPAD), f32),       # h_T (lane-padded)
        jax.ShapeDtypeStruct((B, HPAD), f32),       # c_T (lane-padded)
    )

    packed, h_out, c_out = pl.pallas_call(
        kernel,
        out_shape=out_shapes,
        in_specs=[vmem] * 7,
        out_specs=(vmem, vmem, vmem),
        scratch_shapes=[pltpu.VMEM((T * B, 4 * HPAD), f32)],
    )(x2d, h0_p, c0_p, wih_b, wfused, bg_p, bh_p)

    # glue: split packed heads and go back to the PyTorch layout (B, T, G, Z)
    def seg(start):
        return jnp.transpose(
            packed[:, :, start:start + GZ].reshape(T, B, G, Z), (1, 0, 2, 3))

    pi = seg(0)
    mu = seg(GZ)
    sigma = seg(2 * GZ)
    return (pi, mu, sigma), (h_out[:, :H][None], c_out[:, :H][None])


def mdnrnn_reference(x, h, params, *, n_hidden, n_gaussians, z_size):
    """Pure-JAX f32 reference mirroring torch nn.LSTM(batch_first) + MDN heads."""
    h0, c0 = h
    B, T, Z = x.shape
    H = n_hidden
    G = n_gaussians
    wih, whh, b = params["wih_t"], params["whh_t"], params["b_lstm"]

    def cell(carry, x_t):
        hh, cc = carry
        gates = x_t @ wih + hh @ whh + b
        i_g = jax.nn.sigmoid(gates[:, 0 * H:1 * H])
        f_g = jax.nn.sigmoid(gates[:, 1 * H:2 * H])
        g_g = jnp.tanh(gates[:, 2 * H:3 * H])
        o_g = jax.nn.sigmoid(gates[:, 3 * H:4 * H])
        cc = f_g * cc + i_g * g_g
        hh = o_g * jnp.tanh(cc)
        return (hh, cc), hh

    (h_T, c_T), ys = lax.scan(cell, (h0[0], c0[0]), jnp.transpose(x, (1, 0, 2)))
    y = jnp.transpose(ys, (1, 0, 2))  # (B, T, H)

    pi = (y @ params["w1_t"] + params["b1"]).reshape(B, T, G, Z)
    mu = (y @ params["w2_t"] + params["b2"]).reshape(B, T, G, Z)
    sigma = jnp.exp((y @ params["w3_t"] + params["b3"]).reshape(B, T, G, Z))
    pi = jax.nn.softmax(pi, axis=2)
    return (pi, mu, sigma), (h_T[None], c_T[None])


def init_params(key, *, z_size, n_hidden, n_gaussians):
    H, Z, G = n_hidden, z_size, n_gaussians
    k = 1.0 / jnp.sqrt(jnp.float32(H))
    keys = jax.random.split(key, 10)

    def u(kk, shape):
        return jax.random.uniform(kk, shape, jnp.float32, -k, k)

    return {
        # transposed LSTM weights (torch weight_ih_l0 is (4H, Z) -> here (Z, 4H))
        "wih_t": u(keys[0], (Z, 4 * H)),
        "whh_t": u(keys[1], (H, 4 * H)),
        "b_lstm": u(keys[2], (1, 4 * H)) + u(keys[3], (1, 4 * H)),  # b_ih + b_hh
        "w1_t": u(keys[4], (H, G * Z)),
        "b1": u(keys[5], (1, G * Z)),
        "w2_t": u(keys[6], (H, G * Z)),
        "b2": u(keys[7], (1, G * Z)),
        "w3_t": u(keys[8], (H, G * Z)),
        "b3": u(keys[9], (1, G * Z)),
    }


if __name__ == "__main__":
    Z_SIZE, N_HIDDEN, N_GAUSS, N_LAYERS = 4, 32, 5, 1
    B, T = 2, 8

    root = jax.random.PRNGKey(0)
    k_x, k_p = jax.random.split(root)

    x = jax.random.normal(k_x, (B, T, Z_SIZE), jnp.float32)
    h0 = jnp.zeros((N_LAYERS, B, N_HIDDEN), jnp.float32)
    c0 = jnp.zeros((N_LAYERS, B, N_HIDDEN), jnp.float32)
    params = init_params(k_p, z_size=Z_SIZE, n_hidden=N_HIDDEN, n_gaussians=N_GAUSS)

    (pi, mu, sigma), (h_T, c_T) = mdnrnn_forward(
        x, (h0, c0), params, n_hidden=N_HIDDEN, n_gaussians=N_GAUSS, z_size=Z_SIZE)
    jax.block_until_ready((pi, mu, sigma, h_T, c_T))

    # sanity-check against a pure-JAX f32 reference; the kernel uses bf16 MXU operands
    # (per perf review), so use a bf16-appropriate tolerance.
    (pi_r, mu_r, sg_r), (h_r, c_r) = mdnrnn_reference(
        x, (h0, c0), params, n_hidden=N_HIDDEN, n_gaussians=N_GAUSS, z_size=Z_SIZE)

    assert pi.shape == (B, T, N_GAUSS, Z_SIZE) and sigma.shape == pi.shape
    assert mu.shape == pi.shape
    assert h_T.shape == (N_LAYERS, B, N_HIDDEN) and c_T.shape == h_T.shape
    for a, b_ in ((pi, pi_r), (mu, mu_r), (sigma, sg_r), (h_T, h_r), (c_T, c_r)):
        assert jnp.allclose(a, b_, rtol=1e-2, atol=1e-2), "mismatch vs reference"

    print("KERNEL_OK")
</pallas_src>

<mosaic_0001>
module attributes {stable_mosaic.version = 11 : i64} {
  func.func @_mdnrnn_kernel(%arg0: memref<16x4xf32, #tpu.memory_space<vmem>>, %arg1: memref<2x128xf32, #tpu.memory_space<vmem>>, %arg2: memref<2x128xf32, #tpu.memory_space<vmem>>, %arg3: memref<4x512xbf16, #tpu.memory_space<vmem>>, %arg4: memref<128x640xbf16, #tpu.memory_space<vmem>>, %arg5: memref<1x512xf32, #tpu.memory_space<vmem>>, %arg6: memref<1x1x128xf32, #tpu.memory_space<vmem>>, %arg7: memref<8x2x128xf32, #tpu.memory_space<vmem>>, %arg8: memref<2x128xf32, #tpu.memory_space<vmem>>, %arg9: memref<2x128xf32, #tpu.memory_space<vmem>>, %arg10: memref<16x512xf32, #tpu.memory_space<vmem>>) attributes {dimension_semantics = [], scalar_prefetch = 0 : i64, scratch_operands = 1 : i64, tpu.core_type = #tpu.core_type<tc>} {
    %c0 = arith.constant 0 : index
    %c0_0 = arith.constant 0 : index
    %0 = vector.load %arg0[%c0, %c0_0] : memref<16x4xf32, #tpu.memory_space<vmem>>, vector<16x4xf32>
    %1 = arith.truncf %0 : vector<16x4xf32> to vector<16x4xbf16>
    %c0_1 = arith.constant 0 : index
    %c0_2 = arith.constant 0 : index
    %2 = vector.load %arg3[%c0_1, %c0_2] : memref<4x512xbf16, #tpu.memory_space<vmem>>, vector<4x512xbf16>
    %cst = arith.constant dense<0.000000e+00> : vector<16x512xf32>
    %3 = tpu.matmul %1, %2, %cst {dimension_numbers = #tpu.dot_dimension_numbers<[1], [0], [0], [1], [0, 0, 1, 1], [], []>} : vector<16x4xbf16>, vector<4x512xbf16>, vector<16x512xf32> -> vector<16x512xf32>
    %c0_3 = arith.constant 0 : index
    %c0_4 = arith.constant 0 : index
    %4 = vector.load %arg5[%c0_3, %c0_4] : memref<1x512xf32, #tpu.memory_space<vmem>>, vector<1x512xf32>
    %5 = vector.broadcast %4 : vector<1x512xf32> to vector<16x512xf32>
    %6 = arith.addf %3, %5 : vector<16x512xf32>
    %c0_5 = arith.constant 0 : index
    %c0_6 = arith.constant 0 : index
    %7 = vector.load %arg10[%c0_5, %c0_6] : memref<16x512xf32, #tpu.memory_space<vmem>>, vector<16x512xf32>
    tpu.vector_store %arg10[%c0_5, %c0_6], %6 {strides = array<i32>} : memref<16x512xf32, #tpu.memory_space<vmem>>, vector<16x512xf32>,
    %c0_7 = arith.constant 0 : index
    %c0_8 = arith.constant 0 : index
    %8 = vector.load %arg1[%c0_7, %c0_8] : memref<2x128xf32, #tpu.memory_space<vmem>>, vector<2x128xf32>
    %c0_9 = arith.constant 0 : index
    %c0_10 = arith.constant 0 : index
    %9 = vector.load %arg2[%c0_9, %c0_10] : memref<2x128xf32, #tpu.memory_space<vmem>>, vector<2x128xf32>
    %c0_i32 = arith.constant 0 : i32
    %10 = arith.truncf %8 : vector<2x128xf32> to vector<2x128xbf16>
    %c0_11 = arith.constant 0 : index
    %c0_12 = arith.constant 0 : index
    %11 = vector.load %arg4[%c0_11, %c0_12] : memref<128x640xbf16, #tpu.memory_space<vmem>>, vector<128x640xbf16>
    %cst_13 = arith.constant dense<0.000000e+00> : vector<2x640xf32>
    %12 = tpu.matmul %10, %11, %cst_13 {dimension_numbers = #tpu.dot_dimension_numbers<[1], [0], [0], [1], [0, 0, 1, 1], [], []>} : vector<2x128xbf16>, vector<128x640xbf16>, vector<2x640xf32> -> vector<2x640xf32>
    %13 = vector.extract_strided_slice %12 {offsets = [0, 512], sizes = [2, 128], strides = [1, 1]} : vector<2x640xf32> to vector<2x128xf32>
    %c1_i32 = arith.constant 1 : i32
    %14 = arith.subi %c0_i32, %c1_i32 : i32
    %c0_i32_14 = arith.constant 0 : i32
    %15 = arith.maxsi %14, %c0_i32_14 : i32
    %16 = arith.index_cast %15 : i32 to index
    %c0_15 = arith.constant 0 : index
    %c0_16 = arith.constant 0 : index
    %17 = vector.load %arg7[%16, %c0_15, %c0_16] : memref<8x2x128xf32, #tpu.memory_space<vmem>>, vector<1x2x128xf32>
    %18 = vector.shape_cast %17 : vector<1x2x128xf32> to vector<2x128xf32>
    %19 = vector.shape_cast %13 : vector<2x128xf32> to vector<1x2x128xf32>
    tpu.vector_store %arg7[%16, %c0_15, %c0_16], %19 {strides = array<i32>} : memref<8x2x128xf32, #tpu.memory_space<vmem>>, vector<1x2x128xf32>,
    %20 = vector.extract_strided_slice %12 {offsets = [0, 0], sizes = [2, 512], strides = [1, 1]} : vector<2x640xf32> to vector<2x512xf32>
    %c2_i32 = arith.constant 2 : i32
    %21 = arith.muli %c0_i32, %c2_i32 : i32
    %22 = arith.index_cast %21 : i32 to index
    %c0_17 = arith.constant 0 : index
    %23 = vector.load %arg10[%22, %c0_17] : memref<16x512xf32, #tpu.memory_space<vmem>>, vector<2x512xf32>
    %24 = arith.addf %20, %23 : vector<2x512xf32>
    %25 = vector.extract_strided_slice %24 {offsets = [0, 0], sizes = [2, 128], strides = [1, 1]} : vector<2x512xf32> to vector<2x128xf32>
    %26 = arith.negf %25 : vector<2x128xf32>
    %27 = math.exp %26 : vector<2x128xf32>
    %cst_18 = arith.constant 1.000000e+00 : f32
    %28 = vector.broadcast %cst_18 : f32 to vector<2x128xf32>
    %29 = arith.addf %28, %27 : vector<2x128xf32>
    %30 = arith.divf %28, %29 : vector<2x128xf32>
    %31 = vector.extract_strided_slice %24 {offsets = [0, 128], sizes = [2, 128], strides = [1, 1]} : vector<2x512xf32> to vector<2x128xf32>
    %32 = arith.negf %31 : vector<2x128xf32>
    %33 = math.exp %32 : vector<2x128xf32>
    %cst_19 = arith.constant 1.000000e+00 : f32
    %34 = vector.broadcast %cst_19 : f32 to vector<2x128xf32>
    %35 = arith.addf %34, %33 : vector<2x128xf32>
    %36 = arith.divf %34, %35 : vector<2x128xf32>
    %37 = vector.extract_strided_slice %24 {offsets = [0, 256], sizes = [2, 128], strides = [1, 1]} : vector<2x512xf32> to vector<2x128xf32>
    %38 = math.tanh %37 : vector<2x128xf32>
    %39 = vector.extract_strided_slice %24 {offsets = [0, 384], sizes = [2, 128], strides = [1, 1]} : vector<2x512xf32> to vector<2x128xf32>
    %40 = arith.negf %39 : vector<2x128xf32>
    %41 = math.exp %40 : vector<2x128xf32>
    %cst_20 = arith.constant 1.000000e+00 : f32
    %42 = vector.broadcast %cst_20 : f32 to vector<2x128xf32>
    %43 = arith.addf %42, %41 : vector<2x128xf32>
    %44 = arith.divf %42, %43 : vector<2x128xf32>
    %45 = arith.mulf %36, %9 : vector<2x128xf32>
    %46 = arith.mulf %30, %38 : vector<2x128xf32>
    %47 = arith.addf %45, %46 : vector<2x128xf32>
    %48 = math.tanh %47 : vector<2x128xf32>
    %49 = arith.mulf %44, %48 : vector<2x128xf32>
    %c1_i32_21 = arith.constant 1 : i32
    %50 = arith.truncf %49 : vector<2x128xf32> to vector<2x128xbf16>
    %c0_22 = arith.constant 0 : index
    %c0_23 = arith.constant 0 : index
    %51 = vector.load %arg4[%c0_22, %c0_23] : memref<128x640xbf16, #tpu.memory_space<vmem>>, vector<128x640xbf16>
    %cst_24 = arith.constant dense<0.000000e+00> : vector<2x640xf32>
    %52 = tpu.matmul %50, %51, %cst_24 {dimension_numbers = #tpu.dot_dimension_numbers<[1], [0], [0], [1], [0, 0, 1, 1], [], []>} : vector<2x128xbf16>, vector<128x640xbf16>, vector<2x640xf32> -> vector<2x640xf32>
    %53 = vector.extract_strided_slice %52 {offsets = [0, 512], sizes = [2, 128], strides = [1, 1]} : vector<2x640xf32> to vector<2x128xf32>
    %c1_i32_25 = arith.constant 1 : i32
    %54 = arith.subi %c1_i32_21, %c1_i32_25 : i32
    %c0_i32_26 = arith.constant 0 : i32
    %55 = arith.maxsi %54, %c0_i32_26 : i32
    %56 = arith.index_cast %55 : i32 to index
    %c0_27 = arith.constant 0 : index
    %c0_28 = arith.constant 0 : index
    %57 = vector.load %arg7[%56, %c0_27, %c0_28] : memref<8x2x128xf32, #tpu.memory_space<vmem>>, vector<1x2x128xf32>
    %58 = vector.shape_cast %57 : vector<1x2x128xf32> to vector<2x128xf32>
    %59 = vector.shape_cast %53 : vector<2x128xf32> to vector<1x2x128xf32>
    tpu.vector_store %arg7[%56, %c0_27, %c0_28], %59 {strides = array<i32>} : memref<8x2x128xf32, #tpu.memory_space<vmem>>, vector<1x2x128xf32>,
    %60 = vector.extract_strided_slice %52 {offsets = [0, 0], sizes = [2, 512], strides = [1, 1]} : vector<2x640xf32> to vector<2x512xf32>
    %c2_i32_29 = arith.constant 2 : i32
    %61 = arith.muli %c1_i32_21, %c2_i32_29 : i32
    %62 = arith.index_cast %61 : i32 to index
    %c0_30 = arith.constant 0 : index
    %63 = vector.load %arg10[%62, %c0_30] : memref<16x512xf32, #tpu.memory_space<vmem>>, vector<2x512xf32>
    %64 = arith.addf %60, %63 : vector<2x512xf32>
    %65 = vector.extract_strided_slice %64 {offsets = [0, 0], sizes = [2, 128], strides = [1, 1]} : vector<2x512xf32> to vector<2x128xf32>
    %66 = arith.negf %65 : vector<2x128xf32>
    %67 = math.exp %66 : vector<2x128xf32>
    %cst_31 = arith.constant 1.000000e+00 : f32
    %68 = vector.broadcast %cst_31 : f32 to vector<2x128xf32>
    %69 = arith.addf %68, %67 : vector<2x128xf32>
    %70 = arith.divf %68, %69 : vector<2x128xf32>
    %71 = vector.extract_strided_slice %64 {offsets = [0, 128], sizes = [2, 128], strides = [1, 1]} : vector<2x512xf32> to vector<2x128xf32>
    %72 = arith.negf %71 : vector<2x128xf32>
    %73 = math.exp %72 : vector<2x128xf32>
    %cst_32 = arith.constant 1.000000e+00 : f32
    %74 = vector.broadcast %cst_32 : f32 to vector<2x128xf32>
    %75 = arith.addf %74, %73 : vector<2x128xf32>
    %76 = arith.divf %74, %75 : vector<2x128xf32>
    %77 = vector.extract_strided_slice %64 {offsets = [0, 256], sizes = [2, 128], strides = [1, 1]} : vector<2x512xf32> to vector<2x128xf32>
    %78 = math.tanh %77 : vector<2x128xf32>
    %79 = vector.extract_strided_slice %64 {offsets = [0, 384], sizes = [2, 128], strides = [1, 1]} : vector<2x512xf32> to vector<2x128xf32>
    %80 = arith.negf %79 : vector<2x128xf32>
    %81 = math.exp %80 : vector<2x128xf32>
    %cst_33 = arith.constant 1.000000e+00 : f32
    %82 = vector.broadcast %cst_33 : f32 to vector<2x128xf32>
    %83 = arith.addf %82, %81 : vector<2x128xf32>
    %84 = arith.divf %82, %83 : vector<2x128xf32>
    %85 = arith.mulf %76, %47 : vector<2x128xf32>
    %86 = arith.mulf %70, %78 : vector<2x128xf32>
    %87 = arith.addf %85, %86 : vector<2x128xf32>
    %88 = math.tanh %87 : vector<2x128xf32>
    %89 = arith.mulf %84, %88 : vector<2x128xf32>
    %c2_i32_34 = arith.constant 2 : i32
    %90 = arith.truncf %89 : vector<2x128xf32> to vector<2x128xbf16>
    %c0_35 = arith.constant 0 : index
    %c0_36 = arith.constant 0 : index
    %91 = vector.load %arg4[%c0_35, %c0_36] : memref<128x640xbf16, #tpu.memory_space<vmem>>, vector<128x640xbf16>
    %cst_37 = arith.constant dense<0.000000e+00> : vector<2x640xf32>
    %92 = tpu.matmul %90, %91, %cst_37 {dimension_numbers = #tpu.dot_dimension_numbers<[1], [0], [0], [1], [0, 0, 1, 1], [], []>} : vector<2x128xbf16>, vector<128x640xbf16>, vector<2x640xf32> -> vector<2x640xf32>
    %93 = vector.extract_strided_slice %92 {offsets = [0, 512], sizes = [2, 128], strides = [1, 1]} : vector<2x640xf32> to vector<2x128xf32>
    %c1_i32_38 = arith.constant 1 : i32
    %94 = arith.subi %c2_i32_34, %c1_i32_38 : i32
    %c0_i32_39 = arith.constant 0 : i32
    %95 = arith.maxsi %94, %c0_i32_39 : i32
    %96 = arith.index_cast %95 : i32 to index
    %c0_40 = arith.constant 0 : index
    %c0_41 = arith.constant 0 : index
    %97 = vector.load %arg7[%96, %c0_40, %c0_41] : memref<8x2x128xf32, #tpu.memory_space<vmem>>, vector<1x2x128xf32>
    %98 = vector.shape_cast %97 : vector<1x2x128xf32> to vector<2x128xf32>
    %99 = vector.shape_cast %93 : vector<2x128xf32> to vector<1x2x128xf32>
    tpu.vector_store %arg7[%96, %c0_40, %c0_41], %99 {strides = array<i32>} : memref<8x2x128xf32, #tpu.memory_space<vmem>>, vector<1x2x128xf32>,
    %100 = vector.extract_strided_slice %92 {offsets = [0, 0], sizes = [2, 512], strides = [1, 1]} : vector<2x640xf32> to vector<2x512xf32>
    %c2_i32_42 = arith.constant 2 : i32
    %101 = arith.muli %c2_i32_34, %c2_i32_42 : i32
    %102 = arith.index_cast %101 : i32 to index
    %c0_43 = arith.constant 0 : index
    %103 = vector.load %arg10[%102, %c0_43] : memref<16x512xf32, #tpu.memory_space<vmem>>, vector<2x512xf32>
    %104 = arith.addf %100, %103 : vector<2x512xf32>
    %105 = vector.extract_strided_slice %104 {offsets = [0, 0], sizes = [2, 128], strides = [1, 1]} : vector<2x512xf32> to vector<2x128xf32>
    %106 = arith.negf %105 : vector<2x128xf32>
    %107 = math.exp %106 : vector<2x128xf32>
    %cst_44 = arith.constant 1.000000e+00 : f32
    %108 = vector.broadcast %cst_44 : f32 to vector<2x128xf32>
    %109 = arith.addf %108, %107 : vector<2x128xf32>
    %110 = arith.divf %108, %109 : vector<2x128xf32>
    %111 = vector.extract_strided_slice %104 {offsets = [0, 128], sizes = [2, 128], strides = [1, 1]} : vector<2x512xf32> to vector<2x128xf32>
    %112 = arith.negf %111 : vector<2x128xf32>
    %113 = math.exp %112 : vector<2x128xf32>
    %cst_45 = arith.constant 1.000000e+00 : f32
    %114 = vector.broadcast %cst_45 : f32 to vector<2x128xf32>
    %115 = arith.addf %114, %113 : vector<2x128xf32>
    %116 = arith.divf %114, %115 : vector<2x128xf32>
    %117 = vector.extract_strided_slice %104 {offsets = [0, 256], sizes = [2, 128], strides = [1, 1]} : vector<2x512xf32> to vector<2x128xf32>
    %118 = math.tanh %117 : vector<2x128xf32>
    %119 = vector.extract_strided_slice %104 {offsets = [0, 384], sizes = [2, 128], strides = [1, 1]} : vector<2x512xf32> to vector<2x128xf32>
    %120 = arith.negf %119 : vector<2x128xf32>
    %121 = math.exp %120 : vector<2x128xf32>
    %cst_46 = arith.constant 1.000000e+00 : f32
    %122 = vector.broadcast %cst_46 : f32 to vector<2x128xf32>
    %123 = arith.addf %122, %121 : vector<2x128xf32>
    %124 = arith.divf %122, %123 : vector<2x128xf32>
    %125 = arith.mulf %116, %87 : vector<2x128xf32>
    %126 = arith.mulf %110, %118 : vector<2x128xf32>
    %127 = arith.addf %125, %126 : vector<2x128xf32>
    %128 = math.tanh %127 : vector<2x128xf32>
    %129 = arith.mulf %124, %128 : vector<2x128xf32>
    %c3_i32 = arith.constant 3 : i32
    %130 = arith.truncf %129 : vector<2x128xf32> to vector<2x128xbf16>
    %c0_47 = arith.constant 0 : index
    %c0_48 = arith.constant 0 : index
    %131 = vector.load %arg4[%c0_47, %c0_48] : memref<128x640xbf16, #tpu.memory_space<vmem>>, vector<128x640xbf16>
    %cst_49 = arith.constant dense<0.000000e+00> : vector<2x640xf32>
    %132 = tpu.matmul %130, %131, %cst_49 {dimension_numbers = #tpu.dot_dimension_numbers<[1], [0], [0], [1], [0, 0, 1, 1], [], []>} : vector<2x128xbf16>, vector<128x640xbf16>, vector<2x640xf32> -> vector<2x640xf32>
    %133 = vector.extract_strided_slice %132 {offsets = [0, 512], sizes = [2, 128], strides = [1, 1]} : vector<2x640xf32> to vector<2x128xf32>
    %c1_i32_50 = arith.constant 1 : i32
    %134 = arith.subi %c3_i32, %c1_i32_50 : i32
    %c0_i32_51 = arith.constant 0 : i32
    %135 = arith.maxsi %134, %c0_i32_51 : i32
    %136 = arith.index_cast %135 : i32 to index
    %c0_52 = arith.constant 0 : index
    %c0_53 = arith.constant 0 : index
    %137 = vector.load %arg7[%136, %c0_52, %c0_53] : memref<8x2x128xf32, #tpu.memory_space<vmem>>, vector<1x2x128xf32>
    %138 = vector.shape_cast %137 : vector<1x2x128xf32> to vector<2x128xf32>
    %139 = vector.shape_cast %133 : vector<2x128xf32> to vector<1x2x128xf32>
    tpu.vector_store %arg7[%136, %c0_52, %c0_53], %139 {strides = array<i32>} : memref<8x2x128xf32, #tpu.memory_space<vmem>>, vector<1x2x128xf32>,
    %140 = vector.extract_strided_slice %132 {offsets = [0, 0], sizes = [2, 512], strides = [1, 1]} : vector<2x640xf32> to vector<2x512xf32>
    %c2_i32_54 = arith.constant 2 : i32
    %141 = arith.muli %c3_i32, %c2_i32_54 : i32
    %142 = arith.index_cast %141 : i32 to index
    %c0_55 = arith.constant 0 : index
    %143 = vector.load %arg10[%142, %c0_55] : memref<16x512xf32, #tpu.memory_space<vmem>>, vector<2x512xf32>
    %144 = arith.addf %140, %143 : vector<2x512xf32>
    %145 = vector.extract_strided_slice %144 {offsets = [0, 0], sizes = [2, 128], strides = [1, 1]} : vector<2x512xf32> to vector<2x128xf32>
    %146 = arith.negf %145 : vector<2x128xf32>
    %147 = math.exp %146 : vector<2x128xf32>
    %cst_56 = arith.constant 1.000000e+00 : f32
    %148 = vector.broadcast %cst_56 : f32 to vector<2x128xf32>
    %149 = arith.addf %148, %147 : vector<2x128xf32>
    %150 = arith.divf %148, %149 : vector<2x128xf32>
    %151 = vector.extract_strided_slice %144 {offsets = [0, 128], sizes = [2, 128], strides = [1, 1]} : vector<2x512xf32> to vector<2x128xf32>
    %152 = arith.negf %151 : vector<2x128xf32>
    %153 = math.exp %152 : vector<2x128xf32>
    %cst_57 = arith.constant 1.000000e+00 : f32
    %154 = vector.broadcast %cst_57 : f32 to vector<2x128xf32>
    %155 = arith.addf %154, %153 : vector<2x128xf32>
    %156 = arith.divf %154, %155 : vector<2x128xf32>
    %157 = vector.extract_strided_slice %144 {offsets = [0, 256], sizes = [2, 128], strides = [1, 1]} : vector<2x512xf32> to vector<2x128xf32>
    %158 = math.tanh %157 : vector<2x128xf32>
    %159 = vector.extract_strided_slice %144 {offsets = [0, 384], sizes = [2, 128], strides = [1, 1]} : vector<2x512xf32> to vector<2x128xf32>
    %160 = arith.negf %159 : vector<2x128xf32>
    %161 = math.exp %160 : vector<2x128xf32>
    %cst_58 = arith.constant 1.000000e+00 : f32
    %162 = vector.broadcast %cst_58 : f32 to vector<2x128xf32>
    %163 = arith.addf %162, %161 : vector<2x128xf32>
    %164 = arith.divf %162, %163 : vector<2x128xf32>
    %165 = arith.mulf %156, %127 : vector<2x128xf32>
    %166 = arith.mulf %150, %158 : vector<2x128xf32>
    %167 = arith.addf %165, %166 : vector<2x128xf32>
    %168 = math.tanh %167 : vector<2x128xf32>
    %169 = arith.mulf %164, %168 : vector<2x128xf32>
    %c4_i32 = arith.constant 4 : i32
    %170 = arith.truncf %169 : vector<2x128xf32> to vector<2x128xbf16>
    %c0_59 = arith.constant 0 : index
    %c0_60 = arith.constant 0 : index
    %171 = vector.load %arg4[%c0_59, %c0_60] : memref<128x640xbf16, #tpu.memory_space<vmem>>, vector<128x640xbf16>
    %cst_61 = arith.constant dense<0.000000e+00> : vector<2x640xf32>
    %172 = tpu.matmul %170, %171, %cst_61 {dimension_numbers = #tpu.dot_dimension_numbers<[1], [0], [0], [1], [0, 0, 1, 1], [], []>} : vector<2x128xbf16>, vector<128x640xbf16>, vector<2x640xf32> -> vector<2x640xf32>
    %173 = vector.extract_strided_slice %172 {offsets = [0, 512], sizes = [2, 128], strides = [1, 1]} : vector<2x640xf32> to vector<2x128xf32>
    %c1_i32_62 = arith.constant 1 : i32
    %174 = arith.subi %c4_i32, %c1_i32_62 : i32
    %c0_i32_63 = arith.constant 0 : i32
    %175 = arith.maxsi %174, %c0_i32_63 : i32
    %176 = arith.index_cast %175 : i32 to index
    %c0_64 = arith.constant 0 : index
    %c0_65 = arith.constant 0 : index
    %177 = vector.load %arg7[%176, %c0_64, %c0_65] : memref<8x2x128xf32, #tpu.memory_space<vmem>>, vector<1x2x128xf32>
    %178 = vector.shape_cast %177 : vector<1x2x128xf32> to vector<2x128xf32>
    %179 = vector.shape_cast %173 : vector<2x128xf32> to vector<1x2x128xf32>
    tpu.vector_store %arg7[%176, %c0_64, %c0_65], %179 {strides = array<i32>} : memref<8x2x128xf32, #tpu.memory_space<vmem>>, vector<1x2x128xf32>,
    %180 = vector.extract_strided_slice %172 {offsets = [0, 0], sizes = [2, 512], strides = [1, 1]} : vector<2x640xf32> to vector<2x512xf32>
    %c2_i32_66 = arith.constant 2 : i32
    %181 = arith.muli %c4_i32, %c2_i32_66 : i32
    %182 = arith.index_cast %181 : i32 to index
    %c0_67 = arith.constant 0 : index
    %183 = vector.load %arg10[%182, %c0_67] : memref<16x512xf32, #tpu.memory_space<vmem>>, vector<2x512xf32>
    %184 = arith.addf %180, %183 : vector<2x512xf32>
    %185 = vector.extract_strided_slice %184 {offsets = [0, 0], sizes = [2, 128], strides = [1, 1]} : vector<2x512xf32> to vector<2x128xf32>
    %186 = arith.negf %185 : vector<2x128xf32>
    %187 = math.exp %186 : vector<2x128xf32>
    %cst_68 = arith.constant 1.000000e+00 : f32
    %188 = vector.broadcast %cst_68 : f32 to vector<2x128xf32>
    %189 = arith.addf %188, %187 : vector<2x128xf32>
    %190 = arith.divf %188, %189 : vector<2x128xf32>
    %191 = vector.extract_strided_slice %184 {offsets = [0, 128], sizes = [2, 128], strides = [1, 1]} : vector<2x512xf32> to vector<2x128xf32>
    %192 = arith.negf %191 : vector<2x128xf32>
    %193 = math.exp %192 : vector<2x128xf32>
    %cst_69 = arith.constant 1.000000e+00 : f32
    %194 = vector.broadcast %cst_69 : f32 to vector<2x128xf32>
    %195 = arith.addf %194, %193 : vector<2x128xf32>
    %196 = arith.divf %194, %195 : vector<2x128xf32>
    %197 = vector.extract_strided_slice %184 {offsets = [0, 256], sizes = [2, 128], strides = [1, 1]} : vector<2x512xf32> to vector<2x128xf32>
    %198 = math.tanh %197 : vector<2x128xf32>
    %199 = vector.extract_strided_slice %184 {offsets = [0, 384], sizes = [2, 128], strides = [1, 1]} : vector<2x512xf32> to vector<2x128xf32>
    %200 = arith.negf %199 : vector<2x128xf32>
    %201 = math.exp %200 : vector<2x128xf32>
    %cst_70 = arith.constant 1.000000e+00 : f32
    %202 = vector.broadcast %cst_70 : f32 to vector<2x128xf32>
    %203 = arith.addf %202, %201 : vector<2x128xf32>
    %204 = arith.divf %202, %203 : vector<2x128xf32>
    %205 = arith.mulf %196, %167 : vector<2x128xf32>
    %206 = arith.mulf %190, %198 : vector<2x128xf32>
    %207 = arith.addf %205, %206 : vector<2x128xf32>
    %208 = math.tanh %207 : vector<2x128xf32>
    %209 = arith.mulf %204, %208 : vector<2x128xf32>
    %c5_i32 = arith.constant 5 : i32
    %210 = arith.truncf %209 : vector<2x128xf32> to vector<2x128xbf16>
    %c0_71 = arith.constant 0 : index
    %c0_72 = arith.constant 0 : index
    %211 = vector.load %arg4[%c0_71, %c0_72] : memref<128x640xbf16, #tpu.memory_space<vmem>>, vector<128x640xbf16>
    %cst_73 = arith.constant dense<0.000000e+00> : vector<2x640xf32>
    %212 = tpu.matmul %210, %211, %cst_73 {dimension_numbers = #tpu.dot_dimension_numbers<[1], [0], [0], [1], [0, 0, 1, 1], [], []>} : vector<2x128xbf16>, vector<128x640xbf16>, vector<2x640xf32> -> vector<2x640xf32>
    %213 = vector.extract_strided_slice %212 {offsets = [0, 512], sizes = [2, 128], strides = [1, 1]} : vector<2x640xf32> to vector<2x128xf32>
    %c1_i32_74 = arith.constant 1 : i32
    %214 = arith.subi %c5_i32, %c1_i32_74 : i32
    %c0_i32_75 = arith.constant 0 : i32
    %215 = arith.maxsi %214, %c0_i32_75 : i32
    %216 = arith.index_cast %215 : i32 to index
    %c0_76 = arith.constant 0 : index
    %c0_77 = arith.constant 0 : index
    %217 = vector.load %arg7[%216, %c0_76, %c0_77] : memref<8x2x128xf32, #tpu.memory_space<vmem>>, vector<1x2x128xf32>
    %218 = vector.shape_cast %217 : vector<1x2x128xf32> to vector<2x128xf32>
    %219 = vector.shape_cast %213 : vector<2x128xf32> to vector<1x2x128xf32>
    tpu.vector_store %arg7[%216, %c0_76, %c0_77], %219 {strides = array<i32>} : memref<8x2x128xf32, #tpu.memory_space<vmem>>, vector<1x2x128xf32>,
    %220 = vector.extract_strided_slice %212 {offsets = [0, 0], sizes = [2, 512], strides = [1, 1]} : vector<2x640xf32> to vector<2x512xf32>
    %c2_i32_78 = arith.constant 2 : i32
    %221 = arith.muli %c5_i32, %c2_i32_78 : i32
    %222 = arith.index_cast %221 : i32 to index
    %c0_79 = arith.constant 0 : index
    %223 = vector.load %arg10[%222, %c0_79] : memref<16x512xf32, #tpu.memory_space<vmem>>, vector<2x512xf32>
    %224 = arith.addf %220, %223 : vector<2x512xf32>
    %225 = vector.extract_strided_slice %224 {offsets = [0, 0], sizes = [2, 128], strides = [1, 1]} : vector<2x512xf32> to vector<2x128xf32>
    %226 = arith.negf %225 : vector<2x128xf32>
    %227 = math.exp %226 : vector<2x128xf32>
    %cst_80 = arith.constant 1.000000e+00 : f32
    %228 = vector.broadcast %cst_80 : f32 to vector<2x128xf32>
    %229 = arith.addf %228, %227 : vector<2x128xf32>
    %230 = arith.divf %228, %229 : vector<2x128xf32>
    %231 = vector.extract_strided_slice %224 {offsets = [0, 128], sizes = [2, 128], strides = [1, 1]} : vector<2x512xf32> to vector<2x128xf32>
    %232 = arith.negf %231 : vector<2x128xf32>
    %233 = math.exp %232 : vector<2x128xf32>
    %cst_81 = arith.constant 1.000000e+00 : f32
    %234 = vector.broadcast %cst_81 : f32 to vector<2x128xf32>
    %235 = arith.addf %234, %233 : vector<2x128xf32>
    %236 = arith.divf %234, %235 : vector<2x128xf32>
    %237 = vector.extract_strided_slice %224 {offsets = [0, 256], sizes = [2, 128], strides = [1, 1]} : vector<2x512xf32> to vector<2x128xf32>
    %238 = math.tanh %237 : vector<2x128xf32>
    %239 = vector.extract_strided_slice %224 {offsets = [0, 384], sizes = [2, 128], strides = [1, 1]} : vector<2x512xf32> to vector<2x128xf32>
    %240 = arith.negf %239 : vector<2x128xf32>
    %241 = math.exp %240 : vector<2x128xf32>
    %cst_82 = arith.constant 1.000000e+00 : f32
    %242 = vector.broadcast %cst_82 : f32 to vector<2x128xf32>
    %243 = arith.addf %242, %241 : vector<2x128xf32>
    %244 = arith.divf %242, %243 : vector<2x128xf32>
    %245 = arith.mulf %236, %207 : vector<2x128xf32>
    %246 = arith.mulf %230, %238 : vector<2x128xf32>
    %247 = arith.addf %245, %246 : vector<2x128xf32>
    %248 = math.tanh %247 : vector<2x128xf32>
    %249 = arith.mulf %244, %248 : vector<2x128xf32>
    %c6_i32 = arith.constant 6 : i32
    %250 = arith.truncf %249 : vector<2x128xf32> to vector<2x128xbf16>
    %c0_83 = arith.constant 0 : index
    %c0_84 = arith.constant 0 : index
    %251 = vector.load %arg4[%c0_83, %c0_84] : memref<128x640xbf16, #tpu.memory_space<vmem>>, vector<128x640xbf16>
    %cst_85 = arith.constant dense<0.000000e+00> : vector<2x640xf32>
    %252 = tpu.matmul %250, %251, %cst_85 {dimension_numbers = #tpu.dot_dimension_numbers<[1], [0], [0], [1], [0, 0, 1, 1], [], []>} : vector<2x128xbf16>, vector<128x640xbf16>, vector<2x640xf32> -> vector<2x640xf32>
    %253 = vector.extract_strided_slice %252 {offsets = [0, 512], sizes = [2, 128], strides = [1, 1]} : vector<2x640xf32> to vector<2x128xf32>
    %c1_i32_86 = arith.constant 1 : i32
    %254 = arith.subi %c6_i32, %c1_i32_86 : i32
    %c0_i32_87 = arith.constant 0 : i32
    %255 = arith.maxsi %254, %c0_i32_87 : i32
    %256 = arith.index_cast %255 : i32 to index
    %c0_88 = arith.constant 0 : index
    %c0_89 = arith.constant 0 : index
    %257 = vector.load %arg7[%256, %c0_88, %c0_89] : memref<8x2x128xf32, #tpu.memory_space<vmem>>, vector<1x2x128xf32>
    %258 = vector.shape_cast %257 : vector<1x2x128xf32> to vector<2x128xf32>
    %259 = vector.shape_cast %253 : vector<2x128xf32> to vector<1x2x128xf32>
    tpu.vector_store %arg7[%256, %c0_88, %c0_89], %259 {strides = array<i32>} : memref<8x2x128xf32, #tpu.memory_space<vmem>>, vector<1x2x128xf32>,
    %260 = vector.extract_strided_slice %252 {offsets = [0, 0], sizes = [2, 512], strides = [1, 1]} : vector<2x640xf32> to vector<2x512xf32>
    %c2_i32_90 = arith.constant 2 : i32
    %261 = arith.muli %c6_i32, %c2_i32_90 : i32
    %262 = arith.index_cast %261 : i32 to index
    %c0_91 = arith.constant 0 : index
    %263 = vector.load %arg10[%262, %c0_91] : memref<16x512xf32, #tpu.memory_space<vmem>>, vector<2x512xf32>
    %264 = arith.addf %260, %263 : vector<2x512xf32>
    %265 = vector.extract_strided_slice %264 {offsets = [0, 0], sizes = [2, 128], strides = [1, 1]} : vector<2x512xf32> to vector<2x128xf32>
    %266 = arith.negf %265 : vector<2x128xf32>
    %267 = math.exp %266 : vector<2x128xf32>
    %cst_92 = arith.constant 1.000000e+00 : f32
    %268 = vector.broadcast %cst_92 : f32 to vector<2x128xf32>
    %269 = arith.addf %268, %267 : vector<2x128xf32>
    %270 = arith.divf %268, %269 : vector<2x128xf32>
    %271 = vector.extract_strided_slice %264 {offsets = [0, 128], sizes = [2, 128], strides = [1, 1]} : vector<2x512xf32> to vector<2x128xf32>
    %272 = arith.negf %271 : vector<2x128xf32>
    %273 = math.exp %272 : vector<2x128xf32>
    %cst_93 = arith.constant 1.000000e+00 : f32
    %274 = vector.broadcast %cst_93 : f32 to vector<2x128xf32>
    %275 = arith.addf %274, %273 : vector<2x128xf32>
    %276 = arith.divf %274, %275 : vector<2x128xf32>
    %277 = vector.extract_strided_slice %264 {offsets = [0, 256], sizes = [2, 128], strides = [1, 1]} : vector<2x512xf32> to vector<2x128xf32>
    %278 = math.tanh %277 : vector<2x128xf32>
    %279 = vector.extract_strided_slice %264 {offsets = [0, 384], sizes = [2, 128], strides = [1, 1]} : vector<2x512xf32> to vector<2x128xf32>
    %280 = arith.negf %279 : vector<2x128xf32>
    %281 = math.exp %280 : vector<2x128xf32>
    %cst_94 = arith.constant 1.000000e+00 : f32
    %282 = vector.broadcast %cst_94 : f32 to vector<2x128xf32>
    %283 = arith.addf %282, %281 : vector<2x128xf32>
    %284 = arith.divf %282, %283 : vector<2x128xf32>
    %285 = arith.mulf %276, %247 : vector<2x128xf32>
    %286 = arith.mulf %270, %278 : vector<2x128xf32>
    %287 = arith.addf %285, %286 : vector<2x128xf32>
    %288 = math.tanh %287 : vector<2x128xf32>
    %289 = arith.mulf %284, %288 : vector<2x128xf32>
    %c7_i32 = arith.constant 7 : i32
    %290 = arith.truncf %289 : vector<2x128xf32> to vector<2x128xbf16>
    %c0_95 = arith.constant 0 : index
    %c0_96 = arith.constant 0 : index
    %291 = vector.load %arg4[%c0_95, %c0_96] : memref<128x640xbf16, #tpu.memory_space<vmem>>, vector<128x640xbf16>
    %cst_97 = arith.constant dense<0.000000e+00> : vector<2x640xf32>
    %292 = tpu.matmul %290, %291, %cst_97 {dimension_numbers = #tpu.dot_dimension_numbers<[1], [0], [0], [1], [0, 0, 1, 1], [], []>} : vector<2x128xbf16>, vector<128x640xbf16>, vector<2x640xf32> -> vector<2x640xf32>
    %293 = vector.extract_strided_slice %292 {offsets = [0, 512], sizes = [2, 128], strides = [1, 1]} : vector<2x640xf32> to vector<2x128xf32>
    %c1_i32_98 = arith.constant 1 : i32
    %294 = arith.subi %c7_i32, %c1_i32_98 : i32
    %c0_i32_99 = arith.constant 0 : i32
    %295 = arith.maxsi %294, %c0_i32_99 : i32
    %296 = arith.index_cast %295 : i32 to index
    %c0_100 = arith.constant 0 : index
    %c0_101 = arith.constant 0 : index
    %297 = vector.load %arg7[%296, %c0_100, %c0_101] : memref<8x2x128xf32, #tpu.memory_space<vmem>>, vector<1x2x128xf32>
    %298 = vector.shape_cast %297 : vector<1x2x128xf32> to vector<2x128xf32>
    %299 = vector.shape_cast %293 : vector<2x128xf32> to vector<1x2x128xf32>
    tpu.vector_store %arg7[%296, %c0_100, %c0_101], %299 {strides = array<i32>} : memref<8x2x128xf32, #tpu.memory_space<vmem>>, vector<1x2x128xf32>,
    %300 = vector.extract_strided_slice %292 {offsets = [0, 0], sizes = [2, 512], strides = [1, 1]} : vector<2x640xf32> to vector<2x512xf32>
    %c2_i32_102 = arith.constant 2 : i32
    %301 = arith.muli %c7_i32, %c2_i32_102 : i32
    %302 = arith.index_cast %301 : i32 to index
    %c0_103 = arith.constant 0 : index
    %303 = vector.load %arg10[%302, %c0_103] : memref<16x512xf32, #tpu.memory_space<vmem>>, vector<2x512xf32>
    %304 = arith.addf %300, %303 : vector<2x512xf32>
    %305 = vector.extract_strided_slice %304 {offsets = [0, 0], sizes = [2, 128], strides = [1, 1]} : vector<2x512xf32> to vector<2x128xf32>
    %306 = arith.negf %305 : vector<2x128xf32>
    %307 = math.exp %306 : vector<2x128xf32>
    %cst_104 = arith.constant 1.000000e+00 : f32
    %308 = vector.broadcast %cst_104 : f32 to vector<2x128xf32>
    %309 = arith.addf %308, %307 : vector<2x128xf32>
    %310 = arith.divf %308, %309 : vector<2x128xf32>
    %311 = vector.extract_strided_slice %304 {offsets = [0, 128], sizes = [2, 128], strides = [1, 1]} : vector<2x512xf32> to vector<2x128xf32>
    %312 = arith.negf %311 : vector<2x128xf32>
    %313 = math.exp %312 : vector<2x128xf32>
    %cst_105 = arith.constant 1.000000e+00 : f32
    %314 = vector.broadcast %cst_105 : f32 to vector<2x128xf32>
    %315 = arith.addf %314, %313 : vector<2x128xf32>
    %316 = arith.divf %314, %315 : vector<2x128xf32>
    %317 = vector.extract_strided_slice %304 {offsets = [0, 256], sizes = [2, 128], strides = [1, 1]} : vector<2x512xf32> to vector<2x128xf32>
    %318 = math.tanh %317 : vector<2x128xf32>
    %319 = vector.extract_strided_slice %304 {offsets = [0, 384], sizes = [2, 128], strides = [1, 1]} : vector<2x512xf32> to vector<2x128xf32>
    %320 = arith.negf %319 : vector<2x128xf32>
    %321 = math.exp %320 : vector<2x128xf32>
    %cst_106 = arith.constant 1.000000e+00 : f32
    %322 = vector.broadcast %cst_106 : f32 to vector<2x128xf32>
    %323 = arith.addf %322, %321 : vector<2x128xf32>
    %324 = arith.divf %322, %323 : vector<2x128xf32>
    %325 = arith.mulf %316, %287 : vector<2x128xf32>
    %326 = arith.mulf %310, %318 : vector<2x128xf32>
    %327 = arith.addf %325, %326 : vector<2x128xf32>
    %328 = math.tanh %327 : vector<2x128xf32>
    %329 = arith.mulf %324, %328 : vector<2x128xf32>
    %c8_i32 = arith.constant 8 : i32
    %c0_107 = arith.constant 0 : index
    %c0_108 = arith.constant 0 : index
    %330 = vector.load %arg8[%c0_107, %c0_108] : memref<2x128xf32, #tpu.memory_space<vmem>>, vector<2x128xf32>
    tpu.vector_store %arg8[%c0_107, %c0_108], %329 {strides = array<i32>} : memref<2x128xf32, #tpu.memory_space<vmem>>, vector<2x128xf32>,
    %c0_109 = arith.constant 0 : index
    %c0_110 = arith.constant 0 : index
    %331 = vector.load %arg9[%c0_109, %c0_110] : memref<2x128xf32, #tpu.memory_space<vmem>>, vector<2x128xf32>
    tpu.vector_store %arg9[%c0_109, %c0_110], %327 {strides = array<i32>} : memref<2x128xf32, #tpu.memory_space<vmem>>, vector<2x128xf32>,
    %332 = arith.truncf %329 : vector<2x128xf32> to vector<2x128xbf16>
    %c0_111 = arith.constant 0 : index
    %c0_112 = arith.constant 0 : index
    %333 = vector.load %arg4[%c0_111, %c0_112] : memref<128x640xbf16, #tpu.memory_space<vmem>>, vector<128x640xbf16>
    %334 = vector.extract_strided_slice %333 {offsets = [0, 512], sizes = [128, 128], strides = [1, 1]} : vector<128x640xbf16> to vector<128x128xbf16>
    %cst_113 = arith.constant dense<0.000000e+00> : vector<2x128xf32>
    %335 = tpu.matmul %332, %334, %cst_113 {dimension_numbers = #tpu.dot_dimension_numbers<[1], [0], [0], [1], [0, 0, 1, 1], [], []>} : vector<2x128xbf16>, vector<128x128xbf16>, vector<2x128xf32> -> vector<2x128xf32>
    %c7 = arith.constant 7 : index
    %c0_114 = arith.constant 0 : index
    %c0_115 = arith.constant 0 : index
    %336 = vector.load %arg7[%c7, %c0_114, %c0_115] : memref<8x2x128xf32, #tpu.memory_space<vmem>>, vector<1x2x128xf32>
    %337 = vector.shape_cast %336 : vector<1x2x128xf32> to vector<2x128xf32>
    %338 = vector.shape_cast %335 : vector<2x128xf32> to vector<1x2x128xf32>
    tpu.vector_store %arg7[%c7, %c0_114, %c0_115], %338 {strides = array<i32>} : memref<8x2x128xf32, #tpu.memory_space<vmem>>, vector<1x2x128xf32>,
    %c0_116 = arith.constant 0 : index
    %c0_117 = arith.constant 0 : index
    %c0_118 = arith.constant 0 : index
    %339 = vector.load %arg7[%c0_116, %c0_117, %c0_118] : memref<8x2x128xf32, #tpu.memory_space<vmem>>, vector<8x2x128xf32>
    %c0_119 = arith.constant 0 : index
    %c0_120 = arith.constant 0 : index
    %c0_121 = arith.constant 0 : index
    %340 = vector.load %arg6[%c0_119, %c0_120, %c0_121] : memref<1x1x128xf32, #tpu.memory_space<vmem>>, vector<1x1x128xf32>
    %341 = vector.broadcast %340 : vector<1x1x128xf32> to vector<8x2x128xf32>
    %342 = arith.addf %339, %341 : vector<8x2x128xf32>
    %c0_122 = arith.constant 0 : index
    %c0_123 = arith.constant 0 : index
    %c0_124 = arith.constant 0 : index
    %343 = vector.load %arg7[%c0_122, %c0_123, %c0_124] : memref<8x2x128xf32, #tpu.memory_space<vmem>>, vector<8x2x128xf32>
    tpu.vector_store %arg7[%c0_122, %c0_123, %c0_124], %342 {strides = array<i32>} : memref<8x2x128xf32, #tpu.memory_space<vmem>>, vector<8x2x128xf32>,
    %344 = vector.extract_strided_slice %342 {offsets = [0, 0, 40], sizes = [8, 2, 20], strides = [1, 1, 1]} : vector<8x2x128xf32> to vector<8x2x20xf32>
    %345 = math.exp %344 : vector<8x2x20xf32>
    %c0_125 = arith.constant 0 : index
    %c0_126 = arith.constant 0 : index
    %c40 = arith.constant 40 : index
    %346 = vector.load %arg7[%c0_125, %c0_126, %c40] : memref<8x2x128xf32, #tpu.memory_space<vmem>>, vector<8x2x20xf32>
    tpu.vector_store %arg7[%c0_125, %c0_126, %c40], %345 {strides = array<i32>} : memref<8x2x128xf32, #tpu.memory_space<vmem>>, vector<8x2x20xf32>,
    %347 = vector.extract_strided_slice %342 {offsets = [0, 0, 0], sizes = [8, 2, 20], strides = [1, 1, 1]} : vector<8x2x128xf32> to vector<8x2x20xf32>
    %348 = vector.extract_strided_slice %347 {offsets = [0, 0, 0], sizes = [8, 2, 4], strides = [1, 1, 1]} : vector<8x2x20xf32> to vector<8x2x4xf32>
    %349 = vector.extract_strided_slice %347 {offsets = [0, 0, 4], sizes = [8, 2, 4], strides = [1, 1, 1]} : vector<8x2x20xf32> to vector<8x2x4xf32>
    %350 = arith.maximumf %348, %349 : vector<8x2x4xf32>
    %351 = vector.extract_strided_slice %347 {offsets = [0, 0, 8], sizes = [8, 2, 4], strides = [1, 1, 1]} : vector<8x2x20xf32> to vector<8x2x4xf32>
    %352 = arith.maximumf %350, %351 : vector<8x2x4xf32>
    %353 = vector.extract_strided_slice %347 {offsets = [0, 0, 12], sizes = [8, 2, 4], strides = [1, 1, 1]} : vector<8x2x20xf32> to vector<8x2x4xf32>
    %354 = arith.maximumf %352, %353 : vector<8x2x4xf32>
    %355 = vector.extract_strided_slice %347 {offsets = [0, 0, 16], sizes = [8, 2, 4], strides = [1, 1, 1]} : vector<8x2x20xf32> to vector<8x2x4xf32>
    %356 = arith.maximumf %354, %355 : vector<8x2x4xf32>
    %357 = vector.extract_strided_slice %347 {offsets = [0, 0, 0], sizes = [8, 2, 4], strides = [1, 1, 1]} : vector<8x2x20xf32> to vector<8x2x4xf32>
    %358 = arith.subf %357, %356 : vector<8x2x4xf32>
    %359 = math.exp %358 : vector<8x2x4xf32>
    %360 = vector.extract_strided_slice %347 {offsets = [0, 0, 4], sizes = [8, 2, 4], strides = [1, 1, 1]} : vector<8x2x20xf32> to vector<8x2x4xf32>
    %361 = arith.subf %360, %356 : vector<8x2x4xf32>
    %362 = math.exp %361 : vector<8x2x4xf32>
    %363 = vector.extract_strided_slice %347 {offsets = [0, 0, 8], sizes = [8, 2, 4], strides = [1, 1, 1]} : vector<8x2x20xf32> to vector<8x2x4xf32>
    %364 = arith.subf %363, %356 : vector<8x2x4xf32>
    %365 = math.exp %364 : vector<8x2x4xf32>
    %366 = vector.extract_strided_slice %347 {offsets = [0, 0, 12], sizes = [8, 2, 4], strides = [1, 1, 1]} : vector<8x2x20xf32> to vector<8x2x4xf32>
    %367 = arith.subf %366, %356 : vector<8x2x4xf32>
    %368 = math.exp %367 : vector<8x2x4xf32>
    %369 = vector.extract_strided_slice %347 {offsets = [0, 0, 16], sizes = [8, 2, 4], strides = [1, 1, 1]} : vector<8x2x20xf32> to vector<8x2x4xf32>
    %370 = arith.subf %369, %356 : vector<8x2x4xf32>
    %371 = math.exp %370 : vector<8x2x4xf32>
    %372 = arith.addf %359, %362 : vector<8x2x4xf32>
    %373 = arith.addf %372, %365 : vector<8x2x4xf32>
    %374 = arith.addf %373, %368 : vector<8x2x4xf32>
    %375 = arith.addf %374, %371 : vector<8x2x4xf32>
    %376 = tpu.reciprocal %375 {approx = true} : vector<8x2x4xf32> -> vector<8x2x4xf32>
    %377 = arith.mulf %359, %376 : vector<8x2x4xf32>
    %378 = arith.mulf %362, %376 : vector<8x2x4xf32>
    %379 = arith.mulf %365, %376 : vector<8x2x4xf32>
    %380 = arith.mulf %368, %376 : vector<8x2x4xf32>
    %381 = arith.mulf %371, %376 : vector<8x2x4xf32>
    %382 = tpu.concatenate %377, %378, %379, %380, %381 in 2 : vector<8x2x4xf32>, vector<8x2x4xf32>, vector<8x2x4xf32>, vector<8x2x4xf32>, vector<8x2x4xf32> -> vector<8x2x20xf32>
    %c0_127 = arith.constant 0 : index
    %c0_128 = arith.constant 0 : index
    %c0_129 = arith.constant 0 : index
    %383 = vector.load %arg7[%c0_127, %c0_128, %c0_129] : memref<8x2x128xf32, #tpu.memory_space<vmem>>, vector<8x2x20xf32>
    tpu.vector_store %arg7[%c0_127, %c0_128, %c0_129], %382 {strides = array<i32>} : memref<8x2x128xf32, #tpu.memory_space<vmem>>, vector<8x2x20xf32>,
    return
  }
}

</mosaic_0001>

<bundles_post_ra>
// kernel: tpu_custom_call.1
= control target key start
LH: loop header
LB: loop body
LE: loop exit
PB: predicated region body
PF: predicated region fallthrough
CT: control target
= control target key end

     0   :  { %15 = vsyncpa [#allocation4], 0  ;;  %s7007_s0 = inlined_call_operand.vmem [shape: f32[16,4], index: 0, kind: input, shape index: {}]   ;;  %s7008_s1 = inlined_call_operand.vmem [shape: f32[2,128], index: 1, kind: input, shape index: {}]   ;;  %s7009_s2 = inlined_call_operand.vmem [shape: f32[2,128], index: 2, kind: input, shape index: {}]   ;;  %s7010_s3 = inlined_call_operand.vmem [shape: bf16[4,512], index: 3, kind: input, shape index: {}]   ;;  %s7011_s4 = inlined_call_operand.hbm [shape: bf16[128,640], index: 4, kind: input, shape index: {}]   ;;  %s7012_s5 = inlined_call_operand.vmem [shape: f32[1,512], index: 5, kind: input, shape index: {}]   ;;  %s7013_s6 = inlined_call_operand.vmem [shape: f32[1,1,128], index: 6, kind: input, shape index: {}]   ;;  %s7014_s7 = inlined_call_operand.hbm [shape: f32[8,2,128], index: 7, kind: output, shape index: {0}]   ;;  %s7015_s8 = inlined_call_operand.hbm [shape: f32[2,128], index: 8, kind: output, shape index: {1}]   ;;  %s7016_s9 = inlined_call_operand.hbm [shape: f32[2,128], index: 9, kind: output, shape index: {2}]  }
   0x1   :  { %16 = vsyncpa [#allocation5], 0 }
   0x2   :  { %17 = vsyncpa [#allocation8], 0  ;;  %s5692_s30 = smov [#allocation3]   ;;  %s5598_s13 = scalar_lea.hbm %s7011_s4, 5120 }
   0x3   :  { %s31_s10 = sshll.u32 %s5692_s30, 4  ;;  %p5599_p0 = scmp.ne.s32.totalorder %s7011_s4, %s5598_s13  ;;  %s32_s10 = int_to_ptr.vmem [resolvable:$true] %s31_s10 }
   0x4   :  { %p5602_p1 = scmp.lt.u32.totalorder %s5598_s13, %s7011_s4 }
   0x6   :  { %p5604_p2 = pnand %p5602_p1, %p5599_p0 }
   0x8   :  { %5607 = shalt.err (!%p5604_p2)
}
   0x9   :  { %s5608_s18 = scalar_lea.vmem %s32_s10, 5120  ;;  %p5613_p4 = scmp.lt.s32.totalorder %s32_s10, %s32_s10 }
   0xa   :  { %p5609_p3 = scmp.ne.s32.totalorder %s32_s10, %s5608_s18  ;;  %p5614_p5 = scmp.lt.s32.totalorder %s5608_s18, %s5608_s18 }
   0xc   :  { %p5615_p6 = por %p5614_p5, %p5613_p4 }
   0xe   :  { %p5616_p7 = pnand %p5615_p6, %p5609_p3 }
  0x10   :  { %5619 = shalt.err (!%p5616_p7)
}
  0x11   :  { %s5693_s19 = smov 320   ;;  %s5694_s20 = smov 20  }
  0x12   :  { %37 = dma.hbm_to_vmem [thread:$0]  %s7011_s4, 5120, %s32_s10, [#allocation4], %s5693_s19, %s5693_s19, %s5694_s20  }
  0x13   :  { %5686 = dma.done.wait [#allocation4], 5120  }
  0x14   :  { %5687 = vsyncadd [#allocation4], 4294962176  ;;  %v52_v0 = vlaneseq  ;;  %v5695_v1 = vmov 1983009808   ;;  %v5696_v3 = vmov 0   ;;  %v49_v9 = vld [vmem:[%s7010_s3] sm:$0xff] }
  0x15   :  { %v75_v2 = vunpack.c.l.s4 %v5695_v1  ;;  %139 = vmatprep.mubr.bf16.mxu1 %v5696_v3  ;;  %492 = vmatprep.mubr.bf16.mxu0 %v5696_v3  ;;  %v5779_v7 = vld [vmem:[#allocation3 + $0x4] ss:$20 sps:$4 sm:$0xff]   ;;  %v5781_v8 = vld [vmem:[#allocation3] ss:$20 sps:$4 sm:$0xff]   ;;  %vm94_vm0 = vcmask 1041408   ;;  %v73_v10 = vcombine.high %v49_v9, %v49_v9  ;;  %v47_v15 = vld [vmem:[%s7007_s0 + $0x8] sm:$0xff] }
  0x16   :  { %v5776_v4 = vshrl.u32 %v52_v0, 7  ;;  %460 = vmatprep.subr.bf16.mxu0 %v5779_v7  ;;  %v5787_v12 = vld [vmem:[#allocation3 + $0x2c] ss:$20 sps:$4 sm:$0xff]   ;;  %v5789_v13 = vld [vmem:[#allocation3 + $0x28] ss:$20 sps:$4 sm:$0xff]   ;;  %vm90_vm1 = vcmask 31744  }
  0x17   :  { %v76_v5 = vunpack.c.0.s8 %v75_v2  ;;  %461 = vmatpush1.bf16.msra.mxu0 %v5781_v8  ;;  %v46_v14 = vld [vmem:[%s7007_s0] sm:$0xff]  ;;  %v5800_v19 = vld [vmem:[#allocation3 + $0x54] ss:$20 sps:$4 sm:$0xff]   ;;  %v5809_v24 = vld [vmem:[#allocation3 + $0x7c] ss:$20 sps:$4 sm:$0xff]   ;;  %v5697_v53 = vmov 0.0  }
  0x18   :  { %462 = vmatprep.subr.bf16.mxu0 %v5787_v12  ;;  %v48_v20 = vpack.c.bf16 %v47_v15, %v46_v14  ;;  %v5804_v22 = vld [vmem:[#allocation3 + $0x50] ss:$20 sps:$4 sm:$0xff]   ;;  %v5811_v25 = vld [vmem:[#allocation3 + $0xc] ss:$20 sps:$4 sm:$0xff]   ;;  %v5823_v28 = vld [vmem:[#allocation3 + $0x8] ss:$20 sps:$4 sm:$0xff]  }
  0x19   :  { %v79_v6 = vsub.s32 %v76_v5, %v5776_v4  ;;  %v5815_v26 = vld [vmem:[#allocation3 + $0x78] ss:$20 sps:$4 sm:$0xff]   ;;  %v5825_v29 = vld [vmem:[#allocation3 + $0xa0] ss:$20 sps:$4 sm:$0xff]   ;;  %v5833_v32 = vld [vmem:[#allocation3 + $0x30] ss:$20 sps:$4 sm:$0xff]  }
  0x1a   :  { %v5819_v27 = vld [vmem:[#allocation3 + $0xa4] ss:$20 sps:$4 sm:$0xff]   ;;  %v5828_v30 = vld [vmem:[#allocation3 + $0x34] ss:$20 sps:$4 sm:$0xff]   ;;  %v5830_v31 = vld [vmem:[#allocation3 + $0xcc] ss:$20 sps:$4 sm:$0xff]  }
  0x1b   :  { %v80_v11 = vrot.slane %v49_v9, %v79_v6  ;;  %v87_v16 = vrot.slane %v73_v10, %v79_v6  ;;  %463 = vmatpush1.bf16.msra.mxu0 %v5789_v13  ;;  %v5837_v33 = vld [vmem:[#allocation3 + $0xc8] ss:$20 sps:$4 sm:$0xff]   ;;  %v5845_v36 = vld [vmem:[#allocation3 + $0x58] ss:$20 sps:$4 sm:$0xff]   ;;  %v5848_v37 = vld [vmem:[#allocation3 + $0xf0] ss:$20 sps:$4 sm:$0xff]  }
  0x1c   :  { %464 = vmatprep.subr.bf16.mxu0 %v5800_v19  ;;  %v5839_v34 = vld [vmem:[#allocation3 + $0x5c] ss:$20 sps:$4 sm:$0xff]   ;;  %v5843_v35 = vld [vmem:[#allocation3 + $0xf4] ss:$20 sps:$4 sm:$0xff]   ;;  %v5850_v38 = vld [vmem:[#allocation3 + $0x84] ss:$20 sps:$4 sm:$0xff]  }
  0x1d   :  { %v88_v17 = vcombine.high %v80_v11, %v80_v11  ;;  %v96_v18 = vsel %vm94_vm0, %v80_v11, 0  ;;  %v89_v21 = vcombine.high %v87_v16, %v87_v16  ;;  %v102_v23 = vsel %vm94_vm0, %v87_v16, 0  ;;  %v5852_v39 = vld [vmem:[#allocation3 + $0x11c] ss:$20 sps:$4 sm:$0xff]   ;;  %v5858_v40 = vld [vmem:[#allocation3 + $0x80] ss:$20 sps:$4 sm:$0xff]  }
  0x1e   :  { %v5860_v41 = vld [vmem:[#allocation3 + $0x118] ss:$20 sps:$4 sm:$0xff]   ;;  %v201_v42 = vld [vmem:[%s7008_s1] sm:$0x3]  ;;  %v5871_v44 = vld [vmem:[#allocation3 + $0xa8] ss:$20 sps:$4 sm:$0xff]  }
  0x1f   :  { %4502 = vmatprep.subr.msk.bf16.mxu1 %vm94_vm0, %v88_v17  ;;  %465 = vmatpush1.bf16.msra.mxu0 %v5804_v22  ;;  %v5865_v43 = vld [vmem:[#allocation3 + $0xac] ss:$20 sps:$4 sm:$0xff]   ;;  %v5873_v45 = vpack.c.bf16 %v201_v42, %v201_v42  ;;  %v5875_v46 = vld [vmem:[#allocation3 + $0xd4] ss:$20 sps:$4 sm:$0xff]   ;;  %v5880_v47 = vld [vmem:[#allocation3 + $0xd0] ss:$20 sps:$4 sm:$0xff]  }
  0x20   :  { %108 = vmatpush1.bf16.msra.mxu1 %v96_v18  ;;  %466 = vmatprep.subr.bf16.mxu0 %v5809_v24  ;;  %v5883_v48 = vld [vmem:[#allocation3 + $0xfc] ss:$20 sps:$4 sm:$0xff]   ;;  %v5887_v49 = vld [vmem:[#allocation3 + $0xf8] ss:$20 sps:$4 sm:$0xff]   ;;  %v5893_v51 = vld [vmem:[#allocation3 + $0x120] ss:$20 sps:$4 sm:$0xff]  }
  0x21   :  { %4504 = vmatprep.subr.msk.bf16.mxu1 %vm94_vm0, %v89_v21  ;;  %v5889_v50 = vld [vmem:[#allocation3 + $0x124] ss:$20 sps:$4 sm:$0xff]   ;;  %v5191_v55 = vld [vmem:[#allocation3 + $0x60] ss:$20 sps:$4 sm:$0xff]   ;;  %v5192_v56 = vld [vmem:[#allocation3 + $0x88] ss:$20 sps:$4 sm:$0xff]  }
  0x22   :  { %v5189_v52 = vld [vmem:[#allocation3 + $0x10] ss:$20 sps:$4 sm:$0xff]   ;;  %v5190_v54 = vld [vmem:[#allocation3 + $0x38] ss:$20 sps:$4 sm:$0xff]   ;;  %v5195_v59 = vld [vmem:[#allocation3 + $0x100] ss:$20 sps:$4 sm:$0xff]  }
  0x23   :  { %4503 = vmatmul.mubr.msk.bf16.vlgmr.msra.gmra.mrb[0].mxu1 %vm90_vm1, %v48_v20  ;;  %467 = vmatpush1.bf16.msra.mxu0 %v5815_v26  ;;  %v5193_v57 = vld [vmem:[#allocation3 + $0xb0] ss:$20 sps:$4 sm:$0xff]   ;;  %v5194_v58 = vld [vmem:[#allocation3 + $0xd8] ss:$20 sps:$4 sm:$0xff]   ;;  %v5196_v60 = vld [vmem:[#allocation3 + $0x128] ss:$20 sps:$4 sm:$0xff]  }
  0x24   :  { %151 = vmatpush1.bf16.msra.mxu1 %v102_v23  ;;  %182 = vmatprep.mubr.bf16.mxu1 %v5696_v3  ;;  %vm5698_vm2 = vmmov 0   ;;  %v54_v61 = vsub.s32 0, %v5776_v4  ;;  %v50_v62 = vld [vmem:[%s7012_s5] sm:$0xf]  ;;  %v58_v63 = vsub.s32 1, %v5776_v4  ;;  %v62_v9 = vsub.s32 2, %v5776_v4 }
  0x25   :  { %501 = vmatprep.subr.bf16.mxu1 %v5811_v25  ;;  %468 = vmatprep.subr.bf16.mxu0 %v5819_v27  ;;  %v66_v14 = vsub.s32 3, %v5776_v4  ;;  %s5699_s10 = smov 124   ;;  %s5700_s11 = smov 120   ;;  %vm3733_vm3 = vcmask 484672   ;;  %vm4422_vm4 = vcmask 64512   ;;  %vm4431_vm5 = vcmask 97280  }
  0x26   :  { %v55_v0 = vrot.slane %v50_v62, %v54_v61  ;;  %v59_v1 = vrot.slane %v50_v62, %v58_v63  ;;  %v63_v17 = vrot.slane %v50_v62, %v62_v9  ;;  %s5701_s12 = smov 116   ;;  %s5702_s13 = smov 112   ;;  %vm4440_vm6 = vcmask 130048  }
  0x27   :  { %469 = vmatpush1.bf16.msra.mxu0 %v5825_v29  ;;  %v67_v18 = vrot.slane %v50_v62, %v66_v14  ;;  %s5704_s16 = smov 8   ;;  %s5705_s17 = smov 12   ;;  %vm4449_vm7 = vcmask 156672  }
  0x28   :  { %470 = vmatprep.subr.bf16.mxu0 %v5830_v31  ;;  %s5706_s18 = smov 16   ;;  %s5707_s19 = smov [#allocation7]  }
  0x29   :  { %s4476_s20 = sshll.u32 %s5707_s19, 4  ;;  %s4477_s20 = int_to_ptr.vmem [resolvable:$true] %s4476_s20 }
  0x2a   :  { %s5620_s21 = scalar_lea.vmem %s4477_s20, 32  ;;  %p5625_p9 = scmp.lt.s32.totalorder %s4477_s20, %s4477_s20 }
  0x2b   :  { %4505 = vmatmul.mubr.msk.bf16.vlgmr.msra.gmra.mrb[4].mxu1 %vm90_vm1, %v48_v20  ;;  %471 = vmatpush1.bf16.msra.mxu0 %v5837_v33  ;;  %p5621_p8 = scmp.ne.s32.totalorder %s4477_s20, %s5620_s21  ;;  %p5626_p10 = scmp.lt.s32.totalorder %s5620_s21, %s5620_s21 }
  0x2c   :  { %502 = vmatpush1.bf16.msra.mxu1 %v5823_v28  ;;  %533 = vmatprep.mubr.bf16.mxu1 %v5696_v3 }
  0x2d   :  { %503 = vmatprep.subr.bf16.mxu1 %v5828_v30  ;;  %472 = vmatprep.subr.bf16.mxu0 %v5843_v35  ;;  %p5627_p11 = por %p5626_p10, %p5625_p9 }
  0x2f   :  { %473 = vmatpush1.bf16.msra.mxu0 %v5848_v37  ;;  %p5628_p12 = pnand %p5627_p11, %p5621_p8 }
  0x30   :  { %504 = vmatpush1.bf16.msra.mxu1 %v5833_v32  ;;  %474 = vmatprep.subr.bf16.mxu0 %v5852_v39 }
  0x31   :  { %505 = vmatprep.subr.bf16.mxu1 %v5839_v34 }
  0x33   :  { %475 = vmatpush1.bf16.msra.mxu0 %v5860_v41 }
  0x34   :  { %506 = vmatpush1.bf16.msra.mxu1 %v5845_v36  ;;  %4940 = vmatprep.subr.bf16.mxu0 %v5697_v53 }
  0x35   :  { %507 = vmatprep.subr.bf16.mxu1 %v5850_v38 }
  0x36   :  { %493 = vmatmul.mubr.bf16.vlgmr.msra.gmra.mrb[0].mxu0 %v5873_v45 }
  0x37   :  { %4941 = vmatpush3.bf16.msra.mxu0 %v5189_v52  ;;  %4956 = vmatprep.mubr.msk.bf16.mxu0 %vm5698_vm2, %v5697_v53 }
  0x38   :  { %508 = vmatpush1.bf16.msra.mxu1 %v5858_v40  ;;  %4942 = vmatprep.subr.bf16.mxu0 %v5697_v53 }
  0x39   :  { %509 = vmatprep.subr.bf16.mxu1 %v5865_v43 }
  0x3b   :  { %4943 = vmatpush3.bf16.msra.mxu0 %v5190_v54 }
  0x3c   :  { %510 = vmatpush1.bf16.msra.mxu1 %v5871_v44  ;;  %4944 = vmatprep.subr.bf16.mxu0 %v5697_v53 }
  0x3d   :  { %511 = vmatprep.subr.bf16.mxu1 %v5875_v46 }
  0x3f   :  { %4945 = vmatpush3.bf16.msra.mxu0 %v5191_v55 }
  0x40   :  { %512 = vmatpush1.bf16.msra.mxu1 %v5880_v47  ;;  %4946 = vmatprep.subr.bf16.mxu0 %v5697_v53 }
  0x41   :  { %513 = vmatprep.subr.bf16.mxu1 %v5883_v48 }
  0x43   :  { %4947 = vmatpush3.bf16.msra.mxu0 %v5192_v56 }
  0x44   :  { %514 = vmatpush1.bf16.msra.mxu1 %v5887_v49  ;;  %4948 = vmatprep.subr.bf16.mxu0 %v5697_v53 }
  0x45   :  { %515 = vmatprep.subr.bf16.mxu1 %v5889_v50 }
  0x47   :  { %4949 = vmatpush3.bf16.msra.mxu0 %v5193_v57 }
  0x48   :  { %516 = vmatpush1.bf16.msra.mxu1 %v5893_v51  ;;  %4950 = vmatprep.subr.bf16.mxu0 %v5697_v53 }
  0x49   :  { %872 = vmatprep.subr.bf16.mxu1 %v5779_v7 }
  0x4b   :  { %534 = vmatmul.mubr.bf16.vlgmr.msra.gmra.mrb[8].mxu1 %v5873_v45  ;;  %4951 = vmatpush3.bf16.msra.mxu0 %v5194_v58 }
  0x4c   :  { %873 = vmatpush1.bf16.msra.mxu1 %v5781_v8  ;;  %904 = vmatprep.mubr.bf16.mxu1 %v5696_v3 }
  0x4d   :  { %874 = vmatprep.subr.bf16.mxu1 %v5787_v12  ;;  %4952 = vmatprep.subr.bf16.mxu0 %v5697_v53 }
  0x4f   :  { %4953 = vmatpush3.bf16.msra.mxu0 %v5195_v59 }
  0x50   :  { %875 = vmatpush1.bf16.msra.mxu1 %v5789_v13  ;;  %4954 = vmatprep.subr.bf16.mxu0 %v5697_v53 }
  0x51   :  { %876 = vmatprep.subr.bf16.mxu1 %v5800_v19 }
  0x53   :  { %4955 = vmatpush3.bf16.msra.mxu0 %v5196_v60 }
  0x54   :  { %877 = vmatpush1.bf16.msra.mxu1 %v5804_v22  ;;  %913 = vmatprep.subr.bf16.mxu0 %v5811_v25 }
  0x55   :  { %878 = vmatprep.subr.bf16.mxu1 %v5809_v24 }
  0x56   :  { %4957 = vmatmul.mubr.bf16.vlgmr.msra.gmra.mrb[4].mxu0 %v5873_v45 }
  0x57   :  { %914 = vmatpush1.bf16.msra.mxu0 %v5823_v28  ;;  %945 = vmatprep.mubr.bf16.mxu0 %v5696_v3 }
  0x58   :  { %879 = vmatpush1.bf16.msra.mxu1 %v5815_v26  ;;  %915 = vmatprep.subr.bf16.mxu0 %v5828_v30 }
  0x59   :  { %880 = vmatprep.subr.bf16.mxu1 %v5819_v27 }
  0x5b   :  { %916 = vmatpush1.bf16.msra.mxu0 %v5833_v32 }
  0x5c   :  { %881 = vmatpush1.bf16.msra.mxu1 %v5825_v29  ;;  %917 = vmatprep.subr.bf16.mxu0 %v5839_v34 }
  0x5d   :  { %882 = vmatprep.subr.bf16.mxu1 %v5830_v31 }
  0x5f   :  { %918 = vmatpush1.bf16.msra.mxu0 %v5845_v36 }
  0x60   :  { %883 = vmatpush1.bf16.msra.mxu1 %v5837_v33  ;;  %919 = vmatprep.subr.bf16.mxu0 %v5850_v38 }
  0x61   :  { %884 = vmatprep.subr.bf16.mxu1 %v5843_v35 }
  0x63   :  { %920 = vmatpush1.bf16.msra.mxu0 %v5858_v40 }
  0x64   :  { %885 = vmatpush1.bf16.msra.mxu1 %v5848_v37  ;;  %921 = vmatprep.subr.bf16.mxu0 %v5865_v43 }
  0x65   :  { %886 = vmatprep.subr.bf16.mxu1 %v5852_v39 }
  0x67   :  { %922 = vmatpush1.bf16.msra.mxu0 %v5871_v44 }
  0x68   :  { %887 = vmatpush1.bf16.msra.mxu1 %v5860_v41  ;;  %923 = vmatprep.subr.bf16.mxu0 %v5875_v46 }
  0x69   :  { %4960 = vmatprep.subr.bf16.mxu1 %v5697_v53 }
  0x6b   :  { %924 = vmatpush1.bf16.msra.mxu0 %v5880_v47 }
  0x6c   :  { %925 = vmatprep.subr.bf16.mxu0 %v5883_v48 }
  0x6f   :  { %926 = vmatpush1.bf16.msra.mxu0 %v5887_v49 }
  0x70   :  { %927 = vmatprep.subr.bf16.mxu0 %v5889_v50 }
  0x73   :  { %928 = vmatpush1.bf16.msra.mxu0 %v5893_v51 }
  0x74   :  { %1296 = vmatprep.subr.bf16.mxu0 %v5779_v7 }
  0xf6   :  { %v141_v2 = vpop.f32.mrb[0].mxu1 }
  0xf7   :  { %v142_v5 = vadd.f32 %v141_v2, %v55_v0  ;;  %v143_v6 = vpop.f32.mrb[1].mxu1 }
  0xf8   :  { %v144_v10 = vadd.f32 %v143_v6, %v59_v1  ;;  %v145_v11 = vpop.f32.mrb[2].mxu1 }
  0xf9   :  { %193 = vst [vmem:[#allocation2] sm:$0xff] %v142_v5  ;;  %v146_v7 = vadd.f32 %v145_v11, %v55_v0  ;;  %v147_v15 = vpop.f32.mrb[3].mxu1 }
  0xfa   :  { %194 = vst [vmem:[#allocation2 + $0x8] sm:$0xff] %v144_v10  ;;  %v148_v16 = vadd.f32 %v147_v15, %v59_v1 }
  0xfb   :  { %197 = vst [vmem:[#allocation2 + $0x20] sm:$0xff] %v146_v7 }
  0xfc   :  { %198 = vst [vmem:[#allocation2 + $0x28] sm:$0xff] %v148_v16 }
  0xfe   :  { %v184_v20 = vpop.f32.mrb[4].mxu1 }
  0xff   :  { %v185_v21 = vadd.f32 %v184_v20, %v63_v17  ;;  %v186_v23 = vpop.f32.mrb[5].mxu1  ;;  %v202_v20 = vld [vmem:[%s7009_s2] sm:$0x3] }
 0x100   :  { %v187_v42 = vadd.f32 %v186_v23, %v67_v18  ;;  %v188_v45 = vpop.f32.mrb[6].mxu1  ;;  %v583_v56 = vld [vmem:[#allocation2] sm:$0x3] }
 0x101   :  { %195 = vst [vmem:[#allocation2 + $0x10] sm:$0xff] %v185_v21  ;;  %v189_v52 = vadd.f32 %v188_v45, %v63_v17  ;;  %v190_v54 = vpop.f32.mrb[7].mxu1  ;;  %v584_v59 = vld [vmem:[#allocation2 + $0x8] sm:$0x3] }
 0x102   :  { %196 = vst [vmem:[#allocation2 + $0x18] sm:$0xff] %v187_v42  ;;  %v191_v55 = vadd.f32 %v190_v54, %v67_v18 }
 0x103   :  { %199 = vst [vmem:[#allocation2 + $0x30] sm:$0xff] %v189_v52 }
 0x104   :  { %200 = vst [vmem:[#allocation2 + $0x38] sm:$0xff] %v191_v55 }
 0x108   :  { %v585_v9 = vld [vmem:[#allocation2 + $0x10] sm:$0x3] }
 0x109   :  { %v494_v4 = vpop.f32.mrb[0].mxu0  ;;  %v586_v7 = vld [vmem:[#allocation2 + $0x18] sm:$0x3] }
 0x10a   :  { %v587_v57 = vadd.f32 %v583_v56, %v494_v4  ;;  %v496_v58 = vpop.f32.mrb[1].mxu0 }
 0x10b   :  { %v588_v60 = vadd.f32 %v584_v59, %v496_v58  ;;  %v498_v61 = vpop.f32.mrb[2].mxu0  ;;  %v5197_v59 = vld [vmem:[#allocation3 + $0x10] ss:$20 sps:$4 sm:$0xff]  }
 0x10c   :  { %v4546_v62 = vmul.f32 -1.442695, %v587_v57  ;;  %v499_v63 = vpop.f32.mrb[3].mxu0  ;;  %v5198_v61 = vld [vmem:[#allocation3 + $0x38] ss:$20 sps:$4 sm:$0xff]  }
 0x10d   :  { %v4547_v0 = vmul.f32 -1.442695, %v588_v60  ;;  %v5200_v63 = vld [vmem:[#allocation3 + $0x88] ss:$20 sps:$4 sm:$0xff]  }
 0x10e   :  { %5357 = vpow2.f32 %v4546_v62  ;;  %v5199_v62 = vld [vmem:[#allocation3 + $0x60] ss:$20 sps:$4 sm:$0xff]  }
 0x10f   :  { %5359 = vpow2.f32 %v4547_v0 }
 0x118   :  { %v5358_v1 = vpop.eup %5357 }
 0x119   :  { %v5360_v2 = vpop.eup %5359  ;;  %v594_v5 = vadd.f32 1.0, %v5358_v1 }
 0x11a   :  { %v600_v10 = vadd.f32 1.0, %v5360_v2 }
 0x11b   :  { %5361 = vrcp.f32 %v594_v5 }
 0x11c   :  { %5363 = vrcp.f32 %v600_v10 }
 0x11e   :  { %v535_v6 = vpop.f32.mrb[8].mxu1 }
 0x11f   :  { %v589_v11 = vadd.f32 %v585_v9, %v535_v6  ;;  %v537_v14 = vpop.f32.mrb[9].mxu1 }
 0x120   :  { %v590_v15 = vadd.f32 %v586_v7, %v537_v14  ;;  %v539_v16 = vpop.f32.mrb[10].mxu1 }
 0x121   :  { %v540_v17 = vpop.f32.mrb[11].mxu1  ;;  %5365 = vtanh.f32 %v589_v11 }
 0x122   :  { %v4548_v18 = vmul.f32 -1.442695, %v590_v15 }
 0x124   :  { %5367 = vpow2.f32 %v4548_v18 }
 0x125   :  { %v5362_v21 = vpop.eup %5361 }
 0x126   :  { %v5364_v23 = vpop.eup %5363 }
 0x127   :  { %v610_v45 = vmul.f32 %v5364_v23, %v202_v20  ;;  %v6009_v23 = vld [vmem:[%s7013_s6] ss:$0 sm:$0xff] }
 0x12b   :  { %v5366_v42 = vpop.eup %5365 }
 0x12c   :  { %v611_v52 = vmul.f32 %v5366_v42, %v5362_v21 }
 0x12e   :  { %v5368_v54 = vpop.eup %5367  ;;  %v5956_v55 = vadd.f32 %v611_v52, %v610_v45 }
 0x12f   :  { %v607_v4 = vadd.f32 1.0, %v5368_v54 }
 0x130   :  { %5369 = vtanh.f32 %v5956_v55 }
 0x131   :  { %5371 = vrcp.f32 %v607_v4 }
 0x13a   :  { %v5370_v56 = vpop.eup %5369 }
 0x13b   :  { %v5372_v57 = vpop.eup %5371 }
 0x13c   :  { %v614_v58 = vmul.f32 %v5372_v57, %v5370_v56  ;;  %v5205_v56 = vld [vmem:[#allocation3 + $0x10] ss:$20 sps:$4 sm:$0xff]  }
 0x13e   :  { %v615_v60 = vpack.c.bf16 %v614_v58, %v614_v58  ;;  %v5206_v58 = vld [vmem:[#allocation3 + $0x38] ss:$20 sps:$4 sm:$0xff]  }
 0x140   :  { %905 = vmatmul.mubr.bf16.vlgmr.msra.gmra.mrb[12].mxu1 %v615_v60  ;;  %946 = vmatmul.mubr.bf16.vlgmr.msra.gmra.mrb[8].mxu0 %v615_v60 }
 0x141   :  { %4961 = vmatpush3.bf16.msra.mxu1 %v5197_v59  ;;  %4976 = vmatprep.mubr.msk.bf16.mxu1 %vm5698_vm2, %v5697_v53  ;;  %v5207_v59 = vld [vmem:[#allocation3 + $0x60] ss:$20 sps:$4 sm:$0xff]  }
 0x142   :  { %4962 = vmatprep.subr.bf16.mxu1 %v5697_v53  ;;  %1297 = vmatpush1.bf16.msra.mxu0 %v5781_v8  ;;  %v5201_v8 = vld [vmem:[#allocation3 + $0xb0] ss:$20 sps:$4 sm:$0xff]  }
 0x143   :  { %1298 = vmatprep.subr.bf16.mxu0 %v5787_v12  ;;  %1328 = vmatprep.mubr.bf16.mxu0 %v5696_v3  ;;  %v5202_v12 = vld [vmem:[#allocation3 + $0xd8] ss:$20 sps:$4 sm:$0xff]  }
 0x145   :  { %4963 = vmatpush3.bf16.msra.mxu1 %v5198_v61  ;;  %v5208_v61 = vld [vmem:[#allocation3 + $0x88] ss:$20 sps:$4 sm:$0xff]  }
 0x146   :  { %4964 = vmatprep.subr.bf16.mxu1 %v5697_v53  ;;  %1299 = vmatpush1.bf16.msra.mxu0 %v5789_v13  ;;  %v5203_v13 = vld [vmem:[#allocation3 + $0x100] ss:$20 sps:$4 sm:$0xff]  }
 0x147   :  { %1300 = vmatprep.subr.bf16.mxu0 %v5800_v19  ;;  %v5204_v19 = vld [vmem:[#allocation3 + $0x128] ss:$20 sps:$4 sm:$0xff]  }
 0x149   :  { %4965 = vmatpush3.bf16.msra.mxu1 %v5199_v62  ;;  %v5209_v62 = vld [vmem:[#allocation3 + $0xb0] ss:$20 sps:$4 sm:$0xff]  }
 0x14a   :  { %4966 = vmatprep.subr.bf16.mxu1 %v5697_v53  ;;  %1301 = vmatpush1.bf16.msra.mxu0 %v5804_v22  ;;  %v576_v22 = vpop.f32.mrb[4].mxu0 }
 0x14b   :  { %1302 = vmatprep.subr.bf16.mxu0 %v5809_v24  ;;  %582 = vst [vmem:[#allocation6] sm:$0x3] %v576_v22  ;;  %v4958_v24 = vpop.f32.mrb[5].mxu0  ;;  %v6040_v22 = vld [vmem:[#allocation3 + $0xc] ss:$20 sps:$4 sm:$0xff]  }
 0x14c   :  { %v6043_v24 = vld [vmem:[#allocation3 + $0x8] ss:$20 sps:$4 sm:$0xff]  }
 0x14d   :  { %4967 = vmatpush3.bf16.msra.mxu1 %v5200_v63  ;;  %v5210_v63 = vld [vmem:[#allocation3 + $0xd8] ss:$20 sps:$4 sm:$0xff]  }
 0x14e   :  { %4968 = vmatprep.subr.bf16.mxu1 %v5697_v53  ;;  %1303 = vmatpush1.bf16.msra.mxu0 %v5815_v26 }
 0x14f   :  { %1304 = vmatprep.subr.bf16.mxu0 %v5819_v27  ;;  %v995_v27 = vld [vmem:[#allocation2] sm:$0xc] }
 0x151   :  { %4969 = vmatpush3.bf16.msra.mxu1 %v5201_v8  ;;  %v5211_v8 = vld [vmem:[#allocation3 + $0x100] ss:$20 sps:$4 sm:$0xff]  }
 0x152   :  { %4970 = vmatprep.subr.bf16.mxu1 %v5697_v53  ;;  %1305 = vmatpush1.bf16.msra.mxu0 %v5825_v29  ;;  %v1003_v29 = vrot.slane %v995_v27, 2  ;;  %v6052_v27 = vld [vmem:[#allocation3 + $0x34] ss:$20 sps:$4 sm:$0xff]  }
 0x153   :  { %1306 = vmatprep.subr.bf16.mxu0 %v5830_v31 }
 0x155   :  { %4971 = vmatpush3.bf16.msra.mxu1 %v5202_v12  ;;  %v5212_v12 = vld [vmem:[#allocation3 + $0x128] ss:$20 sps:$4 sm:$0xff]  }
 0x156   :  { %4972 = vmatprep.subr.bf16.mxu1 %v5697_v53  ;;  %1307 = vmatpush1.bf16.msra.mxu0 %v5837_v33 }
 0x157   :  { %1308 = vmatprep.subr.bf16.mxu0 %v5843_v35 }
 0x159   :  { %4973 = vmatpush3.bf16.msra.mxu1 %v5203_v13  ;;  %v6036_v13 = vld [vmem:[#allocation3 + $0x4] ss:$20 sps:$4 sm:$0xff]  }
 0x15a   :  { %4974 = vmatprep.subr.bf16.mxu1 %v5697_v53  ;;  %1309 = vmatpush1.bf16.msra.mxu0 %v5848_v37 }
 0x15b   :  { %1310 = vmatprep.subr.bf16.mxu0 %v5852_v39 }
 0x15d   :  { %4975 = vmatpush3.bf16.msra.mxu1 %v5204_v19  ;;  %v6038_v19 = vld [vmem:[#allocation3] ss:$20 sps:$4 sm:$0xff]  }
 0x15e   :  { %1337 = vmatprep.subr.bf16.mxu1 %v5811_v25  ;;  %1311 = vmatpush1.bf16.msra.mxu0 %v5860_v41  ;;  %v579_v25 = vpop.f32.mrb[6].mxu0 }
 0x15f   :  { %4980 = vmatprep.subr.bf16.mxu0 %v5697_v53  ;;  %v4959_v26 = vpop.f32.mrb[7].mxu0  ;;  %v6048_v25 = vld [vmem:[#allocation3 + $0x2c] ss:$20 sps:$4 sm:$0xff]  }
 0x160   :  { %4977 = vmatmul.mubr.bf16.vlgmr.msra.gmra.mrb[16].mxu1 %v615_v60  ;;  %v6050_v26 = vld [vmem:[#allocation3 + $0x28] ss:$20 sps:$4 sm:$0xff]  }
 0x161   :  { %1338 = vmatpush1.bf16.msra.mxu1 %v5823_v28  ;;  %1369 = vmatprep.mubr.bf16.mxu1 %v5696_v3  ;;  %v996_v28 = vld [vmem:[#allocation2 + $0x8] sm:$0xc] }
 0x162   :  { %1339 = vmatprep.subr.bf16.mxu1 %v5828_v30 }
 0x165   :  { %1340 = vmatpush1.bf16.msra.mxu1 %v5833_v32  ;;  %v1004_v32 = vrot.slane %v996_v28, 2  ;;  %v6055_v28 = vld [vmem:[#allocation3 + $0x30] ss:$20 sps:$4 sm:$0xff]  }
 0x166   :  { %1341 = vmatprep.subr.bf16.mxu1 %v5839_v34 }
 0x169   :  { %1342 = vmatpush1.bf16.msra.mxu1 %v5845_v36 }
 0x16a   :  { %1343 = vmatprep.subr.bf16.mxu1 %v5850_v38 }
 0x16d   :  { %1344 = vmatpush1.bf16.msra.mxu1 %v5858_v40  ;;  %v998_v40 = vld [vmem:[#allocation2 + $0x18] sm:$0xc] }
 0x16e   :  { %1345 = vmatprep.subr.bf16.mxu1 %v5865_v43 }
 0x171   :  { %1346 = vmatpush1.bf16.msra.mxu1 %v5871_v44 }
 0x172   :  { %1347 = vmatprep.subr.bf16.mxu1 %v5875_v46  ;;  %v1006_v46 = vrot.slane %v998_v40, 2  ;;  %v6091_v40 = vld [vmem:[#allocation3 + $0xa8] ss:$20 sps:$4 sm:$0xff]  }
 0x175   :  { %1348 = vmatpush1.bf16.msra.mxu1 %v5880_v47  ;;  %v997_v47 = vld [vmem:[#allocation2 + $0x10] sm:$0xc] }
 0x176   :  { %1349 = vmatprep.subr.bf16.mxu1 %v5883_v48 }
 0x179   :  { %1350 = vmatpush1.bf16.msra.mxu1 %v5887_v49  ;;  %v1005_v49 = vrot.slane %v997_v47, 2  ;;  %v6108_v47 = vld [vmem:[#allocation3 + $0xf4] ss:$20 sps:$4 sm:$0xff]  }
 0x17a   :  { %1351 = vmatprep.subr.bf16.mxu1 %v5889_v50 }
 0x17d   :  { %1352 = vmatpush1.bf16.msra.mxu1 %v5893_v51 }
 0x17e   :  { %1721 = vmatprep.subr.bf16.mxu1 %v6036_v13 }
 0x213   :  { %v906_v30 = vpop.f32.mrb[12].mxu1  ;;  %v947_v31 = vpop.f32.mrb[8].mxu0 }
 0x214   :  { %v1011_v33 = vadd.f32 %v1003_v29, %v906_v30  ;;  %v908_v34 = vpop.f32.mrb[13].mxu1  ;;  %v949_v35 = vpop.f32.mrb[9].mxu0  ;;  %v1013_v51 = vadd.f32 %v1005_v49, %v947_v31  ;;  %v6060_v29 = vld [vmem:[#allocation3 + $0x54] ss:$20 sps:$4 sm:$0xff]   ;;  %v6062_v30 = vld [vmem:[#allocation3 + $0x50] ss:$20 sps:$4 sm:$0xff]  }
 0x215   :  { %v1012_v36 = vadd.f32 %v1004_v32, %v908_v34  ;;  %v910_v37 = vpop.f32.mrb[14].mxu1  ;;  %v951_v38 = vpop.f32.mrb[10].mxu0  ;;  %v1014_v48 = vadd.f32 %v1006_v46, %v949_v35  ;;  %v6064_v31 = vld [vmem:[#allocation3 + $0x5c] ss:$20 sps:$4 sm:$0xff]   ;;  %v6067_v32 = vld [vmem:[#allocation3 + $0x58] ss:$20 sps:$4 sm:$0xff]  }
 0x216   :  { %v4589_v39 = vmul.f32 -1.442695, %v1011_v33  ;;  %v911_v41 = vpop.f32.mrb[15].mxu1  ;;  %v952_v43 = vpop.f32.mrb[11].mxu0  ;;  %v6072_v33 = vld [vmem:[#allocation3 + $0x7c] ss:$20 sps:$4 sm:$0xff]  }
 0x217   :  { %v4590_v44 = vmul.f32 -1.442695, %v1012_v36  ;;  %v4591_v50 = vmul.f32 -1.442695, %v1014_v48  ;;  %v6074_v34 = vld [vmem:[#allocation3 + $0x78] ss:$20 sps:$4 sm:$0xff]  }
 0x218   :  { %5373 = vpow2.f32 %v4589_v39  ;;  %v6076_v35 = vld [vmem:[#allocation3 + $0x84] ss:$20 sps:$4 sm:$0xff]   ;;  %v6079_v36 = vld [vmem:[#allocation3 + $0x80] ss:$20 sps:$4 sm:$0xff]   ;;  %v6098_v43 = vld [vmem:[#allocation3 + $0xc8] ss:$20 sps:$4 sm:$0xff]  }
 0x219   :  { %5375 = vpow2.f32 %v4590_v44  ;;  %v6084_v37 = vld [vmem:[#allocation3 + $0xa4] ss:$20 sps:$4 sm:$0xff]   ;;  %v6086_v38 = vld [vmem:[#allocation3 + $0xa0] ss:$20 sps:$4 sm:$0xff]   ;;  %v6112_v49 = vld [vmem:[#allocation3 + $0xfc] ss:$20 sps:$4 sm:$0xff]  }
 0x21a   :  { %5377 = vpow2.f32 %v4591_v50  ;;  %v6088_v39 = vld [vmem:[#allocation3 + $0xac] ss:$20 sps:$4 sm:$0xff]   ;;  %v6100_v44 = vld [vmem:[#allocation3 + $0xd4] ss:$20 sps:$4 sm:$0xff]   ;;  %v6103_v46 = vld [vmem:[#allocation3 + $0xd0] ss:$20 sps:$4 sm:$0xff]  }
 0x21b   :  { %5379 = vtanh.f32 %v1013_v51  ;;  %v6096_v41 = vld [vmem:[#allocation3 + $0xcc] ss:$20 sps:$4 sm:$0xff]   ;;  %v6110_v48 = vld [vmem:[#allocation3 + $0xf0] ss:$20 sps:$4 sm:$0xff]  }
 0x21c   :  { %v6115_v50 = vld [vmem:[#allocation3 + $0xf8] ss:$20 sps:$4 sm:$0xff]   ;;  %v6120_v51 = vld [vmem:[#allocation3 + $0x11c] ss:$20 sps:$4 sm:$0xff]  }
 0x222   :  { %v5374_v0 = vpop.eup %5373 }
 0x223   :  { %v5376_v1 = vpop.eup %5375  ;;  %v1018_v2 = vadd.f32 1.0, %v5374_v0  ;;  %v6122_v0 = vld [vmem:[#allocation3 + $0x118] ss:$20 sps:$4 sm:$0xff]  }
 0x224   :  { %v1024_v5 = vadd.f32 1.0, %v5376_v1  ;;  %v5378_v6 = vpop.eup %5377  ;;  %v6124_v1 = vld [vmem:[#allocation3 + $0x124] ss:$20 sps:$4 sm:$0xff]  }
 0x225   :  { %5381 = vrcp.f32 %v1018_v2  ;;  %v5380_v9 = vpop.eup %5379  ;;  %v1031_v7 = vadd.f32 1.0, %v5378_v6  ;;  %v6127_v2 = vld [vmem:[#allocation3 + $0x120] ss:$20 sps:$4 sm:$0xff]   ;;  %v1421_v6 = vld [vmem:[#allocation2 + $0x8] sm:$0x30] }
 0x226   :  { %5383 = vrcp.f32 %v1024_v5  ;;  %v1420_v5 = vld [vmem:[#allocation2] sm:$0x30] }
 0x227   :  { %5385 = vrcp.f32 %v1031_v7 }
 0x22f   :  { %v5382_v10 = vpop.eup %5381 }
 0x230   :  { %v5384_v11 = vpop.eup %5383  ;;  %v1035_v14 = vmul.f32 %v5382_v10, %v5380_v9  ;;  %v1428_v9 = vrot.slane %v1420_v5, 4 }
 0x231   :  { %v1034_v15 = vmul.f32 %v5384_v11, %v5956_v55  ;;  %v5386_v52 = vpop.eup %5385 }
 0x233   :  { %v6003_v16 = vadd.f32 %v1035_v14, %v1034_v15  ;;  %v988_v17 = vpop.f32.mrb[16].mxu1  ;;  %v1429_v14 = vrot.slane %v1421_v6, 4 }
 0x234   :  { %994 = vst [vmem:[#allocation6] sm:$0x3] %v988_v17  ;;  %v4978_v18 = vpop.f32.mrb[17].mxu1 }
 0x235   :  { %v991_v20 = vpop.f32.mrb[18].mxu1  ;;  %5387 = vtanh.f32 %v6003_v16 }
 0x236   :  { %v4979_v21 = vpop.f32.mrb[19].mxu1 }
 0x23b   :  { %v3686_v42 = vld [vmem:[#allocation6] sm:$0x3] }
 0x23c   :  { %v6012_v45 = vadd.f32 %v6009_v23, %v3686_v42 }
 0x23e   :  { %3709 = vst [vmem:[#allocation6] sm:$0x3] %v6012_v45  ;;  %v3717_v54 = vmul.f32 1.442695, %v6012_v45  ;;  %3750 = vrot.lane.b32.xlu0 %v6012_v45, %s5699_s10 }
 0x23f   :  { %v5388_v55 = vpop.eup %5387 }
 0x240   :  { %5389 = vpow2.f32 %v3717_v54  ;;  %v1038_v4 = vmul.f32 %v5388_v55, %v5386_v52  ;;  %v1423_v52 = vld [vmem:[#allocation2 + $0x18] sm:$0x30] }
 0x242   :  { %3782 = vrot.lane.b32.xlu0 %v6012_v45, %s5700_s11  ;;  %v1039_v57 = vpack.c.bf16 %v1038_v4, %v1038_v4 }
 0x244   :  { %1329 = vmatmul.mubr.bf16.vlgmr.msra.gmra.mrb[12].mxu0 %v1039_v57  ;;  %1370 = vmatmul.mubr.bf16.vlgmr.msra.gmra.mrb[20].mxu1 %v1039_v57 }
 0x245   :  { %4981 = vmatpush3.bf16.msra.mxu0 %v5205_v56  ;;  %4996 = vmatprep.mubr.msk.bf16.mxu0 %vm5698_vm2, %v5697_v53  ;;  %v1431_v56 = vrot.slane %v1423_v52, 4 }
 0x246   :  { %3814 = vrot.lane.b32.xlu0 %v6012_v45, %s5701_s12  ;;  %4982 = vmatprep.subr.bf16.mxu0 %v5697_v53 }
 0x247   :  { %1753 = vmatprep.mubr.bf16.mxu1 %v5696_v3  ;;  %1722 = vmatpush1.bf16.msra.mxu1 %v6038_v19 }
 0x248   :  { %1723 = vmatprep.subr.bf16.mxu1 %v6048_v25 }
 0x249   :  { %4983 = vmatpush3.bf16.msra.mxu0 %v5206_v58 }
 0x24a   :  { %v5390_v60 = vpop.eup %5389  ;;  %3846 = vrot.lane.b32.xlu0 %v6012_v45, %s5702_s13  ;;  %4984 = vmatprep.subr.bf16.mxu0 %v5697_v53 }
 0x24b   :  { %3734 = vst.msk [vmem:[#allocation6] sm:$0x3] %vm3733_vm3, %v5390_v60  ;;  %1724 = vmatpush1.bf16.msra.mxu1 %v6050_v26 }
 0x24c   :  { %1725 = vmatprep.subr.bf16.mxu1 %v6060_v29 }
 0x24d   :  { %4985 = vmatpush3.bf16.msra.mxu0 %v5207_v59 }
 0x24e   :  { %4986 = vmatprep.subr.bf16.mxu0 %v5697_v53 }
 0x24f   :  { %1726 = vmatpush1.bf16.msra.mxu1 %v6062_v30 }
 0x250   :  { %1727 = vmatprep.subr.bf16.mxu1 %v6072_v33 }
 0x251   :  { %4987 = vmatpush3.bf16.msra.mxu0 %v5208_v61 }
 0x252   :  { %4988 = vmatprep.subr.bf16.mxu0 %v5697_v53 }
 0x253   :  { %1728 = vmatpush1.bf16.msra.mxu1 %v6074_v34 }
 0x254   :  { %1729 = vmatprep.subr.bf16.mxu1 %v6084_v37 }
 0x255   :  { %4989 = vmatpush3.bf16.msra.mxu0 %v5209_v62 }
 0x256   :  { %4990 = vmatprep.subr.bf16.mxu0 %v5697_v53 }
 0x257   :  { %1730 = vmatpush1.bf16.msra.mxu1 %v6086_v38 }
 0x258   :  { %1731 = vmatprep.subr.bf16.mxu1 %v6096_v41 }
 0x259   :  { %4991 = vmatpush3.bf16.msra.mxu0 %v5210_v63 }
 0x25a   :  { %4992 = vmatprep.subr.bf16.mxu0 %v5697_v53 }
 0x25b   :  { %1732 = vmatpush1.bf16.msra.mxu1 %v6098_v43 }
 0x25c   :  { %1733 = vmatprep.subr.bf16.mxu1 %v6108_v47 }
 0x25d   :  { %4993 = vmatpush3.bf16.msra.mxu0 %v5211_v8 }
 0x25e   :  { %4994 = vmatprep.subr.bf16.mxu0 %v5697_v53 }
 0x25f   :  { %1734 = vmatpush1.bf16.msra.mxu1 %v6110_v48 }
 0x260   :  { %1735 = vmatprep.subr.bf16.mxu1 %v6120_v51 }
 0x261   :  { %4995 = vmatpush3.bf16.msra.mxu0 %v5212_v12 }
 0x262   :  { %1762 = vmatprep.subr.bf16.mxu0 %v6040_v22 }
 0x263   :  { %1736 = vmatpush1.bf16.msra.mxu1 %v6122_v0 }
 0x264   :  { %4997 = vmatmul.mubr.bf16.vlgmr.msra.gmra.mrb[16].mxu0 %v1039_v57  ;;  %5000 = vmatprep.subr.bf16.mxu1 %v5697_v53  ;;  %v1422_v57 = vld [vmem:[#allocation2 + $0x10] sm:$0x30] }
 0x265   :  { %1794 = vmatprep.mubr.bf16.mxu0 %v5696_v3  ;;  %1763 = vmatpush1.bf16.msra.mxu0 %v6043_v24  ;;  %v1430_v59 = vrot.slane %v1422_v57, 4 }
 0x266   :  { %1764 = vmatprep.subr.bf16.mxu0 %v6052_v27 }
 0x269   :  { %1765 = vmatpush1.bf16.msra.mxu0 %v6055_v28 }
 0x26a   :  { %1766 = vmatprep.subr.bf16.mxu0 %v6064_v31 }
 0x26d   :  { %1767 = vmatpush1.bf16.msra.mxu0 %v6067_v32 }
 0x26e   :  { %1768 = vmatprep.subr.bf16.mxu0 %v6076_v35 }
 0x271   :  { %1769 = vmatpush1.bf16.msra.mxu0 %v6079_v36 }
 0x272   :  { %1770 = vmatprep.subr.bf16.mxu0 %v6088_v39 }
 0x275   :  { %1771 = vmatpush1.bf16.msra.mxu0 %v6091_v40 }
 0x276   :  { %1772 = vmatprep.subr.bf16.mxu0 %v6100_v44 }
 0x279   :  { %1773 = vmatpush1.bf16.msra.mxu0 %v6103_v46 }
 0x27a   :  { %1774 = vmatprep.subr.bf16.mxu0 %v6112_v49 }
 0x27d   :  { %1775 = vmatpush1.bf16.msra.mxu0 %v6115_v50 }
 0x27e   :  { %1776 = vmatprep.subr.bf16.mxu0 %v6124_v1 }
 0x281   :  { %1777 = vmatpush1.bf16.msra.mxu0 %v6127_v2 }
 0x282   :  { %2146 = vmatprep.subr.bf16.mxu0 %v6036_v13 }
 0x317   :  { %v1330_v10 = vpop.f32.mrb[12].mxu0  ;;  %v1371_v11 = vpop.f32.mrb[20].mxu1 }
 0x318   :  { %v1436_v7 = vadd.f32 %v1428_v9, %v1330_v10  ;;  %v1332_v15 = vpop.f32.mrb[13].mxu0  ;;  %v1373_v17 = vpop.f32.mrb[21].mxu1  ;;  %v1438_v61 = vadd.f32 %v1430_v59, %v1371_v11  ;;  %v5263_v59 = vld [vmem:[#allocation3 + $0x60] ss:$20 sps:$4 sm:$0xff]  }
 0x319   :  { %v1437_v18 = vadd.f32 %v1429_v14, %v1332_v15  ;;  %v1334_v20 = vpop.f32.mrb[14].mxu0  ;;  %v1375_v21 = vpop.f32.mrb[22].mxu1  ;;  %v1439_v58 = vadd.f32 %v1431_v56, %v1373_v17  ;;  %v5261_v56 = vld [vmem:[#allocation3 + $0x10] ss:$20 sps:$4 sm:$0xff]  }
 0x31a   :  { %v4632_v42 = vmul.f32 -1.442695, %v1436_v7  ;;  %v1335_v54 = vpop.f32.mrb[15].mxu0  ;;  %v1376_v55 = vpop.f32.mrb[23].mxu1 }
 0x31b   :  { %v4633_v4 = vmul.f32 -1.442695, %v1437_v18  ;;  %v4634_v60 = vmul.f32 -1.442695, %v1439_v58  ;;  %v5262_v58 = vld [vmem:[#allocation3 + $0x38] ss:$20 sps:$4 sm:$0xff]  }
 0x31c   :  { %5391 = vpow2.f32 %v4632_v42 }
 0x31d   :  { %5393 = vpow2.f32 %v4633_v4 }
 0x31e   :  { %5395 = vpow2.f32 %v4634_v60 }
 0x31f   :  { %5397 = vtanh.f32 %v1438_v61  ;;  %v5264_v61 = vld [vmem:[#allocation3 + $0x88] ss:$20 sps:$4 sm:$0xff]  }
 0x326   :  { %v5392_v62 = vpop.eup %5391 }
 0x327   :  { %v5394_v63 = vpop.eup %5393  ;;  %v1443_v8 = vadd.f32 1.0, %v5392_v62  ;;  %v5265_v62 = vld [vmem:[#allocation3 + $0xb0] ss:$20 sps:$4 sm:$0xff]  }
 0x328   :  { %v1449_v12 = vadd.f32 1.0, %v5394_v63  ;;  %v5396_v5 = vpop.eup %5395  ;;  %v5266_v63 = vld [vmem:[#allocation3 + $0xd8] ss:$20 sps:$4 sm:$0xff]  }
 0x329   :  { %5399 = vrcp.f32 %v1443_v8  ;;  %v5398_v6 = vpop.eup %5397  ;;  %v1456_v7 = vadd.f32 1.0, %v5396_v5  ;;  %v5267_v8 = vld [vmem:[#allocation3 + $0x100] ss:$20 sps:$4 sm:$0xff]   ;;  %v1845_v5 = vld [vmem:[#allocation2] sm:$0xc0] }
 0x32a   :  { %5401 = vrcp.f32 %v1449_v12  ;;  %v5268_v12 = vld [vmem:[#allocation3 + $0x128] ss:$20 sps:$4 sm:$0xff]  }
 0x32b   :  { %5403 = vrcp.f32 %v1456_v7 }
 0x333   :  { %v5400_v9 = vpop.eup %5399 }
 0x334   :  { %v5402_v10 = vpop.eup %5401  ;;  %v1460_v14 = vmul.f32 %v5400_v9, %v5398_v6  ;;  %v1846_v6 = vld [vmem:[#allocation2 + $0x8] sm:$0xc0]  ;;  %v1853_v9 = vrot.slane %v1845_v5, 6 }
 0x335   :  { %v1459_v15 = vmul.f32 %v5402_v10, %v6003_v16  ;;  %v5404_v54 = vpop.eup %5403  ;;  %v1854_v7 = vrot.slane %v1846_v6, 6 }
 0x337   :  { %v6135_v17 = vadd.f32 %v1460_v14, %v1459_v15  ;;  %v1412_v18 = vpop.f32.mrb[16].mxu0 }
 0x338   :  { %1419 = vst [vmem:[#allocation6 + $0x2] sm:$0x3] %v1412_v18  ;;  %v4998_v11 = vpop.f32.mrb[17].mxu0 }
 0x339   :  { %v1415_v20 = vpop.f32.mrb[18].mxu0  ;;  %5405 = vtanh.f32 %v6135_v17 }
 0x33a   :  { %v4999_v21 = vpop.f32.mrb[19].mxu0 }
 0x33f   :  { %v3687_v42 = vld [vmem:[#allocation6 + $0x2] sm:$0x3] }
 0x340   :  { %v6139_v52 = vadd.f32 %v6009_v23, %v3687_v42 }
 0x342   :  { %3710 = vst [vmem:[#allocation6 + $0x2] sm:$0x3] %v6139_v52  ;;  %v3719_v55 = vmul.f32 1.442695, %v6139_v52  ;;  %3784 = vrot.lane.b32.xlu1 %v6139_v52, %s5700_s11  ;;  %3752 = vrot.lane.b32.xlu0 %v6139_v52, %s5699_s10 }
 0x343   :  { %v5406_v16 = vpop.eup %5405 }
 0x344   :  { %5407 = vpow2.f32 %v3719_v55  ;;  %v1463_v4 = vmul.f32 %v5406_v16, %v5404_v54  ;;  %v1848_v55 = vld [vmem:[#allocation2 + $0x18] sm:$0xc0] }
 0x346   :  { %3816 = vrot.lane.b32.xlu1 %v6139_v52, %s5701_s12  ;;  %v1464_v57 = vpack.c.bf16 %v1463_v4, %v1463_v4 }
 0x348   :  { %1754 = vmatmul.mubr.bf16.vlgmr.msra.gmra.mrb[24].mxu1 %v1464_v57  ;;  %1795 = vmatmul.mubr.bf16.vlgmr.msra.gmra.mrb[20].mxu0 %v1464_v57 }
 0x349   :  { %5001 = vmatpush3.bf16.msra.mxu1 %v5261_v56  ;;  %5016 = vmatprep.mubr.msk.bf16.mxu1 %vm5698_vm2, %v5697_v53 }
 0x34a   :  { %3848 = vrot.lane.b32.xlu1 %v6139_v52, %s5702_s13  ;;  %5002 = vmatprep.subr.bf16.mxu1 %v5697_v53 }
 0x34b   :  { %2147 = vmatpush1.bf16.msra.mxu0 %v6038_v19  ;;  %2178 = vmatprep.mubr.bf16.mxu0 %v5696_v3 }
 0x34c   :  { %2148 = vmatprep.subr.bf16.mxu0 %v6048_v25 }
 0x34d   :  { %5003 = vmatpush3.bf16.msra.mxu1 %v5262_v58 }
 0x34e   :  { %v5408_v60 = vpop.eup %5407  ;;  %5004 = vmatprep.subr.bf16.mxu1 %v5697_v53 }
 0x34f   :  { %3735 = vst.msk [vmem:[#allocation6 + $0x2] sm:$0x3] %vm3733_vm3, %v5408_v60  ;;  %2149 = vmatpush1.bf16.msra.mxu0 %v6050_v26 }
 0x350   :  { %2150 = vmatprep.subr.bf16.mxu0 %v6060_v29 }
 0x351   :  { %5005 = vmatpush3.bf16.msra.mxu1 %v5263_v59 }
 0x352   :  { %5006 = vmatprep.subr.bf16.mxu1 %v5697_v53 }
 0x353   :  { %2151 = vmatpush1.bf16.msra.mxu0 %v6062_v30 }
 0x354   :  { %2152 = vmatprep.subr.bf16.mxu0 %v6072_v33 }
 0x355   :  { %5007 = vmatpush3.bf16.msra.mxu1 %v5264_v61 }
 0x356   :  { %5008 = vmatprep.subr.bf16.mxu1 %v5697_v53 }
 0x357   :  { %2153 = vmatpush1.bf16.msra.mxu0 %v6074_v34 }
 0x358   :  { %2154 = vmatprep.subr.bf16.mxu0 %v6084_v37 }
 0x359   :  { %5009 = vmatpush3.bf16.msra.mxu1 %v5265_v62 }
 0x35a   :  { %5010 = vmatprep.subr.bf16.mxu1 %v5697_v53 }
 0x35b   :  { %2155 = vmatpush1.bf16.msra.mxu0 %v6086_v38 }
 0x35c   :  { %2156 = vmatprep.subr.bf16.mxu0 %v6096_v41 }
 0x35d   :  { %5011 = vmatpush3.bf16.msra.mxu1 %v5266_v63 }
 0x35e   :  { %5012 = vmatprep.subr.bf16.mxu1 %v5697_v53 }
 0x35f   :  { %2157 = vmatpush1.bf16.msra.mxu0 %v6098_v43 }
 0x360   :  { %2158 = vmatprep.subr.bf16.mxu0 %v6108_v47 }
 0x361   :  { %5013 = vmatpush3.bf16.msra.mxu1 %v5267_v8 }
 0x362   :  { %5014 = vmatprep.subr.bf16.mxu1 %v5697_v53 }
 0x363   :  { %2159 = vmatpush1.bf16.msra.mxu0 %v6110_v48 }
 0x364   :  { %2160 = vmatprep.subr.bf16.mxu0 %v6120_v51 }
 0x365   :  { %5015 = vmatpush3.bf16.msra.mxu1 %v5268_v12 }
 0x366   :  { %2187 = vmatprep.subr.bf16.mxu1 %v6040_v22 }
 0x367   :  { %2161 = vmatpush1.bf16.msra.mxu0 %v6122_v0 }
 0x368   :  { %5017 = vmatmul.mubr.bf16.vlgmr.msra.gmra.mrb[28].mxu1 %v1464_v57  ;;  %5020 = vmatprep.subr.bf16.mxu0 %v5697_v53  ;;  %v1847_v57 = vld [vmem:[#allocation2 + $0x10] sm:$0xc0] }
 0x369   :  { %2188 = vmatpush1.bf16.msra.mxu1 %v6043_v24  ;;  %2219 = vmatprep.mubr.bf16.mxu1 %v5696_v3  ;;  %v1855_v59 = vrot.slane %v1847_v57, 6 }
 0x36a   :  { %2189 = vmatprep.subr.bf16.mxu1 %v6052_v27 }
 0x36d   :  { %2190 = vmatpush1.bf16.msra.mxu1 %v6055_v28 }
 0x36e   :  { %2191 = vmatprep.subr.bf16.mxu1 %v6064_v31 }
 0x371   :  { %2192 = vmatpush1.bf16.msra.mxu1 %v6067_v32 }
 0x372   :  { %2193 = vmatprep.subr.bf16.mxu1 %v6076_v35 }
 0x375   :  { %2194 = vmatpush1.bf16.msra.mxu1 %v6079_v36 }
 0x376   :  { %2195 = vmatprep.subr.bf16.mxu1 %v6088_v39 }
 0x379   :  { %2196 = vmatpush1.bf16.msra.mxu1 %v6091_v40 }
 0x37a   :  { %2197 = vmatprep.subr.bf16.mxu1 %v6100_v44 }
 0x37d   :  { %2198 = vmatpush1.bf16.msra.mxu1 %v6103_v46 }
 0x37e   :  { %2199 = vmatprep.subr.bf16.mxu1 %v6112_v49 }
 0x381   :  { %2200 = vmatpush1.bf16.msra.mxu1 %v6115_v50 }
 0x382   :  { %2201 = vmatprep.subr.bf16.mxu1 %v6124_v1 }
 0x385   :  { %2202 = vmatpush1.bf16.msra.mxu1 %v6127_v2 }
 0x386   :  { %2559 = vmatprep.subr.bf16.mxu1 %v6036_v13  ;;  %v1856_v13 = vrot.slane %v1848_v55, 6 }
 0x41b   :  { %v1755_v10 = vpop.f32.mrb[24].mxu1  ;;  %v1796_v14 = vpop.f32.mrb[20].mxu0 }
 0x41c   :  { %v1861_v15 = vadd.f32 %v1853_v9, %v1755_v10  ;;  %v1757_v18 = vpop.f32.mrb[25].mxu1  ;;  %v1798_v11 = vpop.f32.mrb[21].mxu0  ;;  %v1863_v61 = vadd.f32 %v1855_v59, %v1796_v14  ;;  %v5271_v59 = vld [vmem:[#allocation3 + $0x60] ss:$20 sps:$4 sm:$0xff]  }
 0x41d   :  { %v1862_v20 = vadd.f32 %v1854_v7, %v1757_v18  ;;  %v1759_v21 = vpop.f32.mrb[26].mxu1  ;;  %v1800_v42 = vpop.f32.mrb[22].mxu0  ;;  %v1864_v58 = vadd.f32 %v1856_v13, %v1798_v11  ;;  %v5269_v13 = vld [vmem:[#allocation3 + $0x10] ss:$20 sps:$4 sm:$0xff]  }
 0x41e   :  { %v4675_v54 = vmul.f32 -1.442695, %v1861_v15  ;;  %v1760_v16 = vpop.f32.mrb[27].mxu1  ;;  %v1801_v4 = vpop.f32.mrb[23].mxu0 }
 0x41f   :  { %v4676_v56 = vmul.f32 -1.442695, %v1862_v20  ;;  %v4677_v60 = vmul.f32 -1.442695, %v1864_v58  ;;  %v5270_v58 = vld [vmem:[#allocation3 + $0x38] ss:$20 sps:$4 sm:$0xff]  }
 0x420   :  { %5409 = vpow2.f32 %v4675_v54 }
 0x421   :  { %5411 = vpow2.f32 %v4676_v56 }
 0x422   :  { %5413 = vpow2.f32 %v4677_v60 }
 0x423   :  { %5415 = vtanh.f32 %v1863_v61  ;;  %v5272_v61 = vld [vmem:[#allocation3 + $0x88] ss:$20 sps:$4 sm:$0xff]  }
 0x42a   :  { %v5410_v62 = vpop.eup %5409 }
 0x42b   :  { %v5412_v63 = vpop.eup %5411  ;;  %v1868_v8 = vadd.f32 1.0, %v5410_v62 }
 0x42c   :  { %v1874_v12 = vadd.f32 1.0, %v5412_v63  ;;  %v5414_v5 = vpop.eup %5413 }
 0x42d   :  { %5417 = vrcp.f32 %v1868_v8  ;;  %v5416_v6 = vpop.eup %5415  ;;  %v1881_v15 = vadd.f32 1.0, %v5414_v5 }
 0x42e   :  { %5419 = vrcp.f32 %v1874_v12 }
 0x42f   :  { %5421 = vrcp.f32 %v1881_v15 }
 0x437   :  { %v5418_v9 = vpop.eup %5417 }
 0x438   :  { %v5420_v10 = vpop.eup %5419  ;;  %v1885_v7 = vmul.f32 %v5418_v9, %v5416_v6 }
 0x439   :  { %v1884_v18 = vmul.f32 %v5420_v10, %v6135_v17  ;;  %v5422_v16 = vpop.eup %5421 }
 0x43b   :  { %v6197_v11 = vadd.f32 %v1885_v7, %v1884_v18  ;;  %v1837_v20 = vpop.f32.mrb[28].mxu1 }
 0x43c   :  { %1844 = vst [vmem:[#allocation6 + $0x4] sm:$0x3] %v1837_v20  ;;  %v5018_v14 = vpop.f32.mrb[29].mxu1 }
 0x43d   :  { %v1840_v21 = vpop.f32.mrb[30].mxu1  ;;  %5423 = vtanh.f32 %v6197_v11 }
 0x43e   :  { %v5019_v42 = vpop.f32.mrb[31].mxu1  ;;  %v5277_v21 = vld [vmem:[#allocation3 + $0x10] ss:$20 sps:$4 sm:$0xff]  }
 0x443   :  { %v3688_v54 = vld [vmem:[#allocation6 + $0x4] sm:$0x3] }
 0x444   :  { %v6201_v55 = vadd.f32 %v6009_v23, %v3688_v54  ;;  %v5279_v54 = vld [vmem:[#allocation3 + $0x60] ss:$20 sps:$4 sm:$0xff]  }
 0x446   :  { %3711 = vst [vmem:[#allocation6 + $0x4] sm:$0x3] %v6201_v55  ;;  %v3721_v4 = vmul.f32 1.442695, %v6201_v55  ;;  %3786 = vrot.lane.b32.xlu0 %v6201_v55, %s5700_s11  ;;  %3754 = vrot.lane.b32.xlu1 %v6201_v55, %s5699_s10 }
 0x447   :  { %v5424_v17 = vpop.eup %5423 }
 0x448   :  { %5425 = vpow2.f32 %v3721_v4  ;;  %v1888_v56 = vmul.f32 %v5424_v17, %v5422_v16  ;;  %v5280_v4 = vld [vmem:[#allocation3 + $0x88] ss:$20 sps:$4 sm:$0xff]   ;;  %v5281_v17 = vld [vmem:[#allocation3 + $0xb0] ss:$20 sps:$4 sm:$0xff]  }
 0x44a   :  { %3818 = vrot.lane.b32.xlu0 %v6201_v55, %s5701_s12  ;;  %v1889_v57 = vpack.c.bf16 %v1888_v56, %v1888_v56  ;;  %v5282_v56 = vld [vmem:[#allocation3 + $0xd8] ss:$20 sps:$4 sm:$0xff]  }
 0x44c   :  { %2179 = vmatmul.mubr.bf16.vlgmr.msra.gmra.mrb[24].mxu0 %v1889_v57  ;;  %2220 = vmatmul.mubr.bf16.vlgmr.msra.gmra.mrb[32].mxu1 %v1889_v57 }
 0x44d   :  { %5021 = vmatpush3.bf16.msra.mxu0 %v5269_v13  ;;  %5036 = vmatprep.mubr.msk.bf16.mxu0 %vm5698_vm2, %v5697_v53  ;;  %v5283_v13 = vld [vmem:[#allocation3 + $0x100] ss:$20 sps:$4 sm:$0xff]  }
 0x44e   :  { %3850 = vrot.lane.b32.xlu0 %v6201_v55, %s5702_s13  ;;  %5022 = vmatprep.subr.bf16.mxu0 %v5697_v53 }
 0x44f   :  { %2560 = vmatpush1.bf16.msra.mxu1 %v6038_v19  ;;  %2591 = vmatprep.mubr.bf16.mxu1 %v5696_v3  ;;  %v5273_v19 = vld [vmem:[#allocation3 + $0xb0] ss:$20 sps:$4 sm:$0xff]  }
 0x450   :  { %2561 = vmatprep.subr.bf16.mxu1 %v6048_v25  ;;  %v5274_v25 = vld [vmem:[#allocation3 + $0xd8] ss:$20 sps:$4 sm:$0xff]  }
 0x451   :  { %5023 = vmatpush3.bf16.msra.mxu0 %v5270_v58  ;;  %v6286_v58 = vld [vmem:[#allocation3 + $0x4] ss:$20 sps:$4 sm:$0xff]  }
 0x452   :  { %v5426_v60 = vpop.eup %5425  ;;  %5024 = vmatprep.subr.bf16.mxu0 %v5697_v53 }
 0x453   :  { %3736 = vst.msk [vmem:[#allocation6 + $0x4] sm:$0x3] %vm3733_vm3, %v5426_v60  ;;  %2562 = vmatpush1.bf16.msra.mxu1 %v6050_v26  ;;  %v5275_v26 = vld [vmem:[#allocation3 + $0x100] ss:$20 sps:$4 sm:$0xff]  }
 0x454   :  { %2563 = vmatprep.subr.bf16.mxu1 %v6060_v29  ;;  %v5276_v29 = vld [vmem:[#allocation3 + $0x128] ss:$20 sps:$4 sm:$0xff]   ;;  %v6290_v60 = vld [vmem:[#allocation3 + $0xc] ss:$20 sps:$4 sm:$0xff]  }
 0x455   :  { %5025 = vmatpush3.bf16.msra.mxu0 %v5271_v59  ;;  %v6288_v59 = vld [vmem:[#allocation3] ss:$20 sps:$4 sm:$0xff]  }
 0x456   :  { %5026 = vmatprep.subr.bf16.mxu0 %v5697_v53 }
 0x457   :  { %2564 = vmatpush1.bf16.msra.mxu1 %v6062_v30 }
 0x458   :  { %2565 = vmatprep.subr.bf16.mxu1 %v6072_v33 }
 0x459   :  { %5027 = vmatpush3.bf16.msra.mxu0 %v5272_v61  ;;  %v6293_v61 = vld [vmem:[#allocation3 + $0x8] ss:$20 sps:$4 sm:$0xff]  }
 0x45a   :  { %5028 = vmatprep.subr.bf16.mxu0 %v5697_v53 }
 0x45b   :  { %2566 = vmatpush1.bf16.msra.mxu1 %v6074_v34 }
 0x45c   :  { %2567 = vmatprep.subr.bf16.mxu1 %v6084_v37 }
 0x45d   :  { %5029 = vmatpush3.bf16.msra.mxu0 %v5273_v19  ;;  %v6298_v19 = vld [vmem:[#allocation3 + $0x2c] ss:$20 sps:$4 sm:$0xff]  }
 0x45e   :  { %5030 = vmatprep.subr.bf16.mxu0 %v5697_v53 }
 0x45f   :  { %2568 = vmatpush1.bf16.msra.mxu1 %v6086_v38 }
 0x460   :  { %2569 = vmatprep.subr.bf16.mxu1 %v6096_v41 }
 0x461   :  { %5031 = vmatpush3.bf16.msra.mxu0 %v5274_v25  ;;  %v6300_v25 = vld [vmem:[#allocation3 + $0x28] ss:$20 sps:$4 sm:$0xff]  }
 0x462   :  { %5032 = vmatprep.subr.bf16.mxu0 %v5697_v53 }
 0x463   :  { %2570 = vmatpush1.bf16.msra.mxu1 %v6098_v43  ;;  %v2272_v43 = vld [vmem:[#allocation2 + $0x30] sm:$0x3] }
 0x464   :  { %2571 = vmatprep.subr.bf16.mxu1 %v6108_v47 }
 0x465   :  { %5033 = vmatpush3.bf16.msra.mxu0 %v5275_v26  ;;  %v6302_v26 = vld [vmem:[#allocation3 + $0x34] ss:$20 sps:$4 sm:$0xff]  }
 0x466   :  { %5034 = vmatprep.subr.bf16.mxu0 %v5697_v53 }
 0x467   :  { %2572 = vmatpush1.bf16.msra.mxu1 %v6110_v48 }
 0x468   :  { %2573 = vmatprep.subr.bf16.mxu1 %v6120_v51 }
 0x469   :  { %5035 = vmatpush3.bf16.msra.mxu0 %v5276_v29  ;;  %v6305_v29 = vld [vmem:[#allocation3 + $0x30] ss:$20 sps:$4 sm:$0xff]  }
 0x46a   :  { %2600 = vmatprep.subr.bf16.mxu0 %v6040_v22 }
 0x46b   :  { %2574 = vmatpush1.bf16.msra.mxu1 %v6122_v0 }
 0x46c   :  { %5037 = vmatmul.mubr.bf16.vlgmr.msra.gmra.mrb[28].mxu0 %v1889_v57  ;;  %5040 = vmatprep.subr.bf16.mxu1 %v5697_v53  ;;  %v5284_v57 = vld [vmem:[#allocation3 + $0x128] ss:$20 sps:$4 sm:$0xff]  }
 0x46d   :  { %2601 = vmatpush1.bf16.msra.mxu0 %v6043_v24  ;;  %2632 = vmatprep.mubr.bf16.mxu0 %v5696_v3  ;;  %v2270_v24 = vld [vmem:[#allocation2 + $0x20] sm:$0x3] }
 0x46e   :  { %2602 = vmatprep.subr.bf16.mxu0 %v6052_v27 }
 0x471   :  { %2603 = vmatpush1.bf16.msra.mxu0 %v6055_v28 }
 0x472   :  { %2604 = vmatprep.subr.bf16.mxu0 %v6064_v31  ;;  %v2271_v31 = vld [vmem:[#allocation2 + $0x28] sm:$0x3] }
 0x475   :  { %2605 = vmatpush1.bf16.msra.mxu0 %v6067_v32 }
 0x476   :  { %2606 = vmatprep.subr.bf16.mxu0 %v6076_v35 }
 0x479   :  { %2607 = vmatpush1.bf16.msra.mxu0 %v6079_v36 }
 0x47a   :  { %2608 = vmatprep.subr.bf16.mxu0 %v6088_v39 }
 0x47d   :  { %2609 = vmatpush1.bf16.msra.mxu0 %v6091_v40  ;;  %v2273_v40 = vld [vmem:[#allocation2 + $0x38] sm:$0x3] }
 0x47e   :  { %2610 = vmatprep.subr.bf16.mxu0 %v6100_v44 }
 0x481   :  { %2611 = vmatpush1.bf16.msra.mxu0 %v6103_v46 }
 0x482   :  { %2612 = vmatprep.subr.bf16.mxu0 %v6112_v49 }
 0x485   :  { %2613 = vmatpush1.bf16.msra.mxu0 %v6115_v50 }
 0x486   :  { %2614 = vmatprep.subr.bf16.mxu0 %v6124_v1 }
 0x489   :  { %2615 = vmatpush1.bf16.msra.mxu0 %v6127_v2 }
 0x48a   :  { %2984 = vmatprep.subr.bf16.mxu0 %v6286_v58 }
 0x51f   :  { %v2180_v22 = vpop.f32.mrb[24].mxu0  ;;  %v2221_v27 = vpop.f32.mrb[32].mxu1 }
 0x520   :  { %v2274_v28 = vadd.f32 %v2270_v24, %v2180_v22  ;;  %v2182_v30 = vpop.f32.mrb[25].mxu0  ;;  %v2223_v32 = vpop.f32.mrb[33].mxu1  ;;  %v2276_v46 = vadd.f32 %v2272_v43, %v2221_v27  ;;  %v6310_v22 = vld [vmem:[#allocation3 + $0x54] ss:$20 sps:$4 sm:$0xff]   ;;  %v6312_v24 = vld [vmem:[#allocation3 + $0x50] ss:$20 sps:$4 sm:$0xff]  }
 0x521   :  { %v2275_v33 = vadd.f32 %v2271_v31, %v2182_v30  ;;  %v2184_v34 = vpop.f32.mrb[26].mxu0  ;;  %v2225_v35 = vpop.f32.mrb[34].mxu1  ;;  %v2277_v41 = vadd.f32 %v2273_v40, %v2223_v32  ;;  %v6314_v27 = vld [vmem:[#allocation3 + $0x5c] ss:$20 sps:$4 sm:$0xff]   ;;  %v6324_v31 = vld [vmem:[#allocation3 + $0x78] ss:$20 sps:$4 sm:$0xff]  }
 0x522   :  { %v4718_v36 = vmul.f32 -1.442695, %v2274_v28  ;;  %v2185_v37 = vpop.f32.mrb[27].mxu0  ;;  %v2226_v38 = vpop.f32.mrb[35].mxu1  ;;  %v6317_v28 = vld [vmem:[#allocation3 + $0x58] ss:$20 sps:$4 sm:$0xff]  }
 0x523   :  { %v4719_v39 = vmul.f32 -1.442695, %v2275_v33  ;;  %v4720_v44 = vmul.f32 -1.442695, %v2277_v41  ;;  %v6322_v30 = vld [vmem:[#allocation3 + $0x7c] ss:$20 sps:$4 sm:$0xff]  }
 0x524   :  { %5427 = vpow2.f32 %v4718_v36  ;;  %v6326_v32 = vld [vmem:[#allocation3 + $0x84] ss:$20 sps:$4 sm:$0xff]   ;;  %v6329_v33 = vld [vmem:[#allocation3 + $0x80] ss:$20 sps:$4 sm:$0xff]   ;;  %v6341_v37 = vld [vmem:[#allocation3 + $0xa8] ss:$20 sps:$4 sm:$0xff]  }
 0x525   :  { %5429 = vpow2.f32 %v4719_v39  ;;  %v6334_v34 = vld [vmem:[#allocation3 + $0xa4] ss:$20 sps:$4 sm:$0xff]   ;;  %v6336_v35 = vld [vmem:[#allocation3 + $0xa0] ss:$20 sps:$4 sm:$0xff]   ;;  %v6348_v39 = vld [vmem:[#allocation3 + $0xc8] ss:$20 sps:$4 sm:$0xff]  }
 0x526   :  { %5431 = vpow2.f32 %v4720_v44  ;;  %v6338_v36 = vld [vmem:[#allocation3 + $0xac] ss:$20 sps:$4 sm:$0xff]   ;;  %v6350_v40 = vld [vmem:[#allocation3 + $0xd4] ss:$20 sps:$4 sm:$0xff]   ;;  %v6353_v41 = vld [vmem:[#allocation3 + $0xd0] ss:$20 sps:$4 sm:$0xff]  }
 0x527   :  { %5433 = vtanh.f32 %v2276_v46  ;;  %v6346_v38 = vld [vmem:[#allocation3 + $0xcc] ss:$20 sps:$4 sm:$0xff]   ;;  %v6358_v43 = vld [vmem:[#allocation3 + $0xf4] ss:$20 sps:$4 sm:$0xff]   ;;  %v6360_v44 = vld [vmem:[#allocation3 + $0xf0] ss:$20 sps:$4 sm:$0xff]  }
 0x528   :  { %v6362_v46 = vld [vmem:[#allocation3 + $0xfc] ss:$20 sps:$4 sm:$0xff]  }
 0x52e   :  { %v5428_v47 = vpop.eup %5427 }
 0x52f   :  { %v5430_v48 = vpop.eup %5429  ;;  %v2281_v49 = vadd.f32 1.0, %v5428_v47  ;;  %v6365_v47 = vld [vmem:[#allocation3 + $0xf8] ss:$20 sps:$4 sm:$0xff]  }
 0x530   :  { %v2287_v50 = vadd.f32 1.0, %v5430_v48  ;;  %v5432_v51 = vpop.eup %5431  ;;  %v6370_v48 = vld [vmem:[#allocation3 + $0x11c] ss:$20 sps:$4 sm:$0xff]  }
 0x531   :  { %5435 = vrcp.f32 %v2281_v49  ;;  %v5434_v0 = vpop.eup %5433  ;;  %v2294_v63 = vadd.f32 1.0, %v5432_v51  ;;  %v6372_v49 = vld [vmem:[#allocation3 + $0x118] ss:$20 sps:$4 sm:$0xff]   ;;  %v6377_v51 = vld [vmem:[#allocation3 + $0x120] ss:$20 sps:$4 sm:$0xff]  }
 0x532   :  { %5437 = vrcp.f32 %v2287_v50  ;;  %v6374_v50 = vld [vmem:[#allocation3 + $0x124] ss:$20 sps:$4 sm:$0xff]  }
 0x533   :  { %5439 = vrcp.f32 %v2294_v63 }
 0x53b   :  { %v5436_v1 = vpop.eup %5435 }
 0x53c   :  { %v5438_v2 = vpop.eup %5437  ;;  %v2298_v62 = vmul.f32 %v5436_v1, %v5434_v0  ;;  %v2683_v0 = vld [vmem:[#allocation2 + $0x20] sm:$0xc]  ;;  %v2684_v1 = vld [vmem:[#allocation2 + $0x28] sm:$0xc] }
 0x53d   :  { %v2297_v8 = vmul.f32 %v5438_v2, %v6197_v11  ;;  %v5440_v18 = vpop.eup %5439  ;;  %v2691_v2 = vrot.slane %v2683_v0, 2 }
 0x53f   :  { %v6258_v12 = vadd.f32 %v2298_v62, %v2297_v8  ;;  %v2262_v5 = vpop.f32.mrb[28].mxu0  ;;  %v2692_v8 = vrot.slane %v2684_v1, 2 }
 0x540   :  { %2269 = vst [vmem:[#allocation6 + $0x6] sm:$0x3] %v2262_v5  ;;  %v5038_v6 = vpop.f32.mrb[29].mxu0 }
 0x541   :  { %v2265_v9 = vpop.f32.mrb[30].mxu0  ;;  %5441 = vtanh.f32 %v6258_v12 }
 0x542   :  { %v5039_v10 = vpop.f32.mrb[31].mxu0 }
 0x547   :  { %v3689_v7 = vld [vmem:[#allocation6 + $0x6] sm:$0x3] }
 0x548   :  { %v6262_v15 = vadd.f32 %v6009_v23, %v3689_v7  ;;  %v5278_v23 = vld [vmem:[#allocation3 + $0x38] ss:$20 sps:$4 sm:$0xff]  }
 0x54a   :  { %3712 = vst [vmem:[#allocation6 + $0x6] sm:$0x3] %v6262_v15  ;;  %v3723_v20 = vmul.f32 1.442695, %v6262_v15  ;;  %3756 = vrot.lane.b32.xlu1 %v6262_v15, %s5699_s10 }
 0x54b   :  { %v5442_v11 = vpop.eup %5441 }
 0x54c   :  { %5443 = vpow2.f32 %v3723_v20  ;;  %v2301_v14 = vmul.f32 %v5442_v11, %v5440_v18  ;;  %v2686_v11 = vld [vmem:[#allocation2 + $0x38] sm:$0xc] }
 0x54e   :  { %3788 = vrot.lane.b32.xlu1 %v6262_v15, %s5700_s11  ;;  %v2302_v42 = vpack.c.bf16 %v2301_v14, %v2301_v14 }
 0x550   :  { %2592 = vmatmul.mubr.bf16.vlgmr.msra.gmra.mrb[36].mxu1 %v2302_v42  ;;  %2633 = vmatmul.mubr.bf16.vlgmr.msra.gmra.mrb[32].mxu0 %v2302_v42 }
 0x551   :  { %5041 = vmatpush3.bf16.msra.mxu1 %v5277_v21  ;;  %5056 = vmatprep.mubr.msk.bf16.mxu1 %vm5698_vm2, %v5697_v53 }
 0x552   :  { %3820 = vrot.lane.b32.xlu1 %v6262_v15, %s5701_s12  ;;  %5042 = vmatprep.subr.bf16.mxu1 %v5697_v53 }
 0x553   :  { %3016 = vmatprep.mubr.bf16.mxu0 %v5696_v3  ;;  %2985 = vmatpush1.bf16.msra.mxu0 %v6288_v59 }
 0x554   :  { %2986 = vmatprep.subr.bf16.mxu0 %v6298_v19 }
 0x555   :  { %5043 = vmatpush3.bf16.msra.mxu1 %v5278_v23  ;;  %v2694_v23 = vrot.slane %v2686_v11, 2 }
 0x556   :  { %v5444_v16 = vpop.eup %5443  ;;  %3852 = vrot.lane.b32.xlu1 %v6262_v15, %s5702_s13  ;;  %5044 = vmatprep.subr.bf16.mxu1 %v5697_v53 }
 0x557   :  { %3737 = vst.msk [vmem:[#allocation6 + $0x6] sm:$0x3] %vm3733_vm3, %v5444_v16  ;;  %2987 = vmatpush1.bf16.msra.mxu0 %v6300_v25 }
 0x558   :  { %2988 = vmatprep.subr.bf16.mxu0 %v6310_v22 }
 0x559   :  { %5045 = vmatpush3.bf16.msra.mxu1 %v5279_v54  ;;  %v2685_v54 = vld [vmem:[#allocation2 + $0x30] sm:$0xc] }
 0x55a   :  { %5046 = vmatprep.subr.bf16.mxu1 %v5697_v53 }
 0x55b   :  { %2989 = vmatpush1.bf16.msra.mxu0 %v6312_v24 }
 0x55c   :  { %2990 = vmatprep.subr.bf16.mxu0 %v6322_v30 }
 0x55d   :  { %5047 = vmatpush3.bf16.msra.mxu1 %v5280_v4  ;;  %v2693_v4 = vrot.slane %v2685_v54, 2 }
 0x55e   :  { %5048 = vmatprep.subr.bf16.mxu1 %v5697_v53 }
 0x55f   :  { %2991 = vmatpush1.bf16.msra.mxu0 %v6324_v31 }
 0x560   :  { %2992 = vmatprep.subr.bf16.mxu0 %v6334_v34 }
 0x561   :  { %5049 = vmatpush3.bf16.msra.mxu1 %v5281_v17 }
 0x562   :  { %5050 = vmatprep.subr.bf16.mxu1 %v5697_v53 }
 0x563   :  { %2993 = vmatpush1.bf16.msra.mxu0 %v6336_v35 }
 0x564   :  { %2994 = vmatprep.subr.bf16.mxu0 %v6346_v38 }
 0x565   :  { %5051 = vmatpush3.bf16.msra.mxu1 %v5282_v56 }
 0x566   :  { %5052 = vmatprep.subr.bf16.mxu1 %v5697_v53 }
 0x567   :  { %2995 = vmatpush1.bf16.msra.mxu0 %v6348_v39 }
 0x568   :  { %2996 = vmatprep.subr.bf16.mxu0 %v6358_v43 }
 0x569   :  { %5053 = vmatpush3.bf16.msra.mxu1 %v5283_v13 }
 0x56a   :  { %5054 = vmatprep.subr.bf16.mxu1 %v5697_v53 }
 0x56b   :  { %2997 = vmatpush1.bf16.msra.mxu0 %v6360_v44 }
 0x56c   :  { %2998 = vmatprep.subr.bf16.mxu0 %v6370_v48 }
 0x56d   :  { %5055 = vmatpush3.bf16.msra.mxu1 %v5284_v57 }
 0x56e   :  { %3025 = vmatprep.subr.bf16.mxu1 %v6290_v60 }
 0x56f   :  { %2999 = vmatpush1.bf16.msra.mxu0 %v6372_v49 }
 0x570   :  { %5057 = vmatmul.mubr.bf16.vlgmr.msra.gmra.mrb[40].mxu1 %v2302_v42  ;;  %5060 = vmatprep.subr.bf16.mxu0 %v5697_v53 }
 0x571   :  { %3057 = vmatprep.mubr.bf16.mxu1 %v5696_v3  ;;  %3026 = vmatpush1.bf16.msra.mxu1 %v6293_v61 }
 0x572   :  { %3027 = vmatprep.subr.bf16.mxu1 %v6302_v26 }
 0x575   :  { %3028 = vmatpush1.bf16.msra.mxu1 %v6305_v29 }
 0x576   :  { %3029 = vmatprep.subr.bf16.mxu1 %v6314_v27 }
 0x579   :  { %3030 = vmatpush1.bf16.msra.mxu1 %v6317_v28 }
 0x57a   :  { %3031 = vmatprep.subr.bf16.mxu1 %v6326_v32 }
 0x57d   :  { %3032 = vmatpush1.bf16.msra.mxu1 %v6329_v33 }
 0x57e   :  { %3033 = vmatprep.subr.bf16.mxu1 %v6338_v36 }
 0x581   :  { %3034 = vmatpush1.bf16.msra.mxu1 %v6341_v37 }
 0x582   :  { %3035 = vmatprep.subr.bf16.mxu1 %v6350_v40 }
 0x585   :  { %3036 = vmatpush1.bf16.msra.mxu1 %v6353_v41 }
 0x586   :  { %3037 = vmatprep.subr.bf16.mxu1 %v6362_v46 }
 0x589   :  { %3038 = vmatpush1.bf16.msra.mxu1 %v6365_v47 }
 0x58a   :  { %3039 = vmatprep.subr.bf16.mxu1 %v6374_v50 }
 0x58d   :  { %3040 = vmatpush1.bf16.msra.mxu1 %v6377_v51 }
 0x58e   :  { %3409 = vmatprep.subr.bf16.mxu1 %v6286_v58 }
 0x623   :  { %v2593_v62 = vpop.f32.mrb[36].mxu1  ;;  %v2634_v63 = vpop.f32.mrb[32].mxu0 }
 0x624   :  { %v2699_v5 = vadd.f32 %v2691_v2, %v2593_v62  ;;  %v2595_v6 = vpop.f32.mrb[37].mxu1  ;;  %v2636_v9 = vpop.f32.mrb[33].mxu0  ;;  %v2701_v56 = vadd.f32 %v2693_v4, %v2634_v63 }
 0x625   :  { %v2700_v10 = vadd.f32 %v2692_v8, %v2595_v6  ;;  %v2597_v7 = vpop.f32.mrb[38].mxu1  ;;  %v2638_v18 = vpop.f32.mrb[34].mxu0  ;;  %v2702_v16 = vadd.f32 %v2694_v23, %v2636_v9 }
 0x626   :  { %v4761_v20 = vmul.f32 -1.442695, %v2699_v5  ;;  %v2598_v14 = vpop.f32.mrb[39].mxu1  ;;  %v2639_v21 = vpop.f32.mrb[35].mxu0 }
 0x627   :  { %v4762_v42 = vmul.f32 -1.442695, %v2700_v10  ;;  %v4763_v17 = vmul.f32 -1.442695, %v2702_v16  ;;  %v6391_v14 = vld [vmem:[%s7013_s6] ss:$0 sm:$0xff] }
 0x628   :  { %5445 = vpow2.f32 %v4761_v20  ;;  %v5333_v16 = vld [vmem:[#allocation3 + $0x10] ss:$20 sps:$4 sm:$0xff]   ;;  %s5703_s6 = smov 4  }
 0x629   :  { %5447 = vpow2.f32 %v4762_v42 }
 0x62a   :  { %5449 = vpow2.f32 %v4763_v17  ;;  %v5334_v17 = vld [vmem:[#allocation3 + $0x38] ss:$20 sps:$4 sm:$0xff]  }
 0x62b   :  { %5451 = vtanh.f32 %v2701_v56  ;;  %v5335_v56 = vld [vmem:[#allocation3 + $0x60] ss:$20 sps:$4 sm:$0xff]  }
 0x632   :  { %v5446_v13 = vpop.eup %5445 }
 0x633   :  { %v5448_v57 = vpop.eup %5447  ;;  %v2706_v58 = vadd.f32 1.0, %v5446_v13 }
 0x634   :  { %v2712_v0 = vadd.f32 1.0, %v5448_v57  ;;  %v5450_v1 = vpop.eup %5449 }
 0x635   :  { %5453 = vrcp.f32 %v2706_v58  ;;  %v5452_v2 = vpop.eup %5451  ;;  %v2719_v6 = vadd.f32 1.0, %v5450_v1 }
 0x636   :  { %5455 = vrcp.f32 %v2712_v0 }
 0x637   :  { %5457 = vrcp.f32 %v2719_v6 }
 0x63f   :  { %v5454_v62 = vpop.eup %5453 }
 0x640   :  { %v5456_v8 = vpop.eup %5455  ;;  %v2723_v5 = vmul.f32 %v5454_v62, %v5452_v2 }
 0x641   :  { %v2722_v10 = vmul.f32 %v5456_v8, %v6258_v12  ;;  %v5458_v12 = vpop.eup %5457 }
 0x643   :  { %v6385_v9 = vadd.f32 %v2723_v5, %v2722_v10  ;;  %v2675_v7 = vpop.f32.mrb[40].mxu1 }
 0x644   :  { %2682 = vst [vmem:[#allocation6 + $0x8] sm:$0x3] %v2675_v7  ;;  %v5058_v63 = vpop.f32.mrb[41].mxu1 }
 0x645   :  { %v2678_v18 = vpop.f32.mrb[42].mxu1  ;;  %5459 = vtanh.f32 %v6385_v9 }
 0x646   :  { %v5059_v20 = vpop.f32.mrb[43].mxu1 }
 0x64b   :  { %v3690_v11 = vld [vmem:[#allocation6 + $0x8] sm:$0x3] }
 0x64c   :  { %v6394_v21 = vadd.f32 %v6391_v14, %v3690_v11 }
 0x64e   :  { %3713 = vst [vmem:[#allocation6 + $0x8] sm:$0x3] %v6394_v21  ;;  %v3725_v42 = vmul.f32 1.442695, %v6394_v21  ;;  %3758 = vrot.lane.b32.xlu0 %v6394_v21, %s5699_s10 }
 0x64f   :  { %v5460_v23 = vpop.eup %5459 }
 0x650   :  { %5461 = vpow2.f32 %v3725_v42  ;;  %v2726_v54 = vmul.f32 %v5460_v23, %v5458_v12  ;;  %v5341_v23 = vld [vmem:[#allocation3 + $0x10] ss:$20 sps:$4 sm:$0xff]  }
 0x652   :  { %3790 = vrot.lane.b32.xlu0 %v6394_v21, %s5700_s11  ;;  %v2727_v4 = vpack.c.bf16 %v2726_v54, %v2726_v54 }
 0x654   :  { %3017 = vmatmul.mubr.bf16.vlgmr.msra.gmra.mrb[36].mxu0 %v2727_v4  ;;  %3058 = vmatmul.mubr.bf16.vlgmr.msra.gmra.mrb[44].mxu1 %v2727_v4 }
 0x655   :  { %5061 = vmatpush3.bf16.msra.mxu0 %v5333_v16  ;;  %5076 = vmatprep.mubr.msk.bf16.mxu0 %vm5698_vm2, %v5697_v53  ;;  %v5342_v16 = vld [vmem:[#allocation3 + $0x38] ss:$20 sps:$4 sm:$0xff]  }
 0x656   :  { %3822 = vrot.lane.b32.xlu0 %v6394_v21, %s5701_s12  ;;  %5062 = vmatprep.subr.bf16.mxu0 %v5697_v53 }
 0x657   :  { %3410 = vmatpush1.bf16.msra.mxu1 %v6288_v59  ;;  %3441 = vmatprep.mubr.bf16.mxu1 %v5696_v3  ;;  %v5336_v59 = vld [vmem:[#allocation3 + $0x88] ss:$20 sps:$4 sm:$0xff]  }
 0x658   :  { %3411 = vmatprep.subr.bf16.mxu1 %v6298_v19  ;;  %v5337_v19 = vld [vmem:[#allocation3 + $0xb0] ss:$20 sps:$4 sm:$0xff]  }
 0x659   :  { %5063 = vmatpush3.bf16.msra.mxu0 %v5334_v17 }
 0x65a   :  { %v5462_v13 = vpop.eup %5461  ;;  %3854 = vrot.lane.b32.xlu0 %v6394_v21, %s5702_s13  ;;  %5064 = vmatprep.subr.bf16.mxu0 %v5697_v53 }
 0x65b   :  { %3738 = vst.msk [vmem:[#allocation6 + $0x8] sm:$0x3] %vm3733_vm3, %v5462_v13  ;;  %3412 = vmatpush1.bf16.msra.mxu1 %v6300_v25  ;;  %v5338_v25 = vld [vmem:[#allocation3 + $0xd8] ss:$20 sps:$4 sm:$0xff]   ;;  %v5345_v13 = vld [vmem:[#allocation3 + $0xb0] ss:$20 sps:$4 sm:$0xff]  }
 0x65c   :  { %3413 = vmatprep.subr.bf16.mxu1 %v6310_v22  ;;  %v5339_v22 = vld [vmem:[#allocation3 + $0x100] ss:$20 sps:$4 sm:$0xff]  }
 0x65d   :  { %5065 = vmatpush3.bf16.msra.mxu0 %v5335_v56  ;;  %v5344_v56 = vld [vmem:[#allocation3 + $0x88] ss:$20 sps:$4 sm:$0xff]  }
 0x65e   :  { %5066 = vmatprep.subr.bf16.mxu0 %v5697_v53 }
 0x65f   :  { %3414 = vmatpush1.bf16.msra.mxu1 %v6312_v24  ;;  %v5340_v24 = vld [vmem:[#allocation3 + $0x128] ss:$20 sps:$4 sm:$0xff]  }
 0x660   :  { %3415 = vmatprep.subr.bf16.mxu1 %v6322_v30 }
 0x661   :  { %5067 = vmatpush3.bf16.msra.mxu0 %v5336_v59  ;;  %v5346_v59 = vld [vmem:[#allocation3 + $0xd8] ss:$20 sps:$4 sm:$0xff]  }
 0x662   :  { %5068 = vmatprep.subr.bf16.mxu0 %v5697_v53 }
 0x663   :  { %3416 = vmatpush1.bf16.msra.mxu1 %v6324_v31 }
 0x664   :  { %3417 = vmatprep.subr.bf16.mxu1 %v6334_v34 }
 0x665   :  { %5069 = vmatpush3.bf16.msra.mxu0 %v5337_v19  ;;  %v5347_v19 = vld [vmem:[#allocation3 + $0x100] ss:$20 sps:$4 sm:$0xff]  }
 0x666   :  { %5070 = vmatprep.subr.bf16.mxu0 %v5697_v53 }
 0x667   :  { %3418 = vmatpush1.bf16.msra.mxu1 %v6336_v35 }
 0x668   :  { %3419 = vmatprep.subr.bf16.mxu1 %v6346_v38 }
 0x669   :  { %5071 = vmatpush3.bf16.msra.mxu0 %v5338_v25  ;;  %v5348_v25 = vld [vmem:[#allocation3 + $0x128] ss:$20 sps:$4 sm:$0xff]  }
 0x66a   :  { %5072 = vmatprep.subr.bf16.mxu0 %v5697_v53 }
 0x66b   :  { %3420 = vmatpush1.bf16.msra.mxu1 %v6348_v39 }
 0x66c   :  { %3421 = vmatprep.subr.bf16.mxu1 %v6358_v43 }
 0x66d   :  { %5073 = vmatpush3.bf16.msra.mxu0 %v5339_v22  ;;  %v5349_v22 = vld [vmem:[#allocation3 + $0x10] ss:$20 sps:$4 sm:$0xff]  }
 0x66e   :  { %5074 = vmatprep.subr.bf16.mxu0 %v5697_v53 }
 0x66f   :  { %3422 = vmatpush1.bf16.msra.mxu1 %v6360_v44 }
 0x670   :  { %3423 = vmatprep.subr.bf16.mxu1 %v6370_v48 }
 0x671   :  { %5075 = vmatpush3.bf16.msra.mxu0 %v5340_v24  ;;  %v5350_v24 = vld [vmem:[#allocation3 + $0x38] ss:$20 sps:$4 sm:$0xff]  }
 0x672   :  { %3450 = vmatprep.subr.bf16.mxu0 %v6290_v60  ;;  %v3109_v60 = vld [vmem:[#allocation2 + $0x28] sm:$0x30] }
 0x673   :  { %3424 = vmatpush1.bf16.msra.mxu1 %v6372_v49 }
 0x674   :  { %5077 = vmatmul.mubr.bf16.vlgmr.msra.gmra.mrb[40].mxu0 %v2727_v4  ;;  %5080 = vmatprep.subr.bf16.mxu1 %v5697_v53  ;;  %v5343_v4 = vld [vmem:[#allocation3 + $0x60] ss:$20 sps:$4 sm:$0xff]  }
 0x675   :  { %3451 = vmatpush1.bf16.msra.mxu0 %v6293_v61  ;;  %3482 = vmatprep.mubr.bf16.mxu0 %v5696_v3  ;;  %v3108_v3 = vld [vmem:[#allocation2 + $0x20] sm:$0x30] }
 0x676   :  { %3452 = vmatprep.subr.bf16.mxu0 %v6302_v26  ;;  %v3116_v61 = vrot.slane %v3108_v3, 4  ;;  %v5351_v3 = vld [vmem:[#allocation3 + $0x60] ss:$20 sps:$4 sm:$0xff]  }
 0x679   :  { %3453 = vmatpush1.bf16.msra.mxu0 %v6305_v29 }
 0x67a   :  { %3454 = vmatprep.subr.bf16.mxu0 %v6314_v27  ;;  %v3117_v27 = vrot.slane %v3109_v60, 4  ;;  %v5352_v60 = vld [vmem:[#allocation3 + $0x88] ss:$20 sps:$4 sm:$0xff]  }
 0x67d   :  { %3455 = vmatpush1.bf16.msra.mxu0 %v6317_v28 }
 0x67e   :  { %3456 = vmatprep.subr.bf16.mxu0 %v6326_v32 }
 0x681   :  { %3457 = vmatpush1.bf16.msra.mxu0 %v6329_v33 }
 0x682   :  { %3458 = vmatprep.subr.bf16.mxu0 %v6338_v36  ;;  %v3111_v36 = vld [vmem:[#allocation2 + $0x38] sm:$0x30] }
 0x685   :  { %3459 = vmatpush1.bf16.msra.mxu0 %v6341_v37 }
 0x686   :  { %3460 = vmatprep.subr.bf16.mxu0 %v6350_v40  ;;  %v3119_v40 = vrot.slane %v3111_v36, 4 }
 0x689   :  { %3461 = vmatpush1.bf16.msra.mxu0 %v6353_v41  ;;  %v3110_v41 = vld [vmem:[#allocation2 + $0x30] sm:$0x30] }
 0x68a   :  { %3462 = vmatprep.subr.bf16.mxu0 %v6362_v46  ;;  %v3118_v44 = vrot.slane %v3110_v41, 4 }
 0x68d   :  { %3463 = vmatpush1.bf16.msra.mxu0 %v6365_v47 }
 0x68e   :  { %3464 = vmatprep.subr.bf16.mxu0 %v6374_v50 }
 0x691   :  { %3465 = vmatpush1.bf16.msra.mxu0 %v6377_v51 }
 0x692   :  { %5100 = vmatprep.subr.bf16.mxu0 %v5697_v53 }
 0x727   :  { %v3018_v26 = vpop.f32.mrb[36].mxu0  ;;  %v3059_v29 = vpop.f32.mrb[44].mxu1 }
 0x728   :  { %v3124_v28 = vadd.f32 %v3116_v61, %v3018_v26  ;;  %v3020_v30 = vpop.f32.mrb[37].mxu0  ;;  %v3061_v31 = vpop.f32.mrb[45].mxu1  ;;  %v3126_v47 = vadd.f32 %v3118_v44, %v3059_v29  ;;  %v5353_v61 = vld [vmem:[#allocation3 + $0xb0] ss:$20 sps:$4 sm:$0xff]   ;;  %v5354_v26 = vld [vmem:[#allocation3 + $0xd8] ss:$20 sps:$4 sm:$0xff]  }
 0x729   :  { %v3125_v32 = vadd.f32 %v3117_v27, %v3020_v30  ;;  %v3022_v33 = vpop.f32.mrb[38].mxu0  ;;  %v3063_v34 = vpop.f32.mrb[46].mxu1  ;;  %v3127_v43 = vadd.f32 %v3119_v40, %v3061_v31  ;;  %v5355_v29 = vld [vmem:[#allocation3 + $0x100] ss:$20 sps:$4 sm:$0xff]   ;;  %v5356_v27 = vld [vmem:[#allocation3 + $0x128] ss:$20 sps:$4 sm:$0xff]  }
 0x72a   :  { %v4804_v35 = vmul.f32 -1.442695, %v3124_v28  ;;  %v3023_v37 = vpop.f32.mrb[39].mxu0  ;;  %v3064_v38 = vpop.f32.mrb[47].mxu1  ;;  %v3533_v28 = vld [vmem:[#allocation2 + $0x20] sm:$0xc0] }
 0x72b   :  { %v4805_v39 = vmul.f32 -1.442695, %v3125_v32  ;;  %v4806_v46 = vmul.f32 -1.442695, %v3127_v43  ;;  %v3534_v30 = vld [vmem:[#allocation2 + $0x28] sm:$0xc0]  ;;  %v6487_v31 = vpop.permute.xlu0 %3750 }
 0x72c   :  { %5463 = vpow2.f32 %v4804_v35  ;;  %v3541_v32 = vrot.slane %v3533_v28, 6  ;;  %v3542_v35 = vrot.slane %v3534_v30, 6  ;;  %v3536_v44 = vld [vmem:[#allocation2 + $0x38] sm:$0xc0] }
 0x72d   :  { %5465 = vpow2.f32 %v4805_v39 }
 0x72e   :  { %5467 = vpow2.f32 %v4806_v46 }
 0x72f   :  { %5469 = vtanh.f32 %v3126_v47 }
 0x736   :  { %v5464_v48 = vpop.eup %5463 }
 0x737   :  { %v5466_v49 = vpop.eup %5465  ;;  %v3131_v50 = vadd.f32 1.0, %v5464_v48  ;;  %v3544_v48 = vrot.slane %v3536_v44, 6 }
 0x738   :  { %v3137_v51 = vadd.f32 1.0, %v5466_v49  ;;  %v5468_v57 = vpop.eup %5467  ;;  %v3783_v49 = vpop.permute.xlu0 %3782 }
 0x739   :  { %5471 = vrcp.f32 %v3131_v50  ;;  %v5470_v58 = vpop.eup %5469  ;;  %v3144_v62 = vadd.f32 1.0, %v5468_v57  ;;  %v3535_v50 = vld [vmem:[#allocation2 + $0x30] sm:$0xc0] }
 0x73a   :  { %5473 = vrcp.f32 %v3137_v51  ;;  %v3543_v57 = vrot.slane %v3535_v50, 6 }
 0x73b   :  { %5475 = vrcp.f32 %v3144_v62 }
 0x743   :  { %v5472_v0 = vpop.eup %5471 }
 0x744   :  { %v5474_v1 = vpop.eup %5473  ;;  %v3148_v2 = vmul.f32 %v5472_v0, %v5470_v58 }
 0x745   :  { %v3147_v8 = vmul.f32 %v5474_v1, %v6385_v9  ;;  %v5476_v11 = vpop.eup %5475  ;;  %v3815_v1 = vpop.permute.xlu0 %3814 }
 0x747   :  { %v6452_v5 = vadd.f32 %v3148_v2, %v3147_v8  ;;  %v3100_v6 = vpop.f32.mrb[40].mxu0 }
 0x748   :  { %3107 = vst [vmem:[#allocation6 + $0xa] sm:$0x3] %v3100_v6  ;;  %v5078_v10 = vpop.f32.mrb[41].mxu0 }
 0x749   :  { %v3103_v7 = vpop.f32.mrb[42].mxu0  ;;  %5477 = vtanh.f32 %v6452_v5  ;;  %v3847_v10 = vpop.permute.xlu0 %3846 }
 0x74a   :  { %v5079_v63 = vpop.f32.mrb[43].mxu0 }
 0x74d   :  { %v6489_v7 = vpop.permute.xlu0 %3752 }
 0x74f   :  { %v3691_v18 = vld [vmem:[#allocation6 + $0xa] sm:$0x3] }
 0x750   :  { %v6456_v20 = vadd.f32 %v6391_v14, %v3691_v18 }
 0x752   :  { %3714 = vst [vmem:[#allocation6 + $0xa] sm:$0x3] %v6456_v20  ;;  %v3727_v12 = vmul.f32 1.442695, %v6456_v20  ;;  %3760 = vrot.lane.b32.xlu1 %v6456_v20, %s5699_s10 }
 0x753   :  { %v5478_v9 = vpop.eup %5477 }
 0x754   :  { %5479 = vpow2.f32 %v3727_v12  ;;  %v3151_v42 = vmul.f32 %v5478_v9, %v5476_v11  ;;  %v3787_v12 = vpop.permute.xlu0 %3786 }
 0x756   :  { %3792 = vrot.lane.b32.xlu1 %v6456_v20, %s5700_s11  ;;  %v3152_v54 = vpack.c.bf16 %v3151_v42, %v3151_v42 }
 0x758   :  { %3442 = vmatmul.mubr.bf16.vlgmr.msra.gmra.mrb[48].mxu1 %v3152_v54  ;;  %3483 = vmatmul.mubr.bf16.vlgmr.msra.gmra.mrb[44].mxu0 %v3152_v54 }
 0x759   :  { %5081 = vmatpush3.bf16.msra.mxu1 %v5341_v23  ;;  %5096 = vmatprep.mubr.msk.bf16.mxu1 %vm5698_vm2, %v5697_v53 }
 0x75a   :  { %3824 = vrot.lane.b32.xlu1 %v6456_v20, %s5701_s12  ;;  %5082 = vmatprep.subr.bf16.mxu1 %v5697_v53 }
 0x75b   :  { %5116 = vmatprep.mubr.msk.bf16.mxu0 %vm5698_vm2, %v5697_v53  ;;  %5101 = vmatpush3.bf16.msra.mxu0 %v5349_v22 }
 0x75c   :  { %5102 = vmatprep.subr.bf16.mxu0 %v5697_v53 }
 0x75d   :  { %5083 = vmatpush3.bf16.msra.mxu1 %v5342_v16  ;;  %v6492_v16 = vpop.permute.xlu1 %3784 }
 0x75e   :  { %v5480_v17 = vpop.eup %5479  ;;  %3856 = vrot.lane.b32.xlu1 %v6456_v20, %s5702_s13  ;;  %5084 = vmatprep.subr.bf16.mxu1 %v5697_v53 }
 0x75f   :  { %3739 = vst.msk [vmem:[#allocation6 + $0xa] sm:$0x3] %vm3733_vm3, %v5480_v17  ;;  %5103 = vmatpush3.bf16.msra.mxu0 %v5350_v24 }
 0x760   :  { %5104 = vmatprep.subr.bf16.mxu0 %v5697_v53 }
 0x761   :  { %5085 = vmatpush3.bf16.msra.mxu1 %v5343_v4 }
 0x762   :  { %5086 = vmatprep.subr.bf16.mxu1 %v5697_v53 }
 0x763   :  { %5105 = vmatpush3.bf16.msra.mxu0 %v5351_v3 }
 0x764   :  { %5106 = vmatprep.subr.bf16.mxu0 %v5697_v53 }
 0x765   :  { %5087 = vmatpush3.bf16.msra.mxu1 %v5344_v56 }
 0x766   :  { %5088 = vmatprep.subr.bf16.mxu1 %v5697_v53 }
 0x767   :  { %5107 = vmatpush3.bf16.msra.mxu0 %v5352_v60 }
 0x768   :  { %5108 = vmatprep.subr.bf16.mxu0 %v5697_v53 }
 0x769   :  { %5089 = vmatpush3.bf16.msra.mxu1 %v5345_v13  ;;  %v3819_v13 = vpop.permute.xlu0 %3818 }
 0x76a   :  { %5090 = vmatprep.subr.bf16.mxu1 %v5697_v53 }
 0x76b   :  { %5109 = vmatpush3.bf16.msra.mxu0 %v5353_v61 }
 0x76c   :  { %5110 = vmatprep.subr.bf16.mxu0 %v5697_v53 }
 0x76d   :  { %5091 = vmatpush3.bf16.msra.mxu1 %v5346_v59  ;;  %v3851_v22 = vpop.permute.xlu0 %3850 }
 0x76e   :  { %5092 = vmatprep.subr.bf16.mxu1 %v5697_v53 }
 0x76f   :  { %5111 = vmatpush3.bf16.msra.mxu0 %v5354_v26 }
 0x770   :  { %5112 = vmatprep.subr.bf16.mxu0 %v5697_v53 }
 0x771   :  { %5093 = vmatpush3.bf16.msra.mxu1 %v5347_v19 }
 0x772   :  { %5094 = vmatprep.subr.bf16.mxu1 %v5697_v53 }
 0x773   :  { %5113 = vmatpush3.bf16.msra.mxu0 %v5355_v29  ;;  %v3759_v29 = vpop.permute.xlu0 %3758 }
 0x774   :  { %5114 = vmatprep.subr.bf16.mxu0 %v5697_v53 }
 0x775   :  { %5095 = vmatpush3.bf16.msra.mxu1 %v5348_v25  ;;  %v6494_v25 = vpop.permute.xlu1 %3816 }
 0x777   :  { %5115 = vmatpush3.bf16.msra.mxu0 %v5356_v27 }
 0x778   :  { %5097 = vmatmul.mubr.bf16.vlgmr.msra.gmra.mrb[52].mxu1 %v3152_v54 }
 0x779   :  { %v6503_v26 = vpop.permute.xlu1 %3848 }
 0x77d   :  { %v3755_v30 = vpop.permute.xlu1 %3754 }
 0x82b   :  { %v3443_v33 = vpop.f32.mrb[48].mxu1  ;;  %v3484_v34 = vpop.f32.mrb[44].mxu0 }
 0x82c   :  { %v3549_v36 = vadd.f32 %v3541_v32, %v3443_v33  ;;  %v3445_v37 = vpop.f32.mrb[49].mxu1  ;;  %v3486_v38 = vpop.f32.mrb[45].mxu0  ;;  %v3551_v0 = vadd.f32 %v3543_v57, %v3484_v34  ;;  %v3774_v33 = vmax.f32 %v6012_v45, %v6487_v31  ;;  %v3776_v34 = vmax.f32 %v6201_v55, %v3755_v30 }
 0x82d   :  { %v3550_v39 = vadd.f32 %v3542_v35, %v3445_v37  ;;  %v3447_v40 = vpop.f32.mrb[50].mxu1  ;;  %v3488_v41 = vpop.f32.mrb[46].mxu0  ;;  %v3552_v51 = vadd.f32 %v3544_v48, %v3486_v38  ;;  %v3778_v31 = vmax.f32 %v6394_v21, %v3759_v29  ;;  %v3775_v29 = vmax.f32 %v6139_v52, %v6489_v7 }
 0x82e   :  { %v4847_v43 = vmul.f32 -1.442695, %v3549_v36  ;;  %v3448_v46 = vpop.f32.mrb[51].mxu1  ;;  %v3489_v53 = vpop.f32.mrb[47].mxu0  ;;  %v3806_v35 = vmax.f32 %v3774_v33, %v3783_v49  ;;  %v3808_v38 = vmax.f32 %v3776_v34, %v3787_v12 }
 0x82f   :  { %v4848_v47 = vmul.f32 -1.442695, %v3550_v39  ;;  %v4849_v58 = vmul.f32 -1.442695, %v3552_v51  ;;  %v3791_v32 = vpop.permute.xlu0 %3790 }
 0x830   :  { %5481 = vpow2.f32 %v4847_v43  ;;  %v3838_v37 = vmax.f32 %v3806_v35, %v3815_v1  ;;  %v3840_v41 = vmax.f32 %v3808_v38, %v3819_v13  ;;  %v3810_v44 = vmax.f32 %v3778_v31, %v3791_v32 }
 0x831   :  { %5483 = vpow2.f32 %v4848_v47 }
 0x832   :  { %5485 = vpow2.f32 %v4849_v58  ;;  %v6515_v40 = vmax.f32 %v3838_v37, %v3847_v10  ;;  %v6520_v43 = vmax.f32 %v3840_v41, %v3851_v22 }
 0x833   :  { %5487 = vtanh.f32 %v3551_v0  ;;  %v3823_v39 = vpop.permute.xlu0 %3822 }
 0x834   :  { %v3842_v53 = vmax.f32 %v3810_v44, %v3823_v39 }
 0x837   :  { %v3855_v46 = vpop.permute.xlu0 %3854 }
 0x838   :  { %v6524_v47 = vmax.f32 %v3842_v53, %v3855_v46 }
 0x83a   :  { %v5482_v2 = vpop.eup %5481 }
 0x83b   :  { %v5484_v62 = vpop.eup %5483  ;;  %v3556_v8 = vadd.f32 1.0, %v5482_v2 }
 0x83c   :  { %v3562_v6 = vadd.f32 1.0, %v5484_v62  ;;  %v5486_v63 = vpop.eup %5485 }
 0x83d   :  { %5489 = vrcp.f32 %v3556_v8  ;;  %v5488_v18 = vpop.eup %5487  ;;  %v3569_v23 = vadd.f32 1.0, %v5486_v63 }
 0x83e   :  { %5491 = vrcp.f32 %v3562_v6 }
 0x83f   :  { %5493 = vrcp.f32 %v3569_v23 }
 0x847   :  { %v5490_v11 = vpop.eup %5489 }
 0x848   :  { %v5492_v9 = vpop.eup %5491  ;;  %v3573_v42 = vmul.f32 %v5490_v11, %v5488_v18 }
 0x849   :  { %v3572_v54 = vmul.f32 %v5492_v9, %v6452_v5  ;;  %v5494_v5 = vpop.eup %5493 }
 0x84b   :  { %v3574_v4 = vadd.f32 %v3573_v42, %v3572_v54  ;;  %v3525_v17 = vpop.f32.mrb[52].mxu1  ;;  %v3757_v54 = vpop.permute.xlu1 %3756 }
 0x84c   :  { %3532 = vst [vmem:[#allocation6 + $0xc] sm:$0x3] %v3525_v17  ;;  %v5098_v56 = vpop.f32.mrb[53].mxu1  ;;  %v3777_v32 = vmax.f32 %v6262_v15, %v3757_v54 }
 0x84d   :  { %5495 = vtanh.f32 %v3574_v4  ;;  %3578 = vst [vmem:[#allocation9] sm:$0x3] %v3574_v4  ;;  %v3528_v59 = vpop.f32.mrb[54].mxu1 }
 0x84e   :  { %v5099_v19 = vpop.f32.mrb[55].mxu1 }
 0x84f   :  { %v3789_v4 = vpop.permute.xlu1 %3788 }
 0x850   :  { %v3809_v34 = vmax.f32 %v3777_v32, %v3789_v4 }
 0x853   :  { %v3692_v24 = vld [vmem:[#allocation6 + $0xc] sm:$0x3]  ;;  %v3821_v13 = vpop.permute.xlu1 %3820 }
 0x854   :  { %v6497_v3 = vadd.f32 %v6391_v14, %v3692_v24 }
 0x856   :  { %3715 = vst [vmem:[#allocation6 + $0xc] sm:$0x3] %v6497_v3  ;;  %v3729_v60 = vmul.f32 1.442695, %v6497_v3  ;;  %3762 = vrot.lane.b32.xlu0 %v6497_v3, %s5699_s10 }
 0x857   :  { %v5496_v61 = vpop.eup %5495  ;;  %v3853_v22 = vpop.permute.xlu1 %3852 }
 0x858   :  { %5497 = vpow2.f32 %v3729_v60  ;;  %v3576_v27 = vmul.f32 %v5496_v61, %v5494_v5 }
 0x85a   :  { %3794 = vrot.lane.b32.xlu0 %v6497_v3, %s5700_s11  ;;  %v3579_v28 = vpack.c.bf16 %v3576_v27, %v3576_v27  ;;  %3577 = vst [vmem:[#allocation7] sm:$0x3] %v3576_v27 }
 0x85b   :  { %v3761_v61 = vpop.permute.xlu1 %3760 }
 0x85c   :  { %5117 = vmatmul.mubr.bf16.vlgmr.msra.gmra.mrb[48].mxu0 %v3579_v28  ;;  %v3807_v28 = vmax.f32 %v3775_v29, %v6492_v16  ;;  %v3841_v16 = vmax.f32 %v3809_v34, %v3821_v13 }
 0x85e   :  { %3826 = vrot.lane.b32.xlu0 %v6497_v3, %s5701_s12  ;;  %v3839_v30 = vmax.f32 %v3807_v28, %v6494_v25  ;;  %v6598_v25 = vmax.f32 %v3841_v16, %v3853_v22 }
 0x85f   :  { %v3793_v27 = vpop.permute.xlu1 %3792 }
 0x860   :  { %v6592_v7 = vmax.f32 %v3839_v30, %v6503_v26 }
 0x862   :  { %v5498_v36 = vpop.eup %5497  ;;  %3858 = vrot.lane.b32.xlu0 %v6497_v3, %s5702_s13 }
 0x863   :  { %3740 = vst.msk [vmem:[#allocation6 + $0xc] sm:$0x3] %vm3733_vm3, %v5498_v36  ;;  %v3825_v33 = vpop.permute.xlu1 %3824  ;;  %v3779_v36 = vmax.f32 %v6456_v20, %v3761_v61 }
 0x865   :  { %v3811_v38 = vmax.f32 %v3779_v36, %v3793_v27 }
 0x866   :  { %3910 = vrot.lane.b32.xlu0 %v6515_v40, %s5703_s6 }
 0x867   :  { %v3857_v41 = vpop.permute.xlu1 %3856  ;;  %v3843_v44 = vmax.f32 %v3811_v38, %v3825_v33 }
 0x869   :  { %v6603_v46 = vmax.f32 %v3843_v44, %v3857_v41 }
 0x86a   :  { %3914 = vrot.lane.b32.xlu0 %v6520_v43, %s5703_s6 }
 0x86e   :  { %3918 = vrot.lane.b32.xlu0 %v6524_v47, %s5703_s6 }
 0x8c8   :  { %v3763_v48 = vpop.permute.xlu0 %3762 }
 0x8c9   :  { %v3780_v50 = vmax.f32 %v6497_v3, %v3763_v48 }
 0x8cc   :  { %v3795_v49 = vpop.permute.xlu0 %3794 }
 0x8cd   :  { %v3812_v57 = vmax.f32 %v3780_v50, %v3795_v49 }
 0x8d0   :  { %v3827_v51 = vpop.permute.xlu0 %3826 }
 0x8d1   :  { %v3844_v58 = vmax.f32 %v3812_v57, %v3827_v51 }
 0x8d4   :  { %v3859_v0 = vpop.permute.xlu0 %3858 }
 0x8d5   :  { %v6529_v1 = vmax.f32 %v3844_v58, %v3859_v0 }
 0x8d7   :  { %3922 = vrot.lane.b32.xlu0 %v6529_v1, %s5703_s6 }
 0x8d8   :  { %v3911_v2 = vpop.permute.xlu0 %3910 }
 0x8d9   :  { %v3934_v8 = vsub.f32 %v6012_v45, %v3911_v2 }
 0x8db   :  { %3958 = vrot.lane.b32.xlu0 %v6515_v40, %s5704_s16  ;;  %v3942_v6 = vmul.f32 1.442695, %v3934_v8 }
 0x8dc   :  { %v3915_v62 = vpop.permute.xlu0 %3914 }
 0x8dd   :  { %v3936_v10 = vsub.f32 %v6201_v55, %v3915_v62  ;;  %5499 = vpow2.f32 %v3942_v6 }
 0x8df   :  { %3962 = vrot.lane.b32.xlu0 %v6520_v43, %s5704_s16  ;;  %v3946_v18 = vmul.f32 1.442695, %v3936_v10 }
 0x8e0   :  { %v3919_v63 = vpop.permute.xlu0 %3918 }
 0x8e1   :  { %v3938_v11 = vsub.f32 %v6394_v21, %v3919_v63  ;;  %5501 = vpow2.f32 %v3946_v18 }
 0x8e3   :  { %3966 = vrot.lane.b32.xlu0 %v6524_v47, %s5704_s16  ;;  %v3950_v12 = vmul.f32 1.442695, %v3938_v11 }
 0x8e5   :  { %5503 = vpow2.f32 %v3950_v12 }
 0x8e7   :  { %3970 = vrot.lane.b32.xlu0 %v6529_v1, %s5704_s16  ;;  %v6560_v9 = vpop.eup %5499 }
 0x8eb   :  { %4006 = vrot.lane.b32.xlu0 %v6515_v40, %s5705_s17  ;;  %v6564_v42 = vpop.eup %5501 }
 0x8ef   :  { %4010 = vrot.lane.b32.xlu0 %v6520_v43, %s5705_s17  ;;  %v6568_v23 = vpop.eup %5503 }
 0x8f3   :  { %4014 = vrot.lane.b32.xlu0 %v6524_v47, %s5705_s17 }
 0x8f7   :  { %4018 = vrot.lane.b32.xlu0 %v6529_v1, %s5705_s17 }
 0x8fb   :  { %4054 = vrot.lane.b32.xlu0 %v6515_v40, %s5706_s18 }
 0x8ff   :  { %4058 = vrot.lane.b32.xlu0 %v6520_v43, %s5706_s18 }
 0x903   :  { %4062 = vrot.lane.b32.xlu0 %v6524_v47, %s5706_s18 }
 0x907   :  { %4066 = vrot.lane.b32.xlu0 %v6529_v1, %s5706_s18 }
 0x90b   :  { %4110 = vrot.lane.b32.xlu0 %v6560_v9, %s5699_s10 }
 0x90f   :  { %4114 = vrot.lane.b32.xlu0 %v6564_v42, %s5699_s10 }
 0x913   :  { %4118 = vrot.lane.b32.xlu0 %v6568_v23, %s5699_s10 }
 0x92f   :  { %v3678_v17 = vpop.f32.mrb[48].mxu0 }
 0x930   :  { %3685 = vst [vmem:[#allocation6 + $0xe] sm:$0x3] %v3678_v17  ;;  %v5118_v56 = vpop.f32.mrb[49].mxu0 }
 0x931   :  { %v3681_v59 = vpop.f32.mrb[50].mxu0 }
 0x932   :  { %v5119_v19 = vpop.f32.mrb[51].mxu0 }
 0x937   :  { %v3693_v24 = vld [vmem:[#allocation6 + $0xe] sm:$0x3] }
 0x938   :  { %v6573_v5 = vadd.f32 %v6391_v14, %v3693_v24 }
 0x93a   :  { %3716 = vst [vmem:[#allocation6 + $0xe] sm:$0x3] %v6573_v5  ;;  %v3731_v60 = vmul.f32 1.442695, %v6573_v5  ;;  %3764 = vrot.lane.b32.xlu1 %v6573_v5, %s5699_s10 }
 0x93c   :  { %5505 = vpow2.f32 %v3731_v60 }
 0x93e   :  { %3796 = vrot.lane.b32.xlu1 %v6573_v5, %s5700_s11 }
 0x942   :  { %3828 = vrot.lane.b32.xlu1 %v6573_v5, %s5701_s12 }
 0x946   :  { %v5506_v14 = vpop.eup %5505  ;;  %3860 = vrot.lane.b32.xlu1 %v6573_v5, %s5702_s13 }
 0x947   :  { %3741 = vst.msk [vmem:[#allocation6 + $0xe] sm:$0x3] %vm3733_vm3, %v5506_v14 }
 0x949   :  { %v3923_v35 = vpop.permute.xlu0 %3922 }
 0x94a   :  { %v3940_v37 = vsub.f32 %v6497_v3, %v3923_v35  ;;  %3912 = vrot.lane.b32.xlu1 %v6592_v7, %s5703_s6 }
 0x94c   :  { %v3954_v39 = vmul.f32 1.442695, %v3940_v37 }
 0x94d   :  { %v3959_v31 = vpop.permute.xlu0 %3958 }
 0x94e   :  { %5507 = vpow2.f32 %v3954_v39  ;;  %v3982_v26 = vsub.f32 %v6012_v45, %v3959_v31  ;;  %3916 = vrot.lane.b32.xlu1 %v6598_v25, %s5703_s6 }
 0x950   :  { %v3990_v53 = vmul.f32 1.442695, %v3982_v26 }
 0x951   :  { %v3963_v48 = vpop.permute.xlu0 %3962 }
 0x952   :  { %5509 = vpow2.f32 %v3990_v53  ;;  %v3984_v49 = vsub.f32 %v6201_v55, %v3963_v48  ;;  %3920 = vrot.lane.b32.xlu1 %v6603_v46, %s5703_s6 }
 0x954   :  { %v3994_v50 = vmul.f32 1.442695, %v3984_v49 }
 0x955   :  { %v3967_v51 = vpop.permute.xlu0 %3966 }
 0x956   :  { %5511 = vpow2.f32 %v3994_v50  ;;  %v3986_v57 = vsub.f32 %v6394_v21, %v3967_v51  ;;  %3960 = vrot.lane.b32.xlu1 %v6592_v7, %s5704_s16 }
 0x958   :  { %v6611_v58 = vpop.eup %5507  ;;  %v3998_v0 = vmul.f32 1.442695, %v3986_v57 }
 0x959   :  { %4122 = vrot.lane.b32.xlu0 %v6611_v58, %s5699_s10  ;;  %v3971_v2 = vpop.permute.xlu0 %3970 }
 0x95a   :  { %5513 = vpow2.f32 %v3998_v0  ;;  %v3988_v62 = vsub.f32 %v6497_v3, %v3971_v2  ;;  %3964 = vrot.lane.b32.xlu1 %v6598_v25, %s5704_s16 }
 0x95c   :  { %v6618_v8 = vpop.eup %5509  ;;  %v4002_v6 = vmul.f32 1.442695, %v3988_v62 }
 0x95d   :  { %4150 = vrot.lane.b32.xlu0 %v6618_v8, %s5700_s11  ;;  %v4007_v10 = vpop.permute.xlu0 %4006 }
 0x95e   :  { %5515 = vpow2.f32 %v4002_v6  ;;  %v4030_v63 = vsub.f32 %v6012_v45, %v4007_v10  ;;  %3968 = vrot.lane.b32.xlu1 %v6603_v46, %s5704_s16 }
 0x960   :  { %v6625_v18 = vpop.eup %5511  ;;  %v4038_v11 = vmul.f32 1.442695, %v4030_v63 }
 0x961   :  { %4154 = vrot.lane.b32.xlu0 %v6625_v18, %s5700_s11  ;;  %v4011_v12 = vpop.permute.xlu0 %4010 }
 0x962   :  { %5517 = vpow2.f32 %v4038_v11  ;;  %v4032_v54 = vsub.f32 %v6201_v55, %v4011_v12  ;;  %4008 = vrot.lane.b32.xlu1 %v6592_v7, %s5705_s17 }
 0x964   :  { %v6632_v4 = vpop.eup %5513  ;;  %v4042_v17 = vmul.f32 1.442695, %v4032_v54 }
 0x965   :  { %4158 = vrot.lane.b32.xlu0 %v6632_v4, %s5700_s11  ;;  %v4015_v56 = vpop.permute.xlu0 %4014 }
 0x966   :  { %5519 = vpow2.f32 %v4042_v17  ;;  %v4034_v13 = vsub.f32 %v6394_v21, %v4015_v56  ;;  %4012 = vrot.lane.b32.xlu1 %v6598_v25, %s5705_s17 }
 0x968   :  { %v6639_v59 = vpop.eup %5515  ;;  %v4046_v19 = vmul.f32 1.442695, %v4034_v13 }
 0x969   :  { %4162 = vrot.lane.b32.xlu0 %v6639_v59, %s5700_s11  ;;  %v4019_v22 = vpop.permute.xlu0 %4018 }
 0x96a   :  { %5521 = vpow2.f32 %v4046_v19  ;;  %v4036_v24 = vsub.f32 %v6497_v3, %v4019_v22  ;;  %4016 = vrot.lane.b32.xlu1 %v6603_v46, %s5705_s17 }
 0x96c   :  { %v6646_v60 = vpop.eup %5517  ;;  %v4050_v61 = vmul.f32 1.442695, %v4036_v24 }
 0x96d   :  { %4190 = vrot.lane.b32.xlu0 %v6646_v60, %s5701_s12  ;;  %v4055_v29 = vpop.permute.xlu0 %4054 }
 0x96e   :  { %5523 = vpow2.f32 %v4050_v61  ;;  %v4078_v27 = vsub.f32 %v6012_v45, %v4055_v29  ;;  %4056 = vrot.lane.b32.xlu1 %v6592_v7, %s5706_s18 }
 0x970   :  { %v6653_v28 = vpop.eup %5519  ;;  %v4086_v14 = vmul.f32 1.442695, %v4078_v27 }
 0x971   :  { %4194 = vrot.lane.b32.xlu0 %v6653_v28, %s5701_s12  ;;  %v4059_v30 = vpop.permute.xlu0 %4058 }
 0x972   :  { %5525 = vpow2.f32 %v4086_v14  ;;  %v4080_v32 = vsub.f32 %v6201_v55, %v4059_v30  ;;  %4060 = vrot.lane.b32.xlu1 %v6598_v25, %s5706_s18 }
 0x974   :  { %v6660_v33 = vpop.eup %5521  ;;  %v4090_v34 = vmul.f32 1.442695, %v4080_v32 }
 0x975   :  { %4198 = vrot.lane.b32.xlu0 %v6660_v33, %s5701_s12  ;;  %v4063_v35 = vpop.permute.xlu0 %4062 }
 0x976   :  { %5527 = vpow2.f32 %v4090_v34  ;;  %v4082_v16 = vsub.f32 %v6394_v21, %v4063_v35  ;;  %4064 = vrot.lane.b32.xlu1 %v6603_v46, %s5706_s18 }
 0x978   :  { %v6667_v36 = vpop.eup %5523  ;;  %v4094_v37 = vmul.f32 1.442695, %v4082_v16 }
 0x979   :  { %4202 = vrot.lane.b32.xlu0 %v6667_v36, %s5701_s12  ;;  %v4067_v38 = vpop.permute.xlu0 %4066 }
 0x97a   :  { %5529 = vpow2.f32 %v4094_v37  ;;  %v4084_v39 = vsub.f32 %v6497_v3, %v4067_v38 }
 0x97c   :  { %v6672_v41 = vpop.eup %5525  ;;  %v4098_v31 = vmul.f32 1.442695, %v4084_v39 }
 0x97d   :  { %4230 = vrot.lane.b32.xlu0 %v6672_v41, %s5702_s13  ;;  %v6691_v6 = vpop.permute.xlu0 %4110 }
 0x97e   :  { %5531 = vpow2.f32 %v4098_v31 }
 0x980   :  { %v6676_v44 = vpop.eup %5527 }
 0x981   :  { %4234 = vrot.lane.b32.xlu0 %v6676_v44, %s5702_s13  ;;  %v6698_v54 = vpop.permute.xlu0 %4114 }
 0x984   :  { %v6680_v26 = vpop.eup %5529 }
 0x985   :  { %4238 = vrot.lane.b32.xlu0 %v6680_v26, %s5702_s13  ;;  %v6704_v22 = vpop.permute.xlu0 %4118 }
 0x988   :  { %v6684_v53 = vpop.eup %5531 }
 0x989   :  { %4242 = vrot.lane.b32.xlu0 %v6684_v53, %s5702_s13 }
 0x9ac   :  { %v3765_v48 = vpop.permute.xlu1 %3764 }
 0x9ad   :  { %v3781_v50 = vmax.f32 %v6573_v5, %v3765_v48 }
 0x9b0   :  { %v3797_v49 = vpop.permute.xlu1 %3796 }
 0x9b1   :  { %v3813_v57 = vmax.f32 %v3781_v50, %v3797_v49 }
 0x9b4   :  { %v3829_v51 = vpop.permute.xlu1 %3828 }
 0x9b5   :  { %v3845_v0 = vmax.f32 %v3813_v57, %v3829_v51 }
 0x9b8   :  { %v3861_v2 = vpop.permute.xlu1 %3860 }
 0x9b9   :  { %v6689_v62 = vmax.f32 %v3845_v0, %v3861_v2  ;;  %v3878_v0 = vsub.f32 %v6012_v45, %v6515_v40 }
 0x9bb   :  { %3924 = vrot.lane.b32.xlu1 %v6689_v62, %s5703_s6 }
 0x9bc   :  { %v3913_v10 = vpop.permute.xlu1 %3912 }
 0x9bd   :  { %v3935_v63 = vsub.f32 %v6139_v52, %v3913_v10 }
 0x9bf   :  { %v3944_v11 = vmul.f32 1.442695, %v3935_v63  ;;  %3972 = vrot.lane.b32.xlu1 %v6689_v62, %s5704_s16 }
 0x9c0   :  { %v3917_v12 = vpop.permute.xlu1 %3916 }
 0x9c1   :  { %5533 = vpow2.f32 %v3944_v11  ;;  %v3937_v17 = vsub.f32 %v6262_v15, %v3917_v12 }
 0x9c3   :  { %v3948_v56 = vmul.f32 1.442695, %v3937_v17  ;;  %4020 = vrot.lane.b32.xlu1 %v6689_v62, %s5705_s17  ;;  %v3886_v17 = vmul.f32 1.442695, %v3878_v0 }
 0x9c4   :  { %v3921_v13 = vpop.permute.xlu1 %3920 }
 0x9c5   :  { %5535 = vpow2.f32 %v3948_v56  ;;  %v3939_v19 = vsub.f32 %v6456_v20, %v3921_v13  ;;  %v3880_v56 = vsub.f32 %v6201_v55, %v6520_v43 }
 0x9c7   :  { %v3952_v24 = vmul.f32 1.442695, %v3939_v19  ;;  %4068 = vrot.lane.b32.xlu1 %v6689_v62, %s5706_s18 }
 0x9c8   :  { %v3961_v61 = vpop.permute.xlu1 %3960 }
 0x9c9   :  { %5537 = vpow2.f32 %v3952_v24  ;;  %v3983_v29 = vsub.f32 %v6139_v52, %v3961_v61  ;;  %v3890_v61 = vmul.f32 1.442695, %v3880_v56 }
 0x9cb   :  { %v6709_v27 = vpop.eup %5533  ;;  %v3992_v14 = vmul.f32 1.442695, %v3983_v29  ;;  %v6711_v30 = vpop.permute.xlu0 %4122  ;;  %v3882_v29 = vsub.f32 %v6394_v21, %v6524_v47 }
 0x9cc   :  { %4112 = vrot.lane.b32.xlu1 %v6709_v27, %s5699_s10  ;;  %v3965_v32 = vpop.permute.xlu1 %3964 }
 0x9cd   :  { %5539 = vpow2.f32 %v3992_v14  ;;  %v3985_v34 = vsub.f32 %v6262_v15, %v3965_v32 }
 0x9cf   :  { %v6716_v35 = vpop.eup %5535  ;;  %v3996_v16 = vmul.f32 1.442695, %v3985_v34  ;;  %v6718_v37 = vpop.permute.xlu0 %4150 }
 0x9d0   :  { %4116 = vrot.lane.b32.xlu1 %v6716_v35, %s5699_s10  ;;  %v3969_v38 = vpop.permute.xlu1 %3968 }
 0x9d1   :  { %5541 = vpow2.f32 %v3996_v16  ;;  %v3987_v39 = vsub.f32 %v6456_v20, %v3969_v38  ;;  %v3894_v16 = vmul.f32 1.442695, %v3882_v29  ;;  %v3884_v38 = vsub.f32 %v6497_v3, %v6529_v1 }
 0x9d3   :  { %v6723_v31 = vpop.eup %5537  ;;  %v4000_v48 = vmul.f32 1.442695, %v3987_v39  ;;  %v6725_v49 = vpop.permute.xlu0 %4154 }
 0x9d4   :  { %4120 = vrot.lane.b32.xlu1 %v6723_v31, %s5699_s10  ;;  %v4009_v50 = vpop.permute.xlu1 %4008 }
 0x9d5   :  { %5543 = vpow2.f32 %v4000_v48  ;;  %v4031_v51 = vsub.f32 %v6139_v52, %v4009_v50 }
 0x9d7   :  { %v6730_v57 = vpop.eup %5539  ;;  %v4040_v2 = vmul.f32 1.442695, %v4031_v51  ;;  %v6734_v10 = vpop.permute.xlu0 %4158  ;;  %v3898_v51 = vmul.f32 1.442695, %v3884_v38 }
 0x9d8   :  { %4152 = vrot.lane.b32.xlu1 %v6730_v57, %s5700_s11  ;;  %v4013_v63 = vpop.permute.xlu1 %4012 }
 0x9d9   :  { %5545 = vpow2.f32 %v4040_v2  ;;  %v4033_v11 = vsub.f32 %v6262_v15, %v4013_v63 }
 0x9db   :  { %v6739_v12 = vpop.eup %5541  ;;  %v4044_v13 = vmul.f32 1.442695, %v4033_v11  ;;  %v6743_v19 = vpop.permute.xlu0 %4162 }
 0x9dc   :  { %4156 = vrot.lane.b32.xlu1 %v6739_v12, %s5700_s11  ;;  %v4017_v45 = vpop.permute.xlu1 %4016 }
 0x9dd   :  { %5547 = vpow2.f32 %v4044_v13  ;;  %v4035_v40 = vsub.f32 %v6456_v20, %v4017_v45 }
 0x9de   :  { %5549 = vpow2.f32 %v3886_v17 }
 0x9df   :  { %v6748_v24 = vpop.eup %5543  ;;  %v4048_v14 = vmul.f32 1.442695, %v4035_v40  ;;  %v4191_v32 = vpop.permute.xlu0 %4190 }
 0x9e0   :  { %4160 = vrot.lane.b32.xlu1 %v6748_v24, %s5700_s11  ;;  %v4057_v55 = vpop.permute.xlu1 %4056 }
 0x9e1   :  { %5551 = vpow2.f32 %v4048_v14  ;;  %v4079_v43 = vsub.f32 %v6139_v52, %v4057_v55 }
 0x9e2   :  { %5553 = vpow2.f32 %v3890_v61 }
 0x9e3   :  { %v6755_v34 = vpop.eup %5545  ;;  %v4088_v39 = vmul.f32 1.442695, %v4079_v43  ;;  %v4195_v48 = vpop.permute.xlu0 %4194 }
 0x9e4   :  { %4192 = vrot.lane.b32.xlu1 %v6755_v34, %s5701_s12  ;;  %v4061_v21 = vpop.permute.xlu1 %4060 }
 0x9e5   :  { %5555 = vpow2.f32 %v4088_v39  ;;  %v4081_v47 = vsub.f32 %v6262_v15, %v4061_v21 }
 0x9e6   :  { %5557 = vpow2.f32 %v3894_v16 }
 0x9e7   :  { %v6762_v50 = vpop.eup %5547  ;;  %v4092_v0 = vmul.f32 1.442695, %v4081_v47  ;;  %v4199_v2 = vpop.permute.xlu0 %4198 }
 0x9e8   :  { %4196 = vrot.lane.b32.xlu1 %v6762_v50, %s5701_s12  ;;  %v4065_v63 = vpop.permute.xlu1 %4064  ;;  %v6766_v3 = vpop.eup %5549 }
 0x9e9   :  { %5559 = vpow2.f32 %v4092_v0  ;;  %v4083_v1 = vsub.f32 %v6456_v20, %v4065_v63  ;;  %v4134_v11 = vadd.f32 %v6766_v3, %v6691_v6 }
 0x9ea   :  { %5561 = vpow2.f32 %v3898_v51 }
 0x9eb   :  { %v6771_v17 = vpop.eup %5551  ;;  %v4096_v56 = vmul.f32 1.442695, %v4083_v1  ;;  %v4203_v13 = vpop.permute.xlu0 %4202  ;;  %v4174_v45 = vadd.f32 %v6718_v37, %v4134_v11 }
 0x9ec   :  { %4200 = vrot.lane.b32.xlu1 %v6771_v17, %s5701_s12  ;;  %v6776_v40 = vpop.eup %5553 }
 0x9ed   :  { %5563 = vpow2.f32 %v4096_v56  ;;  %v4136_v61 = vadd.f32 %v6776_v40, %v6698_v54  ;;  %v4214_v29 = vadd.f32 %v4191_v32, %v4174_v45 }
 0x9ef   :  { %v6780_v14 = vpop.eup %5555  ;;  %v4231_v6 = vpop.permute.xlu0 %4230  ;;  %v4176_v55 = vadd.f32 %v6725_v49, %v4136_v61 }
 0x9f0   :  { %v4254_v43 = vadd.f32 %v4231_v6, %v4214_v29  ;;  %4232 = vrot.lane.b32.xlu1 %v6780_v14, %s5702_s13  ;;  %v6785_v37 = vpop.eup %5557 }
 0x9f1   :  { %v4138_v16 = vadd.f32 %v6785_v37, %v6704_v22  ;;  %v4216_v38 = vadd.f32 %v4195_v48, %v4176_v55 }
 0x9f2   :  { %5565 = vrcp.f32 %v4254_v43 }
 0x9f3   :  { %v6789_v39 = vpop.eup %5559  ;;  %v4235_v54 = vpop.permute.xlu0 %4234  ;;  %v4178_v32 = vadd.f32 %v6734_v10, %v4138_v16 }
 0x9f4   :  { %v4256_v21 = vadd.f32 %v4235_v54, %v4216_v38  ;;  %4236 = vrot.lane.b32.xlu1 %v6789_v39, %s5702_s13  ;;  %v5562_v49 = vpop.eup %5561 }
 0x9f5   :  { %v4140_v47 = vadd.f32 %v5562_v49, %v6711_v30  ;;  %v4218_v51 = vadd.f32 %v4199_v2, %v4178_v32 }
 0x9f6   :  { %5567 = vrcp.f32 %v4256_v21 }
 0x9f7   :  { %v6795_v0 = vpop.eup %5563  ;;  %v4239_v63 = vpop.permute.xlu0 %4238  ;;  %v4180_v22 = vadd.f32 %v6743_v19, %v4140_v47 }
 0x9f8   :  { %v4258_v48 = vadd.f32 %v4239_v63, %v4218_v51  ;;  %4240 = vrot.lane.b32.xlu1 %v6795_v0, %s5702_s13 }
 0x9f9   :  { %v4220_v1 = vadd.f32 %v4203_v13, %v4180_v22 }
 0x9fa   :  { %5569 = vrcp.f32 %v4258_v48 }
 0x9fb   :  { %v4243_v10 = vpop.permute.xlu0 %4242 }
 0x9fc   :  { %v6800_v11 = vpop.eup %5565  ;;  %v4260_v56 = vadd.f32 %v4243_v10, %v4220_v1 }
 0x9fd   :  { %4286 = vrot.lane.b32.xlu0 %v6800_v11, %s5703_s6 }
 0x9fe   :  { %5571 = vrcp.f32 %v4260_v56  ;;  %v3879_v56 = vsub.f32 %v6139_v52, %v6592_v7 }
 0xa00   :  { %v6804_v30 = vpop.eup %5567 }
 0xa01   :  { %4290 = vrot.lane.b32.xlu0 %v6804_v30, %s5703_s6 }
 0xa04   :  { %v6808_v19 = vpop.eup %5569 }
 0xa05   :  { %4294 = vrot.lane.b32.xlu0 %v6808_v19, %s5703_s6 }
 0xa08   :  { %v5572_v2 = vpop.eup %5571 }
 0xa09   :  { %4298 = vrot.lane.b32.xlu0 %v5572_v2, %s5703_s6  ;;  %v6813_v13 = vmul.f32 %v5572_v2, %v5562_v49 }
 0xa0d   :  { %4318 = vrot.lane.b32.xlu0 %v6800_v11, %s5704_s16 }
 0xa11   :  { %4322 = vrot.lane.b32.xlu0 %v6804_v30, %s5704_s16 }
 0xa15   :  { %4326 = vrot.lane.b32.xlu0 %v6808_v19, %s5704_s16 }
 0xa19   :  { %4330 = vrot.lane.b32.xlu0 %v5572_v2, %s5704_s16 }
 0xa1d   :  { %4350 = vrot.lane.b32.xlu0 %v6800_v11, %s5705_s17 }
 0xa21   :  { %4354 = vrot.lane.b32.xlu0 %v6804_v30, %s5705_s17 }
 0xa25   :  { %4358 = vrot.lane.b32.xlu0 %v6808_v19, %s5705_s17 }
 0xa29   :  { %4362 = vrot.lane.b32.xlu0 %v5572_v2, %s5705_s17 }
 0xa2d   :  { %4382 = vrot.lane.b32.xlu0 %v6800_v11, %s5706_s18  ;;  %v3925_v45 = vpop.permute.xlu1 %3924 }
 0xa2e   :  { %v3941_v61 = vsub.f32 %v6573_v5, %v3925_v45  ;;  %v3888_v45 = vmul.f32 1.442695, %v3879_v56 }
 0xa30   :  { %v3956_v29 = vmul.f32 1.442695, %v3941_v61  ;;  %v3881_v61 = vsub.f32 %v6262_v15, %v6598_v25 }
 0xa31   :  { %4386 = vrot.lane.b32.xlu0 %v6804_v30, %s5706_s18  ;;  %v3973_v6 = vpop.permute.xlu1 %3972 }
 0xa32   :  { %5573 = vpow2.f32 %v3956_v29  ;;  %v3989_v55 = vsub.f32 %v6573_v5, %v3973_v6  ;;  %v3892_v6 = vmul.f32 1.442695, %v3881_v61 }
 0xa34   :  { %v4004_v43 = vmul.f32 1.442695, %v3989_v55  ;;  %v3883_v55 = vsub.f32 %v6456_v20, %v6603_v46 }
 0xa35   :  { %4390 = vrot.lane.b32.xlu0 %v6808_v19, %s5706_s18  ;;  %v4021_v16 = vpop.permute.xlu1 %4020 }
 0xa36   :  { %5575 = vpow2.f32 %v4004_v43  ;;  %v4037_v38 = vsub.f32 %v6573_v5, %v4021_v16  ;;  %v3896_v16 = vmul.f32 1.442695, %v3883_v55 }
 0xa38   :  { %v4052_v54 = vmul.f32 1.442695, %v4037_v38 }
 0xa39   :  { %4394 = vrot.lane.b32.xlu0 %v5572_v2, %s5706_s18  ;;  %v4069_v32 = vpop.permute.xlu1 %4068 }
 0xa3a   :  { %5577 = vpow2.f32 %v4052_v54  ;;  %v4085_v21 = vsub.f32 %v6573_v5, %v4069_v32 }
 0xa3c   :  { %v6840_v49 = vpop.eup %5573  ;;  %v4100_v47 = vmul.f32 1.442695, %v4085_v21 }
 0xa3d   :  { %7021 = vst [vmem:[#allocation13_spill] sm:$0xff] %v6840_v49  ;;  %4124 = vrot.lane.b32.xlu1 %v6840_v49, %s5699_s10 }
 0xa3e   :  { %5579 = vpow2.f32 %v4100_v47  ;;  %v4113_v51 = vpop.permute.xlu1 %4112 }
 0xa3f   :  { %5581 = vpow2.f32 %v3888_v45 }
 0xa40   :  { %v6844_v63 = vpop.eup %5575  ;;  %5583 = vpow2.f32 %v3892_v6 }
 0xa41   :  { %7022 = vst [vmem:[#allocation14_spill] sm:$0xff] %v6844_v63  ;;  %4164 = vrot.lane.b32.xlu1 %v6844_v63, %s5700_s11  ;;  %5585 = vpow2.f32 %v3896_v16 }
 0xa42   :  { %v4117_v22 = vpop.permute.xlu1 %4116 }
 0xa44   :  { %v6848_v48 = vpop.eup %5577 }
 0xa45   :  { %7023 = vst [vmem:[#allocation15_spill] sm:$0xff] %v6848_v48  ;;  %4204 = vrot.lane.b32.xlu1 %v6848_v48, %s5701_s12 }
 0xa46   :  { %v4121_v1 = vpop.permute.xlu1 %4120 }
 0xa48   :  { %v6852_v10 = vpop.eup %5579 }
 0xa49   :  { %7024 = vst [vmem:[#allocation16_spill] sm:$0xff] %v6852_v10  ;;  %4244 = vrot.lane.b32.xlu1 %v6852_v10, %s5702_s13  ;;  %v5582_v32 = vpop.eup %5581 }
 0xa4a   :  { %v4153_v2 = vpop.permute.xlu1 %4152  ;;  %v4135_v21 = vadd.f32 %v5582_v32, %v4113_v51  ;;  %v5584_v47 = vpop.eup %5583 }
 0xa4b   :  { %v4137_v56 = vadd.f32 %v5584_v47, %v4117_v22  ;;  %v5586_v61 = vpop.eup %5585 }
 0xa4c   :  { %v4175_v7 = vadd.f32 %v4153_v2, %v4135_v21  ;;  %v4139_v48 = vadd.f32 %v5586_v61, %v4121_v1 }
 0xa4e   :  { %v4157_v29 = vpop.permute.xlu1 %4156 }
 0xa4f   :  { %v4177_v25 = vadd.f32 %v4157_v29, %v4137_v56 }
 0xa52   :  { %v4161_v43 = vpop.permute.xlu1 %4160 }
 0xa53   :  { %v4179_v46 = vadd.f32 %v4161_v43, %v4139_v48 }
 0xa56   :  { %v4193_v38 = vpop.permute.xlu1 %4192 }
 0xa57   :  { %v4215_v10 = vadd.f32 %v4193_v38, %v4175_v7 }
 0xa5a   :  { %v4197_v54 = vpop.permute.xlu1 %4196 }
 0xa5b   :  { %v4217_v63 = vadd.f32 %v4197_v54, %v4177_v25 }
 0xa5e   :  { %v4201_v52 = vpop.permute.xlu1 %4200 }
 0xa5f   :  { %v4219_v55 = vadd.f32 %v4201_v52, %v4179_v46 }
 0xa62   :  { %v4233_v15 = vpop.permute.xlu1 %4232 }
 0xa63   :  { %v4255_v45 = vadd.f32 %v4233_v15, %v4215_v10 }
 0xa65   :  { %5587 = vrcp.f32 %v4255_v45  ;;  %v4270_v45 = vmul.f32 %v6800_v11, %v6766_v3  ;;  %v4272_v3 = vmul.f32 %v6804_v30, %v6776_v40 }
 0xa66   :  { %v4237_v20 = vpop.permute.xlu1 %4236 }
 0xa67   :  { %v4257_v6 = vadd.f32 %v4237_v20, %v4217_v63 }
 0xa69   :  { %5589 = vrcp.f32 %v4257_v6 }
 0xa6a   :  { %v4241_v16 = vpop.permute.xlu1 %4240 }
 0xa6b   :  { %v4259_v49 = vadd.f32 %v4241_v16, %v4219_v55 }
 0xa6d   :  { %5591 = vrcp.f32 %v4259_v49 }
 0xa6f   :  { %v5588_v51 = vpop.eup %5587  ;;  %v4287_v2 = vpop.permute.xlu0 %4286 }
 0xa70   :  { %4288 = vrot.lane.b32.xlu1 %v5588_v51, %s5703_s6  ;;  %v6863_v22 = vmul.f32 %v5588_v51, %v5582_v32  ;;  %v4310_v56 = vmul.f32 %v6560_v9, %v4287_v2 }
 0xa72   :  { %v4414_v20 = vsel %vm90_vm1, %v4270_v45, %v4310_v56 }
 0xa73   :  { %v5590_v29 = vpop.eup %5589  ;;  %v4291_v10 = vpop.permute.xlu0 %4290 }
 0xa74   :  { %4292 = vrot.lane.b32.xlu1 %v5590_v29, %s5703_s6  ;;  %v6866_v1 = vmul.f32 %v5590_v29, %v5584_v47  ;;  %v4312_v46 = vmul.f32 %v6564_v42, %v4291_v10 }
 0xa76   :  { %v4416_v42 = vsel %vm90_vm1, %v4272_v3, %v4312_v46 }
 0xa77   :  { %v5592_v38 = vpop.eup %5591  ;;  %v4295_v48 = vpop.permute.xlu0 %4294 }
 0xa78   :  { %4296 = vrot.lane.b32.xlu1 %v5592_v38, %s5703_s6  ;;  %v6869_v63 = vmul.f32 %v5592_v38, %v5586_v61 }
 0xa7b   :  { %v4299_v43 = vpop.permute.xlu0 %4298 }
 0xa7c   :  { %4320 = vrot.lane.b32.xlu1 %v5588_v51, %s5704_s16 }
 0xa7f   :  { %v4319_v49 = vpop.permute.xlu0 %4318 }
 0xa80   :  { %4324 = vrot.lane.b32.xlu1 %v5590_v29, %s5704_s16  ;;  %v4342_v25 = vmul.f32 %v6618_v8, %v4319_v49 }
 0xa82   :  { %v4423_v9 = vsel %vm4422_vm4, %v4414_v20, %v4342_v25 }
 0xa83   :  { %v4323_v54 = vpop.permute.xlu0 %4322 }
 0xa84   :  { %4328 = vrot.lane.b32.xlu1 %v5592_v38, %s5704_s16  ;;  %v4344_v55 = vmul.f32 %v6625_v18, %v4323_v54  ;;  %v3885_v18 = vsub.f32 %v6573_v5, %v6689_v62 }
 0xa86   :  { %v3900_v62 = vmul.f32 1.442695, %v3885_v18 }
 0xa87   :  { %v4327_v32 = vpop.permute.xlu0 %4326 }
 0xa88   :  { %4352 = vrot.lane.b32.xlu1 %v5588_v51, %s5705_s17  ;;  %v4346_v40 = vmul.f32 %v6632_v4, %v4327_v32  ;;  %5593 = vpow2.f32 %v3900_v62 }
 0xa8b   :  { %v4331_v21 = vpop.permute.xlu0 %4330 }
 0xa8c   :  { %4356 = vrot.lane.b32.xlu1 %v5590_v29, %s5705_s17 }
 0xa8f   :  { %v4351_v52 = vpop.permute.xlu0 %4350 }
 0xa90   :  { %4360 = vrot.lane.b32.xlu1 %v5592_v38, %s5705_s17  ;;  %v4374_v61 = vmul.f32 %v6646_v60, %v4351_v52 }
 0xa92   :  { %v4432_v11 = vsel %vm4431_vm5, %v4423_v9, %v4374_v61  ;;  %v5594_v52 = vpop.eup %5593 }
 0xa93   :  { %v4355_v7 = vpop.permute.xlu0 %4354 }
 0xa94   :  { %4384 = vrot.lane.b32.xlu1 %v5588_v51, %s5706_s18  ;;  %v4376_v60 = vmul.f32 %v6653_v28, %v4355_v7  ;;  %v4314_v51 = vmul.f32 %v6568_v23, %v4295_v48  ;;  %v4274_v28 = vmul.f32 %v6808_v19, %v6785_v37  ;;  %v4316_v48 = vmul.f32 %v6611_v58, %v4299_v43 }
 0xa96   :  { %v4420_v54 = vsel %vm90_vm1, %v6813_v13, %v4316_v48 }
 0xa97   :  { %v4359_v47 = vpop.permute.xlu0 %4358 }
 0xa98   :  { %4388 = vrot.lane.b32.xlu1 %v5590_v29, %s5706_s18  ;;  %v4378_v10 = vmul.f32 %v6660_v33, %v4359_v47 }
 0xa9b   :  { %v4363_v15 = vpop.permute.xlu0 %4362 }
 0xa9c   :  { %4392 = vrot.lane.b32.xlu1 %v5592_v38, %s5706_s18  ;;  %v4418_v38 = vsel %vm90_vm1, %v4274_v28, %v4314_v51  ;;  %v4380_v33 = vmul.f32 %v6667_v36, %v4363_v15 }
 0xa9d   :  { %v4427_v4 = vsel %vm4422_vm4, %v4418_v38, %v4346_v40 }
 0xa9e   :  { %v4436_v19 = vsel %vm4431_vm5, %v4427_v4, %v4378_v10 }
 0xa9f   :  { %v4383_v6 = vpop.permute.xlu0 %4382 }
 0xaa0   :  { %v4406_v8 = vmul.f32 %v6672_v41, %v4383_v6  ;;  %v4425_v41 = vsel %vm4422_vm4, %v4416_v42, %v4344_v55 }
 0xaa1   :  { %v4434_v29 = vsel %vm4431_vm5, %v4425_v41, %v4376_v60 }
 0xaa2   :  { %v4441_v16 = vsel %vm4440_vm6, %v4432_v11, %v4406_v8 }
 0xaa3   :  { %4450 = vst.msk [vmem:[#allocation6] sm:$0x3] %vm4449_vm7, %v4441_v16  ;;  %v4387_v2 = vpop.permute.xlu0 %4386 }
 0xaa4   :  { %v4408_v30 = vmul.f32 %v6676_v44, %v4387_v2  ;;  %v4348_v44 = vmul.f32 %v6639_v59, %v4331_v21 }
 0xaa6   :  { %v4443_v23 = vsel %vm4440_vm6, %v4434_v29, %v4408_v30  ;;  %v4429_v43 = vsel %vm4422_vm4, %v4420_v54, %v4348_v44 }
 0xaa7   :  { %4452 = vst.msk [vmem:[#allocation6 + $0x4] sm:$0x3] %vm4449_vm7, %v4443_v23  ;;  %v4391_v5 = vpop.permute.xlu0 %4390  ;;  %v4438_v59 = vsel %vm4431_vm5, %v4429_v43, %v4380_v33 }
 0xaa8   :  { %v4410_v37 = vmul.f32 %v6680_v26, %v4391_v5 }
 0xaaa   :  { %v4445_v49 = vsel %vm4440_vm6, %v4436_v19, %v4410_v37 }
 0xaab   :  { %4454 = vst.msk [vmem:[#allocation6 + $0x8] sm:$0x3] %vm4449_vm7, %v4445_v49  ;;  %v4395_v58 = vpop.permute.xlu0 %4394 }
 0xaac   :  { %v4412_v32 = vmul.f32 %v6684_v53, %v4395_v58 }
 0xaae   :  { %v4447_v26 = vsel %vm4440_vm6, %v4438_v59, %v4412_v32 }
 0xaaf   :  { %4456 = vst.msk [vmem:[#allocation6 + $0xc] sm:$0x3] %vm4449_vm7, %v4447_v26  ;;  %v4125_v36 = vpop.permute.xlu1 %4124 }
 0xab0   :  { %v4141_v7 = vadd.f32 %v5594_v52, %v4125_v36 }
 0xab3   :  { %v4165_v21 = vpop.permute.xlu1 %4164 }
 0xab4   :  { %v4181_v13 = vadd.f32 %v4165_v21, %v4141_v7 }
 0xab7   :  { %v4205_v47 = vpop.permute.xlu1 %4204 }
 0xab8   :  { %v4221_v56 = vadd.f32 %v4205_v47, %v4181_v13 }
 0xabb   :  { %v4245_v15 = vpop.permute.xlu1 %4244 }
 0xabc   :  { %v4261_v25 = vadd.f32 %v4245_v15, %v4221_v56 }
 0xabe   :  { %5595 = vrcp.f32 %v4261_v25 }
 0xac8   :  { %v5596_v45 = vpop.eup %5595 }
 0xac9   :  { %4300 = vrot.lane.b32.xlu1 %v5596_v45, %s5703_s6  ;;  %v6926_v53 = vmul.f32 %v5596_v45, %v5594_v52 }
 0xacd   :  { %4332 = vrot.lane.b32.xlu1 %v5596_v45, %s5704_s16 }
 0xace   :  { %5631 = shalt.err (!%p5628_p12)
}
 0xacf   :  { %s5632_s23 = scalar_lea.hbm %s7015_s8, 32 }
 0xad0   :  { %p5633_p13 = scmp.ne.s32.totalorder %s7015_s8, %s5632_s23  ;;  %p5636_p0 = scmp.lt.u32.totalorder %s5632_s23, %s7015_s8 }
 0xad2   :  { %p5638_p1 = pnand %p5636_p0, %p5633_p13 }
 0xad4   :  { %5641 = shalt.err (!%p5638_p1)
}
 0xad5   :  { %4479 = dma.vmem_to_hbm [thread:$0]  %s4477_s20, 32, %s7015_s8, [#allocation8]   ;;  %4364 = vrot.lane.b32.xlu1 %v5596_v45, %s5705_s17 }
 0xad6   :  { %s5708_s1 = smov [#allocation9]  }
 0xad7   :  { %s4486_s28 = sshll.u32 %s5708_s1, 4  ;;  %s4487_s28 = int_to_ptr.vmem [resolvable:$true] %s4486_s28 }
 0xad8   :  { %s5642_s5 = scalar_lea.vmem %s4487_s28, 32  ;;  %p5647_p3 = scmp.lt.s32.totalorder %s4487_s28, %s4487_s28 }
 0xad9   :  { %p5643_p2 = scmp.ne.s32.totalorder %s4487_s28, %s5642_s5  ;;  %p5648_p4 = scmp.lt.s32.totalorder %s5642_s5, %s5642_s5 }
 0xadb   :  { %p5649_p5 = por %p5648_p4, %p5647_p3 }
 0xadd   :  { %p5650_p6 = pnand %p5649_p5, %p5643_p2 }
 0xadf   :  { %5653 = shalt.err (!%p5650_p6)
}
 0xae0   :  { %s5654_s30 = scalar_lea.hbm %s7016_s9, 32 }
 0xae1   :  { %p5655_p7 = scmp.ne.s32.totalorder %s7016_s9, %s5654_s30  ;;  %p5658_p8 = scmp.lt.u32.totalorder %s5654_s30, %s7016_s9 }
 0xae3   :  { %p5660_p9 = pnand %p5658_p8, %p5655_p7 }
 0xae5   :  { %5663 = shalt.err (!%p5660_p9)
}
 0xae6   :  { %4489 = dma.vmem_to_hbm [thread:$0]  %s4487_s28, 32, %s7016_s9, [#allocation8]   ;;  %4396 = vrot.lane.b32.xlu1 %v5596_v45, %s5706_s18  ;;  %v4289_v61 = vpop.permute.xlu1 %4288  ;;  %v7025_v62 = vld [vmem:[#allocation13_spill] sm:$0xff]  ;;  %v7026_v37 = vld [vmem:[#allocation14_spill] sm:$0xff]  ;;  %v7027_v19 = vld [vmem:[#allocation15_spill] sm:$0xff] }
 0xae7   :  { %v4311_v11 = vmul.f32 %v6709_v27, %v4289_v61  ;;  %s5709_s9 = smov [#allocation6]   ;;  %v7028_v58 = vld [vmem:[#allocation16_spill] sm:$0xff] }
 0xae8   :  { %s4463_s15 = sshll.u32 %s5709_s9, 4  ;;  %s4464_s15 = int_to_ptr.vmem [resolvable:$true] %s4463_s15 }
 0xae9   :  { %v4415_v51 = vsel %vm90_vm1, %v6863_v22, %v4311_v11  ;;  %s5664_s6 = scalar_lea.vmem %s4464_s15, 256  ;;  %p5669_p11 = scmp.lt.s32.totalorder %s4464_s15, %s4464_s15 }
 0xaea   :  { %v4293_v20 = vpop.permute.xlu1 %4292  ;;  %p5665_p10 = scmp.ne.s32.totalorder %s4464_s15, %s5664_s6  ;;  %p5670_p12 = scmp.lt.s32.totalorder %s5664_s6, %s5664_s6 }
 0xaeb   :  { %v4313_v2 = vmul.f32 %v6716_v35, %v4293_v20 }
 0xaec   :  { %p5671_p13 = por %p5670_p12, %p5669_p11 }
 0xaee   :  { %v4297_v46 = vpop.permute.xlu1 %4296  ;;  %p5672_p0 = pnand %p5671_p13, %p5665_p10 }
 0xaef   :  { %v4315_v22 = vmul.f32 %v6723_v31, %v4297_v46 }
 0xaf2   :  { %v4321_v6 = vpop.permute.xlu1 %4320 }
 0xaf3   :  { %v4343_v16 = vmul.f32 %v6730_v57, %v4321_v6 }
 0xaf5   :  { %v4424_v41 = vsel %vm4422_vm4, %v4415_v51, %v4343_v16 }
 0xaf6   :  { %v4325_v9 = vpop.permute.xlu1 %4324 }
 0xaf7   :  { %v4345_v40 = vmul.f32 %v6739_v12, %v4325_v9 }
 0xafa   :  { %v4329_v55 = vpop.permute.xlu1 %4328 }
 0xafb   :  { %v4347_v12 = vmul.f32 %v6748_v24, %v4329_v55 }
 0xafe   :  { %v4353_v8 = vpop.permute.xlu1 %4352 }
 0xaff   :  { %v4375_v42 = vmul.f32 %v6755_v34, %v4353_v8  ;;  %v4417_v34 = vsel %vm90_vm1, %v6866_v1, %v4313_v2  ;;  %v4419_v1 = vsel %vm90_vm1, %v6869_v63, %v4315_v22 }
 0xb00   :  { %v4426_v29 = vsel %vm4422_vm4, %v4417_v34, %v4345_v40  ;;  %v4428_v38 = vsel %vm4422_vm4, %v4419_v1, %v4347_v12 }
 0xb01   :  { %v4433_v28 = vsel %vm4431_vm5, %v4424_v41, %v4375_v42 }
 0xb02   :  { %v4357_v3 = vpop.permute.xlu1 %4356 }
 0xb03   :  { %v4377_v27 = vmul.f32 %v6762_v50, %v4357_v3 }
 0xb05   :  { %v4435_v10 = vsel %vm4431_vm5, %v4426_v29, %v4377_v27 }
 0xb06   :  { %v4361_v60 = vpop.permute.xlu1 %4360 }
 0xb07   :  { %v4379_v50 = vmul.f32 %v6771_v17, %v4361_v60 }
 0xb09   :  { %v4437_v24 = vsel %vm4431_vm5, %v4428_v38, %v4379_v50 }
 0xb0a   :  { %v4385_v18 = vpop.permute.xlu1 %4384 }
 0xb0b   :  { %v4407_v30 = vmul.f32 %v6780_v14, %v4385_v18 }
 0xb0d   :  { %v4442_v57 = vsel %vm4440_vm6, %v4433_v28, %v4407_v30 }
 0xb0e   :  { %4451 = vst.msk [vmem:[#allocation6 + $0x2] sm:$0x3] %vm4449_vm7, %v4442_v57  ;;  %v4389_v35 = vpop.permute.xlu1 %4388 }
 0xb0f   :  { %v4409_v14 = vmul.f32 %v6789_v39, %v4389_v35 }
 0xb11   :  { %v4444_v23 = vsel %vm4440_vm6, %v4435_v10, %v4409_v14 }
 0xb12   :  { %4453 = vst.msk [vmem:[#allocation6 + $0x6] sm:$0x3] %vm4449_vm7, %v4444_v23  ;;  %v4393_v31 = vpop.permute.xlu1 %4392 }
 0xb13   :  { %v4411_v48 = vmul.f32 %v6795_v0, %v4393_v31 }
 0xb15   :  { %v4446_v39 = vsel %vm4440_vm6, %v4437_v24, %v4411_v48 }
 0xb16   :  { %4455 = vst.msk [vmem:[#allocation6 + $0xa] sm:$0x3] %vm4449_vm7, %v4446_v39 }
 0xb3b   :  { %v4301_v5 = vpop.permute.xlu1 %4300 }
 0xb3c   :  { %v4317_v4 = vmul.f32 %v7025_v62, %v4301_v5 }
 0xb3e   :  { %v4421_v0 = vsel %vm90_vm1, %v6926_v53, %v4317_v4 }
 0xb3f   :  { %v4333_v17 = vpop.permute.xlu1 %4332 }
 0xb40   :  { %v4349_v63 = vmul.f32 %v7026_v37, %v4333_v17 }
 0xb42   :  { %v4430_v54 = vsel %vm4422_vm4, %v4421_v0, %v4349_v63 }
 0xb47   :  { %v4365_v44 = vpop.permute.xlu1 %4364 }
 0xb48   :  { %v4381_v33 = vmul.f32 %v7027_v19, %v4365_v44 }
 0xb4a   :  { %v4439_v32 = vsel %vm4431_vm5, %v4430_v54, %v4381_v33 }
 0xb58   :  { %v4397_v49 = vpop.permute.xlu1 %4396 }
 0xb59   :  { %v4413_v43 = vmul.f32 %v7028_v58, %v4397_v49 }
 0xb5b   :  { %v4448_v59 = vsel %vm4440_vm6, %v4439_v32, %v4413_v43 }
 0xb5c   :  { %4457 = vst.msk [vmem:[#allocation6 + $0xe] sm:$0x3] %vm4449_vm7, %v4448_v59 }
 0xb5d   :  { %5675 = shalt.err (!%p5672_p0)
}
 0xb5e   :  { %s5676_s18 = scalar_lea.hbm %s7014_s7, 256 }
 0xb5f   :  { %p5677_p1 = scmp.ne.s32.totalorder %s7014_s7, %s5676_s18  ;;  %p5680_p2 = scmp.lt.u32.totalorder %s5676_s18, %s7014_s7 }
 0xb61   :  { %p5682_p3 = pnand %p5680_p2, %p5677_p1 }
 0xb63   :  { %5685 = shalt.err (!%p5682_p3)
}
 0xb64   :  { %s5710_s4 = smov 32   ;;  %s5711_s23 = smov 2  }
 0xb65   :  { %4469 = dma.vmem_to_hbm [thread:$0]  %s4464_s15, 256, %s7014_s7, [#allocation5], %s5710_s4, %s5710_s4, %s5711_s23  }
 0xb66   :  { %5688 = dma.done.wait [#allocation5], 256  }
 0xb67   :  { %5689 = vsyncadd [#allocation5], 4294967040 }
 0xb68   :  { %5690 = dma.done.wait [#allocation8], 64  }
 0xb69   :  { %5691 = vsyncadd [#allocation8], 4294967232 }
 0xb6a   :  { %4499 = vsyncpa [#allocation4], 1 }
 0xb6b   :  { %4500 = vsyncpa [#allocation5], 1 }
 0xb6c   :  { %4501 = vsyncpa [#allocation8], 1 }

</bundles_post_ra>
